<compile_context>
chip_gen: v7x
topology: tpu7x:2x2x1
jax: 0.10.0
libtpu: 0.0.40
codegen_flags: <defaults>
</compile_context>

<pallas_src>
import jax
import jax.numpy as jnp
from jax.experimental import pallas as pl
from jax.experimental.pallas import tpu as pltpu


def _head_kernel(ids_ref,               # SMEM (B,)  i32   -- scalar prefetch
                 cls_ref,               # VMEM (TB, HH) f32 -- CLS rows only
                 wd_ref, bd_ref,        # VMEM (HH, H) bf16, (1, H)  f32
                 w1_ref, b1_ref,        # VMEM (E, N1) bf16, (1, N1) f32
                 w3_ref, b3_ref,        # VMEM (N1, T) bf16, (1, T)  f32
                 uemb_hbm,              # ANY  (num_users, E) f32 -- stays in HBM
                 out_ref,               # VMEM (1, 1, TB) f32 -- lane-dense row
                 u_buf,                 # VMEM scratch (2, TB, E) f32
                 sem):                  # DMA semaphores (2,) -- one per slot
    i1 = pl.program_id(1)               # inner ("arbitrary") tile index
    n_inner = pl.num_programs(1)
    tile = pl.program_id(0) * n_inner + i1   # global batch-tile index
    TB = u_buf.shape[1]
    num_users = uemb_hbm.shape[0]

    cur_slot = i1 % 2
    nxt_slot = 1 - cur_slot

    def start_gather(first_row, slot):
        # TB independent row DMAs, all signalling sem[slot].  They are waited
        # with ONE counted wait (the sum of the row sizes equals the size of
        # u_buf[slot]).  ids are clamped so a bad id can't fault the DMA engine.
        for b in range(TB):               # static unroll; TB known at trace time
            uid = jnp.clip(ids_ref[first_row + b], 0, num_users - 1)
            pltpu.make_async_copy(uemb_hbm.at[uid], u_buf.at[slot, b],
                                  sem.at[slot]).start()

    # Prime the current slot on this core's FIRST inner step.  Each core of a
    # megacore split starts its chunk at i1 == 0, so this is safe under
    # dimension_semantics=("parallel", "arbitrary").
    @pl.when(i1 == 0)
    def _():
        start_gather(tile * TB, cur_slot)

    # Cross-iteration prefetch: start the NEXT tile's gather into the other
    # slot; it completes while this tile (and the pipeline's own DMAs) run.
    @pl.when(i1 + 1 < n_inner)
    def _():
        start_gather((tile + 1) * TB, nxt_slot)

    # ---- text branch: x = tanh(dense(dropout(features[:, 0, :]))) ---------
    # dropout == identity (eval); bf16 MXU operands, f32 accumulation.
    # Runs while the gather DMAs are in flight.
    x = jnp.dot(cls_ref[...].astype(jnp.bfloat16), wd_ref[...],
                preferred_element_type=jnp.float32)
    x = jnp.tanh(x + bd_ref[...])

    # ---- one counted wait for all TB row copies of the current slot -------
    pltpu.make_async_copy(u_buf.at[cur_slot], u_buf.at[cur_slot],
                          sem.at[cur_slot]).wait()

    # ---- user branch: U = lin3(relu(lin1(relu(user_emb[ann_ids])))) -------
    u = jnp.maximum(u_buf[cur_slot], 0.0)                          # relu, f32
    u = jnp.dot(u.astype(jnp.bfloat16), w1_ref[...],
                preferred_element_type=jnp.float32) + b1_ref[...]
    u = jnp.maximum(u, 0.0)
    u = jnp.dot(u.astype(jnp.bfloat16), w3_ref[...],
                preferred_element_type=jnp.float32) + b3_ref[...]

    # ---- (U * x).sum(1) -> lane-dense (TB,) row of the output slab --------
    out_ref[0, 0, :] = jnp.sum(u * x, axis=1)


def _pick_tile_b(batch):
    """Largest tile <= 256 that divides the batch; prefer keeping >= 2 tiles
    so the parallel axis can shard across 2 TensorCores on megacore parts."""
    for cand in (256, 128, 64, 32, 16, 8):
        if batch % cand == 0 and batch // cand >= 2:
            return cand
    for cand in (256, 128, 64, 32, 16, 8):
        if batch % cand == 0:
            return cand
    raise ValueError("batch size must be a multiple of 8")


def _vmem_budget_bytes(tile_b, HH, H, E, N1, T):
    """Per-generation VMEM budget: actual resident bytes + headroom, capped by
    the chip's physical VMEM (falls back to 64 MiB if undetectable)."""
    weights = (HH * H + E * N1 + N1 * T) * 2 + (H + N1 + T) * 4   # bf16 w, f32 b
    need = (2 * weights                 # weight/bias blocks (double-buffered)
            + 2 * tile_b * HH * 4       # CLS feature block (double-buffered)
            + 2 * tile_b * E * 4        # u_buf scratch (2 slots)
            + 2 * tile_b * 4)           # output block
    budget = int(need * 1.5) + (4 << 20)
    try:
        cap = pltpu.get_tpu_info().vmem_capacity_bytes
    except Exception:
        cap = 64 << 20
    return max(16 << 20, min(budget, cap * 3 // 4))


def roberta_recsys_head(features, ann_ids, params, *, tile_b=None):
    """features: (B, S, HH) f32, ann_ids: (B,) i32. Returns (B,) f32."""
    B, S, HH = features.shape
    H = params["dense_w"].shape[1]
    E = params["user_emb"].shape[1]
    N1 = params["lin1_w"].shape[1]
    T = params["lin3_w"].shape[1]
    assert T == H, "(U * x).sum(1) requires text_dim == hidden_size"
    assert E % 128 == 0, "emb rows must be lane-aligned for the counted-wait gather"

    if tile_b is None:
        tile_b = _pick_tile_b(B)
    assert B % tile_b == 0 and tile_b % 8 == 0, "batch must be a multiple of tile_b (>=8)"

    num_tiles = B // tile_b
    num_splits = 2 if num_tiles % 2 == 0 else 1       # parallel axis (2 TCs on v7x)
    tps = num_tiles // num_splits                     # inner (arbitrary) axis

    # CLS-only fetch: cheap XLA slice so the kernel never sees the seq dim.
    cls = features[:, 0, :]                            # (B, HH)

    def tiled(i0, i1, ids):                            # global batch-tile index
        return (i0 * tps + i1, 0)

    # Weights use a constant index_map -> DMA'd once per core, VMEM-resident.
    # TODO(synk): add pipeline_mode=pl.Buffered(1) to the constant weight specs
    # (saves ~4 MB VMEM at prod sizes on v7x) once verified on the target build.
    grid_spec = pltpu.PrefetchScalarGridSpec(
        num_scalar_prefetch=1,                         # ann_ids -> SMEM
        grid=(num_splits, tps),
        in_specs=[
            pl.BlockSpec((tile_b, HH), tiled),                    # CLS features
            pl.BlockSpec((HH, H), lambda i0, i1, ids: (0, 0)),    # dense_w
            pl.BlockSpec((1, H),  lambda i0, i1, ids: (0, 0)),    # dense_b
            pl.BlockSpec((E, N1), lambda i0, i1, ids: (0, 0)),    # lin1_w
            pl.BlockSpec((1, N1), lambda i0, i1, ids: (0, 0)),    # lin1_b
            pl.BlockSpec((N1, T), lambda i0, i1, ids: (0, 0)),    # lin3_w
            pl.BlockSpec((1, T),  lambda i0, i1, ids: (0, 0)),    # lin3_b
            pl.BlockSpec(memory_space=pl.ANY),                    # user_emb (HBM)
        ],
        out_specs=pl.BlockSpec((1, 1, tile_b),
                               lambda i0, i1, ids: (i0 * tps + i1, 0, 0)),
        scratch_shapes=[
            pltpu.VMEM((2, tile_b, E), jnp.float32),   # double-buffered gather
            pltpu.SemaphoreType.DMA((2,)),             # one sem per slot
        ],
    )

    out = pl.pallas_call(
        _head_kernel,
        out_shape=jax.ShapeDtypeStruct((num_tiles, 1, tile_b), jnp.float32),
        grid_spec=grid_spec,
        compiler_params=pltpu.CompilerParams(
            dimension_semantics=("parallel", "arbitrary"),
            vmem_limit_bytes=_vmem_budget_bytes(tile_b, HH, H, E, N1, T),
        ),
    )(
        ann_ids, cls,
        params["dense_w"], params["dense_b"],
        params["lin1_w"], params["lin1_b"],
        params["lin3_w"], params["lin3_b"],
        params["user_emb"],
    )
    return out.reshape(B)


def _reference(features, ann_ids, params):
    """Pure-JAX reference with the same bf16-operand / f32-accumulate recipe."""
    x0 = features[:, 0, :].astype(jnp.bfloat16)
    x = jnp.dot(x0, params["dense_w"], preferred_element_type=jnp.float32)
    x = jnp.tanh(x + params["dense_b"][0])
    u = jnp.maximum(params["user_emb"][ann_ids], 0.0)
    u = jnp.dot(u.astype(jnp.bfloat16), params["lin1_w"],
                preferred_element_type=jnp.float32) + params["lin1_b"][0]
    u = jnp.maximum(u, 0.0)
    u = jnp.dot(u.astype(jnp.bfloat16), params["lin3_w"],
                preferred_element_type=jnp.float32) + params["lin3_b"][0]
    return jnp.sum(u * x, axis=1)


def _reference_f32(features, ann_ids, params):
    """All-f32 activations (weights still bf16-rounded) -- loose parity check."""
    x = jnp.tanh(features[:, 0, :] @ params["dense_w"].astype(jnp.float32)
                 + params["dense_b"][0])
    u = jnp.maximum(params["user_emb"][ann_ids], 0.0)
    u = jnp.maximum(u @ params["lin1_w"].astype(jnp.float32) + params["lin1_b"][0], 0.0)
    u = u @ params["lin3_w"].astype(jnp.float32) + params["lin3_b"][0]
    return jnp.sum(u * x, axis=1)


def init_params(key, *, num_users, emb_size, hidden, head_hidden, n_hidden_1, text_dim):
    keys = jax.random.split(key, 7)
    s = 0.02
    return {
        # Embedding rows stay f32 so each in-kernel row gather is a clean,
        # lane-aligned DMA on every generation (v5e has no bf16 VPU).
        # TODO(synk): store bf16 rows + bf16 u_buf on v6e/v7x (halves gather DMA).
        "user_emb": (s * jax.random.normal(keys[0], (num_users, emb_size))).astype(jnp.float32),
        # Weights are bf16 MXU operands; biases f32; accumulation f32.
        "dense_w": (s * jax.random.normal(keys[1], (head_hidden, hidden))).astype(jnp.bfloat16),
        "dense_b": (s * jax.random.normal(keys[2], (1, hidden))).astype(jnp.float32),
        "lin1_w":  (s * jax.random.normal(keys[3], (emb_size, n_hidden_1))).astype(jnp.bfloat16),
        "lin1_b":  (s * jax.random.normal(keys[4], (1, n_hidden_1))).astype(jnp.float32),
        "lin3_w":  (s * jax.random.normal(keys[5], (n_hidden_1, text_dim))).astype(jnp.bfloat16),
        "lin3_b":  (s * jax.random.normal(keys[6], (1, text_dim))).astype(jnp.float32),
    }
    # NOTE: out_proj / lin4..lin6 / out_proj_append only matter on the
    # append_combo=True branch, which in the PyTorch source is shape-inconsistent
    # (cat along dim=0 keeps text_dim features but lin4 expects 2*text_dim).
    # TODO(synk): combo branch not implemented due to that inconsistency.


if __name__ == "__main__":
    B, S = 64, 8          # B=64, tile_b=16 -> 4 tiles = 2 parallel x 2 inner,
    HIDDEN = 128          #   exercising both the prime and the cross-iteration
    EMB = 128             #   prefetch paths of the gather.
    N1 = 256
    NUM_USERS = 64

    key = jax.random.PRNGKey(0)
    k_feat, k_ids, k_params = jax.random.split(key, 3)

    features = jax.random.normal(k_feat, (B, S, HIDDEN), jnp.float32)
    ann_ids = jax.random.randint(k_ids, (B,), 0, NUM_USERS, jnp.int32)
    params = init_params(k_params, num_users=NUM_USERS, emb_size=EMB,
                         hidden=HIDDEN, head_hidden=HIDDEN,
                         n_hidden_1=N1, text_dim=EMB)

    out = jax.block_until_ready(roberta_recsys_head(features, ann_ids, params, tile_b=16))
    ref = jax.block_until_ready(_reference(features, ann_ids, params))
    ref32 = jax.block_until_ready(_reference_f32(features, ann_ids, params))

    assert out.shape == (B,)
    assert jnp.allclose(out, ref, atol=5e-4, rtol=1e-2), (out, ref)
    assert jnp.allclose(out, ref32, atol=2e-2, rtol=5e-2), (out, ref32)
    print("KERNEL_OK")
</pallas_src>

<mosaic_0001>
module attributes {stable_mosaic.version = 11 : i64} {
  func.func @_head_kernel(%arg0: i32, %arg1: i32, %arg2: memref<64xi32, #tpu.memory_space<smem>>, %arg3: memref<16x128xf32, #tpu.memory_space<vmem>>, %arg4: memref<128x128xbf16, #tpu.memory_space<vmem>>, %arg5: memref<1x128xf32, #tpu.memory_space<vmem>>, %arg6: memref<128x256xbf16, #tpu.memory_space<vmem>>, %arg7: memref<1x256xf32, #tpu.memory_space<vmem>>, %arg8: memref<256x128xbf16, #tpu.memory_space<vmem>>, %arg9: memref<1x128xf32, #tpu.memory_space<vmem>>, %arg10: memref<64x128xf32, #tpu.memory_space<any>>, %arg11: memref<1x1x16xf32, #tpu.memory_space<vmem>>, %arg12: memref<2x16x128xf32, #tpu.memory_space<vmem>>, %arg13: memref<2x!tpu.dma_semaphore, #tpu.memory_space<semaphore_mem>>) attributes {dimension_semantics = [#tpu.dimension_semantics<parallel>, #tpu.dimension_semantics<arbitrary>], iteration_bounds = array<i64: 2, 2>, scalar_prefetch = 1 : i64, scratch_operands = 2 : i64, tpu.core_type = #tpu.core_type<tc>, window_params = [{transform_indices = @transform_0, window_bounds = array<i64: 16, 128>}, {pipeline_mode = #tpu.pipeline_mode<synchronous>, transform_indices = @transform_1, window_bounds = array<i64: 128, 128>}, {pipeline_mode = #tpu.pipeline_mode<synchronous>, transform_indices = @transform_2, window_bounds = array<i64: 1, 128>}, {pipeline_mode = #tpu.pipeline_mode<synchronous>, transform_indices = @transform_3, window_bounds = array<i64: 128, 256>}, {pipeline_mode = #tpu.pipeline_mode<synchronous>, transform_indices = @transform_4, window_bounds = array<i64: 1, 256>}, {pipeline_mode = #tpu.pipeline_mode<synchronous>, transform_indices = @transform_5, window_bounds = array<i64: 256, 128>}, {pipeline_mode = #tpu.pipeline_mode<synchronous>, transform_indices = @transform_6, window_bounds = array<i64: 1, 128>}, {}, {transform_indices = @transform_8, window_bounds = array<i64: 1, 1, 16>}]} {
    %c2_i32 = arith.constant 2 : i32
    %0 = arith.muli %arg0, %c2_i32 : i32
    %1 = arith.addi %0, %arg1 : i32
    %c2_i32_0 = arith.constant 2 : i32
    %c0_i32 = arith.constant 0 : i32
    %2 = arith.cmpi eq, %c2_i32_0, %c0_i32 : i32
    %c1_i32 = arith.constant 1 : i32
    %3 = arith.select %2, %c1_i32, %c2_i32_0 : i32
    %4 = arith.remsi %arg1, %3 : i32
    %c0_i32_1 = arith.constant 0 : i32
    %5 = arith.cmpi ne, %4, %c0_i32_1 : i32
    %c0_i32_2 = arith.constant 0 : i32
    %6 = arith.cmpi slt, %4, %c0_i32_2 : i32
    %c0_i32_3 = arith.constant 0 : i32
    %7 = arith.cmpi slt, %3, %c0_i32_3 : i32
    %8 = arith.xori %6, %7 : i1
    %9 = arith.andi %8, %5 : i1
    %10 = arith.addi %4, %3 : i32
    %11 = arith.select %9, %10, %4 : i32
    %c1_i32_4 = arith.constant 1 : i32
    %12 = arith.subi %c1_i32_4, %11 : i32
    %c0_i32_5 = arith.constant 0 : i32
    %13 = arith.cmpi eq, %arg1, %c0_i32_5 : i32
    %14 = arith.extui %13 : i1 to i32
    %c0_i32_6 = arith.constant 0 : i32
    %15 = arith.cmpi ne, %14, %c0_i32_6 : i32
    scf.if %15 {
      %c16_i32 = arith.constant 16 : i32
      %58 = arith.muli %1, %c16_i32 : i32
      %c0_i32_37 = arith.constant 0 : i32
      %59 = arith.addi %58, %c0_i32_37 : i32
      %60 = arith.index_cast %59 : i32 to index
      %61 = memref.load %arg2[%60] : memref<64xi32, #tpu.memory_space<smem>>
      %c0_i32_38 = arith.constant 0 : i32
      %c63_i32 = arith.constant 63 : i32
      %62 = arith.maxsi %c0_i32_38, %61 : i32
      %63 = arith.minsi %c63_i32, %62 : i32
      %c0_i32_39 = arith.constant 0 : i32
      %c0_i32_40 = arith.constant 0 : i32
      %64 = tpu.memref_slice %arg10[%63, %c0_i32_40] : memref<64x128xf32, #tpu.memory_space<any>> -> memref<1x128xf32, #tpu.memory_space<any>>
      %65 = tpu.memref_squeeze %64 : memref<1x128xf32, #tpu.memory_space<any>> -> memref<128xf32, #tpu.memory_space<any>>
      %c0_i32_41 = arith.constant 0 : i32
      %66 = tpu.memref_slice %arg12[%11, %c0_i32_39, %c0_i32_41] : memref<2x16x128xf32, #tpu.memory_space<vmem>> -> memref<1x1x128xf32, #tpu.memory_space<vmem>>
      %67 = tpu.memref_squeeze %66 : memref<1x1x128xf32, #tpu.memory_space<vmem>> -> memref<128xf32, #tpu.memory_space<vmem>>
      %68 = tpu.memref_slice %arg13[%11] : memref<2x!tpu.dma_semaphore, #tpu.memory_space<semaphore_mem>> -> memref<1x!tpu.dma_semaphore, #tpu.memory_space<semaphore_mem>>
      %69 = tpu.memref_squeeze %68 : memref<1x!tpu.dma_semaphore, #tpu.memory_space<semaphore_mem>> -> memref<!tpu.dma_semaphore, #tpu.memory_space<semaphore_mem>>
      tpu.enqueue_dma source(%65 : memref<128xf32, #tpu.memory_space<any>>) target(%67 : memref<128xf32, #tpu.memory_space<vmem>>) target_semaphore(%69 : memref<!tpu.dma_semaphore, #tpu.memory_space<semaphore_mem>>)
      %c1_i32_42 = arith.constant 1 : i32
      %70 = arith.addi %58, %c1_i32_42 : i32
      %71 = arith.index_cast %70 : i32 to index
      %72 = memref.load %arg2[%71] : memref<64xi32, #tpu.memory_space<smem>>
      %c0_i32_43 = arith.constant 0 : i32
      %c63_i32_44 = arith.constant 63 : i32
      %73 = arith.maxsi %c0_i32_43, %72 : i32
      %74 = arith.minsi %c63_i32_44, %73 : i32
      %c1_i32_45 = arith.constant 1 : i32
      %c0_i32_46 = arith.constant 0 : i32
      %75 = tpu.memref_slice %arg10[%74, %c0_i32_46] : memref<64x128xf32, #tpu.memory_space<any>> -> memref<1x128xf32, #tpu.memory_space<any>>
      %76 = tpu.memref_squeeze %75 : memref<1x128xf32, #tpu.memory_space<any>> -> memref<128xf32, #tpu.memory_space<any>>
      %c0_i32_47 = arith.constant 0 : i32
      %77 = tpu.memref_slice %arg12[%11, %c1_i32_45, %c0_i32_47] : memref<2x16x128xf32, #tpu.memory_space<vmem>> -> memref<1x1x128xf32, #tpu.memory_space<vmem>>
      %78 = tpu.memref_squeeze %77 : memref<1x1x128xf32, #tpu.memory_space<vmem>> -> memref<128xf32, #tpu.memory_space<vmem>>
      %79 = tpu.memref_slice %arg13[%11] : memref<2x!tpu.dma_semaphore, #tpu.memory_space<semaphore_mem>> -> memref<1x!tpu.dma_semaphore, #tpu.memory_space<semaphore_mem>>
      %80 = tpu.memref_squeeze %79 : memref<1x!tpu.dma_semaphore, #tpu.memory_space<semaphore_mem>> -> memref<!tpu.dma_semaphore, #tpu.memory_space<semaphore_mem>>
      tpu.enqueue_dma source(%76 : memref<128xf32, #tpu.memory_space<any>>) target(%78 : memref<128xf32, #tpu.memory_space<vmem>>) target_semaphore(%80 : memref<!tpu.dma_semaphore, #tpu.memory_space<semaphore_mem>>)
      %c2_i32_48 = arith.constant 2 : i32
      %81 = arith.addi %58, %c2_i32_48 : i32
      %82 = arith.index_cast %81 : i32 to index
      %83 = memref.load %arg2[%82] : memref<64xi32, #tpu.memory_space<smem>>
      %c0_i32_49 = arith.constant 0 : i32
      %c63_i32_50 = arith.constant 63 : i32
      %84 = arith.maxsi %c0_i32_49, %83 : i32
      %85 = arith.minsi %c63_i32_50, %84 : i32
      %c2_i32_51 = arith.constant 2 : i32
      %c0_i32_52 = arith.constant 0 : i32
      %86 = tpu.memref_slice %arg10[%85, %c0_i32_52] : memref<64x128xf32, #tpu.memory_space<any>> -> memref<1x128xf32, #tpu.memory_space<any>>
      %87 = tpu.memref_squeeze %86 : memref<1x128xf32, #tpu.memory_space<any>> -> memref<128xf32, #tpu.memory_space<any>>
      %c0_i32_53 = arith.constant 0 : i32
      %88 = tpu.memref_slice %arg12[%11, %c2_i32_51, %c0_i32_53] : memref<2x16x128xf32, #tpu.memory_space<vmem>> -> memref<1x1x128xf32, #tpu.memory_space<vmem>>
      %89 = tpu.memref_squeeze %88 : memref<1x1x128xf32, #tpu.memory_space<vmem>> -> memref<128xf32, #tpu.memory_space<vmem>>
      %90 = tpu.memref_slice %arg13[%11] : memref<2x!tpu.dma_semaphore, #tpu.memory_space<semaphore_mem>> -> memref<1x!tpu.dma_semaphore, #tpu.memory_space<semaphore_mem>>
      %91 = tpu.memref_squeeze %90 : memref<1x!tpu.dma_semaphore, #tpu.memory_space<semaphore_mem>> -> memref<!tpu.dma_semaphore, #tpu.memory_space<semaphore_mem>>
      tpu.enqueue_dma source(%87 : memref<128xf32, #tpu.memory_space<any>>) target(%89 : memref<128xf32, #tpu.memory_space<vmem>>) target_semaphore(%91 : memref<!tpu.dma_semaphore, #tpu.memory_space<semaphore_mem>>)
      %c3_i32 = arith.constant 3 : i32
      %92 = arith.addi %58, %c3_i32 : i32
      %93 = arith.index_cast %92 : i32 to index
      %94 = memref.load %arg2[%93] : memref<64xi32, #tpu.memory_space<smem>>
      %c0_i32_54 = arith.constant 0 : i32
      %c63_i32_55 = arith.constant 63 : i32
      %95 = arith.maxsi %c0_i32_54, %94 : i32
      %96 = arith.minsi %c63_i32_55, %95 : i32
      %c3_i32_56 = arith.constant 3 : i32
      %c0_i32_57 = arith.constant 0 : i32
      %97 = tpu.memref_slice %arg10[%96, %c0_i32_57] : memref<64x128xf32, #tpu.memory_space<any>> -> memref<1x128xf32, #tpu.memory_space<any>>
      %98 = tpu.memref_squeeze %97 : memref<1x128xf32, #tpu.memory_space<any>> -> memref<128xf32, #tpu.memory_space<any>>
      %c0_i32_58 = arith.constant 0 : i32
      %99 = tpu.memref_slice %arg12[%11, %c3_i32_56, %c0_i32_58] : memref<2x16x128xf32, #tpu.memory_space<vmem>> -> memref<1x1x128xf32, #tpu.memory_space<vmem>>
      %100 = tpu.memref_squeeze %99 : memref<1x1x128xf32, #tpu.memory_space<vmem>> -> memref<128xf32, #tpu.memory_space<vmem>>
      %101 = tpu.memref_slice %arg13[%11] : memref<2x!tpu.dma_semaphore, #tpu.memory_space<semaphore_mem>> -> memref<1x!tpu.dma_semaphore, #tpu.memory_space<semaphore_mem>>
      %102 = tpu.memref_squeeze %101 : memref<1x!tpu.dma_semaphore, #tpu.memory_space<semaphore_mem>> -> memref<!tpu.dma_semaphore, #tpu.memory_space<semaphore_mem>>
      tpu.enqueue_dma source(%98 : memref<128xf32, #tpu.memory_space<any>>) target(%100 : memref<128xf32, #tpu.memory_space<vmem>>) target_semaphore(%102 : memref<!tpu.dma_semaphore, #tpu.memory_space<semaphore_mem>>)
      %c4_i32 = arith.constant 4 : i32
      %103 = arith.addi %58, %c4_i32 : i32
      %104 = arith.index_cast %103 : i32 to index
      %105 = memref.load %arg2[%104] : memref<64xi32, #tpu.memory_space<smem>>
      %c0_i32_59 = arith.constant 0 : i32
      %c63_i32_60 = arith.constant 63 : i32
      %106 = arith.maxsi %c0_i32_59, %105 : i32
      %107 = arith.minsi %c63_i32_60, %106 : i32
      %c4_i32_61 = arith.constant 4 : i32
      %c0_i32_62 = arith.constant 0 : i32
      %108 = tpu.memref_slice %arg10[%107, %c0_i32_62] : memref<64x128xf32, #tpu.memory_space<any>> -> memref<1x128xf32, #tpu.memory_space<any>>
      %109 = tpu.memref_squeeze %108 : memref<1x128xf32, #tpu.memory_space<any>> -> memref<128xf32, #tpu.memory_space<any>>
      %c0_i32_63 = arith.constant 0 : i32
      %110 = tpu.memref_slice %arg12[%11, %c4_i32_61, %c0_i32_63] : memref<2x16x128xf32, #tpu.memory_space<vmem>> -> memref<1x1x128xf32, #tpu.memory_space<vmem>>
      %111 = tpu.memref_squeeze %110 : memref<1x1x128xf32, #tpu.memory_space<vmem>> -> memref<128xf32, #tpu.memory_space<vmem>>
      %112 = tpu.memref_slice %arg13[%11] : memref<2x!tpu.dma_semaphore, #tpu.memory_space<semaphore_mem>> -> memref<1x!tpu.dma_semaphore, #tpu.memory_space<semaphore_mem>>
      %113 = tpu.memref_squeeze %112 : memref<1x!tpu.dma_semaphore, #tpu.memory_space<semaphore_mem>> -> memref<!tpu.dma_semaphore, #tpu.memory_space<semaphore_mem>>
      tpu.enqueue_dma source(%109 : memref<128xf32, #tpu.memory_space<any>>) target(%111 : memref<128xf32, #tpu.memory_space<vmem>>) target_semaphore(%113 : memref<!tpu.dma_semaphore, #tpu.memory_space<semaphore_mem>>)
      %c5_i32 = arith.constant 5 : i32
      %114 = arith.addi %58, %c5_i32 : i32
      %115 = arith.index_cast %114 : i32 to index
      %116 = memref.load %arg2[%115] : memref<64xi32, #tpu.memory_space<smem>>
      %c0_i32_64 = arith.constant 0 : i32
      %c63_i32_65 = arith.constant 63 : i32
      %117 = arith.maxsi %c0_i32_64, %116 : i32
      %118 = arith.minsi %c63_i32_65, %117 : i32
      %c5_i32_66 = arith.constant 5 : i32
      %c0_i32_67 = arith.constant 0 : i32
      %119 = tpu.memref_slice %arg10[%118, %c0_i32_67] : memref<64x128xf32, #tpu.memory_space<any>> -> memref<1x128xf32, #tpu.memory_space<any>>
      %120 = tpu.memref_squeeze %119 : memref<1x128xf32, #tpu.memory_space<any>> -> memref<128xf32, #tpu.memory_space<any>>
      %c0_i32_68 = arith.constant 0 : i32
      %121 = tpu.memref_slice %arg12[%11, %c5_i32_66, %c0_i32_68] : memref<2x16x128xf32, #tpu.memory_space<vmem>> -> memref<1x1x128xf32, #tpu.memory_space<vmem>>
      %122 = tpu.memref_squeeze %121 : memref<1x1x128xf32, #tpu.memory_space<vmem>> -> memref<128xf32, #tpu.memory_space<vmem>>
      %123 = tpu.memref_slice %arg13[%11] : memref<2x!tpu.dma_semaphore, #tpu.memory_space<semaphore_mem>> -> memref<1x!tpu.dma_semaphore, #tpu.memory_space<semaphore_mem>>
      %124 = tpu.memref_squeeze %123 : memref<1x!tpu.dma_semaphore, #tpu.memory_space<semaphore_mem>> -> memref<!tpu.dma_semaphore, #tpu.memory_space<semaphore_mem>>
      tpu.enqueue_dma source(%120 : memref<128xf32, #tpu.memory_space<any>>) target(%122 : memref<128xf32, #tpu.memory_space<vmem>>) target_semaphore(%124 : memref<!tpu.dma_semaphore, #tpu.memory_space<semaphore_mem>>)
      %c6_i32 = arith.constant 6 : i32
      %125 = arith.addi %58, %c6_i32 : i32
      %126 = arith.index_cast %125 : i32 to index
      %127 = memref.load %arg2[%126] : memref<64xi32, #tpu.memory_space<smem>>
      %c0_i32_69 = arith.constant 0 : i32
      %c63_i32_70 = arith.constant 63 : i32
      %128 = arith.maxsi %c0_i32_69, %127 : i32
      %129 = arith.minsi %c63_i32_70, %128 : i32
      %c6_i32_71 = arith.constant 6 : i32
      %c0_i32_72 = arith.constant 0 : i32
      %130 = tpu.memref_slice %arg10[%129, %c0_i32_72] : memref<64x128xf32, #tpu.memory_space<any>> -> memref<1x128xf32, #tpu.memory_space<any>>
      %131 = tpu.memref_squeeze %130 : memref<1x128xf32, #tpu.memory_space<any>> -> memref<128xf32, #tpu.memory_space<any>>
      %c0_i32_73 = arith.constant 0 : i32
      %132 = tpu.memref_slice %arg12[%11, %c6_i32_71, %c0_i32_73] : memref<2x16x128xf32, #tpu.memory_space<vmem>> -> memref<1x1x128xf32, #tpu.memory_space<vmem>>
      %133 = tpu.memref_squeeze %132 : memref<1x1x128xf32, #tpu.memory_space<vmem>> -> memref<128xf32, #tpu.memory_space<vmem>>
      %134 = tpu.memref_slice %arg13[%11] : memref<2x!tpu.dma_semaphore, #tpu.memory_space<semaphore_mem>> -> memref<1x!tpu.dma_semaphore, #tpu.memory_space<semaphore_mem>>
      %135 = tpu.memref_squeeze %134 : memref<1x!tpu.dma_semaphore, #tpu.memory_space<semaphore_mem>> -> memref<!tpu.dma_semaphore, #tpu.memory_space<semaphore_mem>>
      tpu.enqueue_dma source(%131 : memref<128xf32, #tpu.memory_space<any>>) target(%133 : memref<128xf32, #tpu.memory_space<vmem>>) target_semaphore(%135 : memref<!tpu.dma_semaphore, #tpu.memory_space<semaphore_mem>>)
      %c7_i32 = arith.constant 7 : i32
      %136 = arith.addi %58, %c7_i32 : i32
      %137 = arith.index_cast %136 : i32 to index
      %138 = memref.load %arg2[%137] : memref<64xi32, #tpu.memory_space<smem>>
      %c0_i32_74 = arith.constant 0 : i32
      %c63_i32_75 = arith.constant 63 : i32
      %139 = arith.maxsi %c0_i32_74, %138 : i32
      %140 = arith.minsi %c63_i32_75, %139 : i32
      %c7_i32_76 = arith.constant 7 : i32
      %c0_i32_77 = arith.constant 0 : i32
      %141 = tpu.memref_slice %arg10[%140, %c0_i32_77] : memref<64x128xf32, #tpu.memory_space<any>> -> memref<1x128xf32, #tpu.memory_space<any>>
      %142 = tpu.memref_squeeze %141 : memref<1x128xf32, #tpu.memory_space<any>> -> memref<128xf32, #tpu.memory_space<any>>
      %c0_i32_78 = arith.constant 0 : i32
      %143 = tpu.memref_slice %arg12[%11, %c7_i32_76, %c0_i32_78] : memref<2x16x128xf32, #tpu.memory_space<vmem>> -> memref<1x1x128xf32, #tpu.memory_space<vmem>>
      %144 = tpu.memref_squeeze %143 : memref<1x1x128xf32, #tpu.memory_space<vmem>> -> memref<128xf32, #tpu.memory_space<vmem>>
      %145 = tpu.memref_slice %arg13[%11] : memref<2x!tpu.dma_semaphore, #tpu.memory_space<semaphore_mem>> -> memref<1x!tpu.dma_semaphore, #tpu.memory_space<semaphore_mem>>
      %146 = tpu.memref_squeeze %145 : memref<1x!tpu.dma_semaphore, #tpu.memory_space<semaphore_mem>> -> memref<!tpu.dma_semaphore, #tpu.memory_space<semaphore_mem>>
      tpu.enqueue_dma source(%142 : memref<128xf32, #tpu.memory_space<any>>) target(%144 : memref<128xf32, #tpu.memory_space<vmem>>) target_semaphore(%146 : memref<!tpu.dma_semaphore, #tpu.memory_space<semaphore_mem>>)
      %c8_i32 = arith.constant 8 : i32
      %147 = arith.addi %58, %c8_i32 : i32
      %148 = arith.index_cast %147 : i32 to index
      %149 = memref.load %arg2[%148] : memref<64xi32, #tpu.memory_space<smem>>
      %c0_i32_79 = arith.constant 0 : i32
      %c63_i32_80 = arith.constant 63 : i32
      %150 = arith.maxsi %c0_i32_79, %149 : i32
      %151 = arith.minsi %c63_i32_80, %150 : i32
      %c8_i32_81 = arith.constant 8 : i32
      %c0_i32_82 = arith.constant 0 : i32
      %152 = tpu.memref_slice %arg10[%151, %c0_i32_82] : memref<64x128xf32, #tpu.memory_space<any>> -> memref<1x128xf32, #tpu.memory_space<any>>
      %153 = tpu.memref_squeeze %152 : memref<1x128xf32, #tpu.memory_space<any>> -> memref<128xf32, #tpu.memory_space<any>>
      %c0_i32_83 = arith.constant 0 : i32
      %154 = tpu.memref_slice %arg12[%11, %c8_i32_81, %c0_i32_83] : memref<2x16x128xf32, #tpu.memory_space<vmem>> -> memref<1x1x128xf32, #tpu.memory_space<vmem>>
      %155 = tpu.memref_squeeze %154 : memref<1x1x128xf32, #tpu.memory_space<vmem>> -> memref<128xf32, #tpu.memory_space<vmem>>
      %156 = tpu.memref_slice %arg13[%11] : memref<2x!tpu.dma_semaphore, #tpu.memory_space<semaphore_mem>> -> memref<1x!tpu.dma_semaphore, #tpu.memory_space<semaphore_mem>>
      %157 = tpu.memref_squeeze %156 : memref<1x!tpu.dma_semaphore, #tpu.memory_space<semaphore_mem>> -> memref<!tpu.dma_semaphore, #tpu.memory_space<semaphore_mem>>
      tpu.enqueue_dma source(%153 : memref<128xf32, #tpu.memory_space<any>>) target(%155 : memref<128xf32, #tpu.memory_space<vmem>>) target_semaphore(%157 : memref<!tpu.dma_semaphore, #tpu.memory_space<semaphore_mem>>)
      %c9_i32 = arith.constant 9 : i32
      %158 = arith.addi %58, %c9_i32 : i32
      %159 = arith.index_cast %158 : i32 to index
      %160 = memref.load %arg2[%159] : memref<64xi32, #tpu.memory_space<smem>>
      %c0_i32_84 = arith.constant 0 : i32
      %c63_i32_85 = arith.constant 63 : i32
      %161 = arith.maxsi %c0_i32_84, %160 : i32
      %162 = arith.minsi %c63_i32_85, %161 : i32
      %c9_i32_86 = arith.constant 9 : i32
      %c0_i32_87 = arith.constant 0 : i32
      %163 = tpu.memref_slice %arg10[%162, %c0_i32_87] : memref<64x128xf32, #tpu.memory_space<any>> -> memref<1x128xf32, #tpu.memory_space<any>>
      %164 = tpu.memref_squeeze %163 : memref<1x128xf32, #tpu.memory_space<any>> -> memref<128xf32, #tpu.memory_space<any>>
      %c0_i32_88 = arith.constant 0 : i32
      %165 = tpu.memref_slice %arg12[%11, %c9_i32_86, %c0_i32_88] : memref<2x16x128xf32, #tpu.memory_space<vmem>> -> memref<1x1x128xf32, #tpu.memory_space<vmem>>
      %166 = tpu.memref_squeeze %165 : memref<1x1x128xf32, #tpu.memory_space<vmem>> -> memref<128xf32, #tpu.memory_space<vmem>>
      %167 = tpu.memref_slice %arg13[%11] : memref<2x!tpu.dma_semaphore, #tpu.memory_space<semaphore_mem>> -> memref<1x!tpu.dma_semaphore, #tpu.memory_space<semaphore_mem>>
      %168 = tpu.memref_squeeze %167 : memref<1x!tpu.dma_semaphore, #tpu.memory_space<semaphore_mem>> -> memref<!tpu.dma_semaphore, #tpu.memory_space<semaphore_mem>>
      tpu.enqueue_dma source(%164 : memref<128xf32, #tpu.memory_space<any>>) target(%166 : memref<128xf32, #tpu.memory_space<vmem>>) target_semaphore(%168 : memref<!tpu.dma_semaphore, #tpu.memory_space<semaphore_mem>>)
      %c10_i32 = arith.constant 10 : i32
      %169 = arith.addi %58, %c10_i32 : i32
      %170 = arith.index_cast %169 : i32 to index
      %171 = memref.load %arg2[%170] : memref<64xi32, #tpu.memory_space<smem>>
      %c0_i32_89 = arith.constant 0 : i32
      %c63_i32_90 = arith.constant 63 : i32
      %172 = arith.maxsi %c0_i32_89, %171 : i32
      %173 = arith.minsi %c63_i32_90, %172 : i32
      %c10_i32_91 = arith.constant 10 : i32
      %c0_i32_92 = arith.constant 0 : i32
      %174 = tpu.memref_slice %arg10[%173, %c0_i32_92] : memref<64x128xf32, #tpu.memory_space<any>> -> memref<1x128xf32, #tpu.memory_space<any>>
      %175 = tpu.memref_squeeze %174 : memref<1x128xf32, #tpu.memory_space<any>> -> memref<128xf32, #tpu.memory_space<any>>
      %c0_i32_93 = arith.constant 0 : i32
      %176 = tpu.memref_slice %arg12[%11, %c10_i32_91, %c0_i32_93] : memref<2x16x128xf32, #tpu.memory_space<vmem>> -> memref<1x1x128xf32, #tpu.memory_space<vmem>>
      %177 = tpu.memref_squeeze %176 : memref<1x1x128xf32, #tpu.memory_space<vmem>> -> memref<128xf32, #tpu.memory_space<vmem>>
      %178 = tpu.memref_slice %arg13[%11] : memref<2x!tpu.dma_semaphore, #tpu.memory_space<semaphore_mem>> -> memref<1x!tpu.dma_semaphore, #tpu.memory_space<semaphore_mem>>
      %179 = tpu.memref_squeeze %178 : memref<1x!tpu.dma_semaphore, #tpu.memory_space<semaphore_mem>> -> memref<!tpu.dma_semaphore, #tpu.memory_space<semaphore_mem>>
      tpu.enqueue_dma source(%175 : memref<128xf32, #tpu.memory_space<any>>) target(%177 : memref<128xf32, #tpu.memory_space<vmem>>) target_semaphore(%179 : memref<!tpu.dma_semaphore, #tpu.memory_space<semaphore_mem>>)
      %c11_i32 = arith.constant 11 : i32
      %180 = arith.addi %58, %c11_i32 : i32
      %181 = arith.index_cast %180 : i32 to index
      %182 = memref.load %arg2[%181] : memref<64xi32, #tpu.memory_space<smem>>
      %c0_i32_94 = arith.constant 0 : i32
      %c63_i32_95 = arith.constant 63 : i32
      %183 = arith.maxsi %c0_i32_94, %182 : i32
      %184 = arith.minsi %c63_i32_95, %183 : i32
      %c11_i32_96 = arith.constant 11 : i32
      %c0_i32_97 = arith.constant 0 : i32
      %185 = tpu.memref_slice %arg10[%184, %c0_i32_97] : memref<64x128xf32, #tpu.memory_space<any>> -> memref<1x128xf32, #tpu.memory_space<any>>
      %186 = tpu.memref_squeeze %185 : memref<1x128xf32, #tpu.memory_space<any>> -> memref<128xf32, #tpu.memory_space<any>>
      %c0_i32_98 = arith.constant 0 : i32
      %187 = tpu.memref_slice %arg12[%11, %c11_i32_96, %c0_i32_98] : memref<2x16x128xf32, #tpu.memory_space<vmem>> -> memref<1x1x128xf32, #tpu.memory_space<vmem>>
      %188 = tpu.memref_squeeze %187 : memref<1x1x128xf32, #tpu.memory_space<vmem>> -> memref<128xf32, #tpu.memory_space<vmem>>
      %189 = tpu.memref_slice %arg13[%11] : memref<2x!tpu.dma_semaphore, #tpu.memory_space<semaphore_mem>> -> memref<1x!tpu.dma_semaphore, #tpu.memory_space<semaphore_mem>>
      %190 = tpu.memref_squeeze %189 : memref<1x!tpu.dma_semaphore, #tpu.memory_space<semaphore_mem>> -> memref<!tpu.dma_semaphore, #tpu.memory_space<semaphore_mem>>
      tpu.enqueue_dma source(%186 : memref<128xf32, #tpu.memory_space<any>>) target(%188 : memref<128xf32, #tpu.memory_space<vmem>>) target_semaphore(%190 : memref<!tpu.dma_semaphore, #tpu.memory_space<semaphore_mem>>)
      %c12_i32 = arith.constant 12 : i32
      %191 = arith.addi %58, %c12_i32 : i32
      %192 = arith.index_cast %191 : i32 to index
      %193 = memref.load %arg2[%192] : memref<64xi32, #tpu.memory_space<smem>>
      %c0_i32_99 = arith.constant 0 : i32
      %c63_i32_100 = arith.constant 63 : i32
      %194 = arith.maxsi %c0_i32_99, %193 : i32
      %195 = arith.minsi %c63_i32_100, %194 : i32
      %c12_i32_101 = arith.constant 12 : i32
      %c0_i32_102 = arith.constant 0 : i32
      %196 = tpu.memref_slice %arg10[%195, %c0_i32_102] : memref<64x128xf32, #tpu.memory_space<any>> -> memref<1x128xf32, #tpu.memory_space<any>>
      %197 = tpu.memref_squeeze %196 : memref<1x128xf32, #tpu.memory_space<any>> -> memref<128xf32, #tpu.memory_space<any>>
      %c0_i32_103 = arith.constant 0 : i32
      %198 = tpu.memref_slice %arg12[%11, %c12_i32_101, %c0_i32_103] : memref<2x16x128xf32, #tpu.memory_space<vmem>> -> memref<1x1x128xf32, #tpu.memory_space<vmem>>
      %199 = tpu.memref_squeeze %198 : memref<1x1x128xf32, #tpu.memory_space<vmem>> -> memref<128xf32, #tpu.memory_space<vmem>>
      %200 = tpu.memref_slice %arg13[%11] : memref<2x!tpu.dma_semaphore, #tpu.memory_space<semaphore_mem>> -> memref<1x!tpu.dma_semaphore, #tpu.memory_space<semaphore_mem>>
      %201 = tpu.memref_squeeze %200 : memref<1x!tpu.dma_semaphore, #tpu.memory_space<semaphore_mem>> -> memref<!tpu.dma_semaphore, #tpu.memory_space<semaphore_mem>>
      tpu.enqueue_dma source(%197 : memref<128xf32, #tpu.memory_space<any>>) target(%199 : memref<128xf32, #tpu.memory_space<vmem>>) target_semaphore(%201 : memref<!tpu.dma_semaphore, #tpu.memory_space<semaphore_mem>>)
      %c13_i32 = arith.constant 13 : i32
      %202 = arith.addi %58, %c13_i32 : i32
      %203 = arith.index_cast %202 : i32 to index
      %204 = memref.load %arg2[%203] : memref<64xi32, #tpu.memory_space<smem>>
      %c0_i32_104 = arith.constant 0 : i32
      %c63_i32_105 = arith.constant 63 : i32
      %205 = arith.maxsi %c0_i32_104, %204 : i32
      %206 = arith.minsi %c63_i32_105, %205 : i32
      %c13_i32_106 = arith.constant 13 : i32
      %c0_i32_107 = arith.constant 0 : i32
      %207 = tpu.memref_slice %arg10[%206, %c0_i32_107] : memref<64x128xf32, #tpu.memory_space<any>> -> memref<1x128xf32, #tpu.memory_space<any>>
      %208 = tpu.memref_squeeze %207 : memref<1x128xf32, #tpu.memory_space<any>> -> memref<128xf32, #tpu.memory_space<any>>
      %c0_i32_108 = arith.constant 0 : i32
      %209 = tpu.memref_slice %arg12[%11, %c13_i32_106, %c0_i32_108] : memref<2x16x128xf32, #tpu.memory_space<vmem>> -> memref<1x1x128xf32, #tpu.memory_space<vmem>>
      %210 = tpu.memref_squeeze %209 : memref<1x1x128xf32, #tpu.memory_space<vmem>> -> memref<128xf32, #tpu.memory_space<vmem>>
      %211 = tpu.memref_slice %arg13[%11] : memref<2x!tpu.dma_semaphore, #tpu.memory_space<semaphore_mem>> -> memref<1x!tpu.dma_semaphore, #tpu.memory_space<semaphore_mem>>
      %212 = tpu.memref_squeeze %211 : memref<1x!tpu.dma_semaphore, #tpu.memory_space<semaphore_mem>> -> memref<!tpu.dma_semaphore, #tpu.memory_space<semaphore_mem>>
      tpu.enqueue_dma source(%208 : memref<128xf32, #tpu.memory_space<any>>) target(%210 : memref<128xf32, #tpu.memory_space<vmem>>) target_semaphore(%212 : memref<!tpu.dma_semaphore, #tpu.memory_space<semaphore_mem>>)
      %c14_i32 = arith.constant 14 : i32
      %213 = arith.addi %58, %c14_i32 : i32
      %214 = arith.index_cast %213 : i32 to index
      %215 = memref.load %arg2[%214] : memref<64xi32, #tpu.memory_space<smem>>
      %c0_i32_109 = arith.constant 0 : i32
      %c63_i32_110 = arith.constant 63 : i32
      %216 = arith.maxsi %c0_i32_109, %215 : i32
      %217 = arith.minsi %c63_i32_110, %216 : i32
      %c14_i32_111 = arith.constant 14 : i32
      %c0_i32_112 = arith.constant 0 : i32
      %218 = tpu.memref_slice %arg10[%217, %c0_i32_112] : memref<64x128xf32, #tpu.memory_space<any>> -> memref<1x128xf32, #tpu.memory_space<any>>
      %219 = tpu.memref_squeeze %218 : memref<1x128xf32, #tpu.memory_space<any>> -> memref<128xf32, #tpu.memory_space<any>>
      %c0_i32_113 = arith.constant 0 : i32
      %220 = tpu.memref_slice %arg12[%11, %c14_i32_111, %c0_i32_113] : memref<2x16x128xf32, #tpu.memory_space<vmem>> -> memref<1x1x128xf32, #tpu.memory_space<vmem>>
      %221 = tpu.memref_squeeze %220 : memref<1x1x128xf32, #tpu.memory_space<vmem>> -> memref<128xf32, #tpu.memory_space<vmem>>
      %222 = tpu.memref_slice %arg13[%11] : memref<2x!tpu.dma_semaphore, #tpu.memory_space<semaphore_mem>> -> memref<1x!tpu.dma_semaphore, #tpu.memory_space<semaphore_mem>>
      %223 = tpu.memref_squeeze %222 : memref<1x!tpu.dma_semaphore, #tpu.memory_space<semaphore_mem>> -> memref<!tpu.dma_semaphore, #tpu.memory_space<semaphore_mem>>
      tpu.enqueue_dma source(%219 : memref<128xf32, #tpu.memory_space<any>>) target(%221 : memref<128xf32, #tpu.memory_space<vmem>>) target_semaphore(%223 : memref<!tpu.dma_semaphore, #tpu.memory_space<semaphore_mem>>)
      %c15_i32 = arith.constant 15 : i32
      %224 = arith.addi %58, %c15_i32 : i32
      %225 = arith.index_cast %224 : i32 to index
      %226 = memref.load %arg2[%225] : memref<64xi32, #tpu.memory_space<smem>>
      %c0_i32_114 = arith.constant 0 : i32
      %c63_i32_115 = arith.constant 63 : i32
      %227 = arith.maxsi %c0_i32_114, %226 : i32
      %228 = arith.minsi %c63_i32_115, %227 : i32
      %c15_i32_116 = arith.constant 15 : i32
      %c0_i32_117 = arith.constant 0 : i32
      %229 = tpu.memref_slice %arg10[%228, %c0_i32_117] : memref<64x128xf32, #tpu.memory_space<any>> -> memref<1x128xf32, #tpu.memory_space<any>>
      %230 = tpu.memref_squeeze %229 : memref<1x128xf32, #tpu.memory_space<any>> -> memref<128xf32, #tpu.memory_space<any>>
      %c0_i32_118 = arith.constant 0 : i32
      %231 = tpu.memref_slice %arg12[%11, %c15_i32_116, %c0_i32_118] : memref<2x16x128xf32, #tpu.memory_space<vmem>> -> memref<1x1x128xf32, #tpu.memory_space<vmem>>
      %232 = tpu.memref_squeeze %231 : memref<1x1x128xf32, #tpu.memory_space<vmem>> -> memref<128xf32, #tpu.memory_space<vmem>>
      %233 = tpu.memref_slice %arg13[%11] : memref<2x!tpu.dma_semaphore, #tpu.memory_space<semaphore_mem>> -> memref<1x!tpu.dma_semaphore, #tpu.memory_space<semaphore_mem>>
      %234 = tpu.memref_squeeze %233 : memref<1x!tpu.dma_semaphore, #tpu.memory_space<semaphore_mem>> -> memref<!tpu.dma_semaphore, #tpu.memory_space<semaphore_mem>>
      tpu.enqueue_dma source(%230 : memref<128xf32, #tpu.memory_space<any>>) target(%232 : memref<128xf32, #tpu.memory_space<vmem>>) target_semaphore(%234 : memref<!tpu.dma_semaphore, #tpu.memory_space<semaphore_mem>>)
    } else {
    }
    %c1_i32_7 = arith.constant 1 : i32
    %16 = arith.addi %arg1, %c1_i32_7 : i32
    %c2_i32_8 = arith.constant 2 : i32
    %17 = arith.cmpi slt, %16, %c2_i32_8 : i32
    %18 = arith.extui %17 : i1 to i32
    %c0_i32_9 = arith.constant 0 : i32
    %19 = arith.cmpi ne, %18, %c0_i32_9 : i32
    scf.if %19 {
      %c1_i32_37 = arith.constant 1 : i32
      %58 = arith.addi %1, %c1_i32_37 : i32
      %c16_i32 = arith.constant 16 : i32
      %59 = arith.muli %58, %c16_i32 : i32
      %c0_i32_38 = arith.constant 0 : i32
      %60 = arith.addi %59, %c0_i32_38 : i32
      %61 = arith.index_cast %60 : i32 to index
      %62 = memref.load %arg2[%61] : memref<64xi32, #tpu.memory_space<smem>>
      %c0_i32_39 = arith.constant 0 : i32
      %c63_i32 = arith.constant 63 : i32
      %63 = arith.maxsi %c0_i32_39, %62 : i32
      %64 = arith.minsi %c63_i32, %63 : i32
      %c0_i32_40 = arith.constant 0 : i32
      %c0_i32_41 = arith.constant 0 : i32
      %65 = tpu.memref_slice %arg10[%64, %c0_i32_41] : memref<64x128xf32, #tpu.memory_space<any>> -> memref<1x128xf32, #tpu.memory_space<any>>
      %66 = tpu.memref_squeeze %65 : memref<1x128xf32, #tpu.memory_space<any>> -> memref<128xf32, #tpu.memory_space<any>>
      %c0_i32_42 = arith.constant 0 : i32
      %67 = tpu.memref_slice %arg12[%12, %c0_i32_40, %c0_i32_42] : memref<2x16x128xf32, #tpu.memory_space<vmem>> -> memref<1x1x128xf32, #tpu.memory_space<vmem>>
      %68 = tpu.memref_squeeze %67 : memref<1x1x128xf32, #tpu.memory_space<vmem>> -> memref<128xf32, #tpu.memory_space<vmem>>
      %69 = tpu.memref_slice %arg13[%12] : memref<2x!tpu.dma_semaphore, #tpu.memory_space<semaphore_mem>> -> memref<1x!tpu.dma_semaphore, #tpu.memory_space<semaphore_mem>>
      %70 = tpu.memref_squeeze %69 : memref<1x!tpu.dma_semaphore, #tpu.memory_space<semaphore_mem>> -> memref<!tpu.dma_semaphore, #tpu.memory_space<semaphore_mem>>
      tpu.enqueue_dma source(%66 : memref<128xf32, #tpu.memory_space<any>>) target(%68 : memref<128xf32, #tpu.memory_space<vmem>>) target_semaphore(%70 : memref<!tpu.dma_semaphore, #tpu.memory_space<semaphore_mem>>)
      %c1_i32_43 = arith.constant 1 : i32
      %71 = arith.addi %59, %c1_i32_43 : i32
      %72 = arith.index_cast %71 : i32 to index
      %73 = memref.load %arg2[%72] : memref<64xi32, #tpu.memory_space<smem>>
      %c0_i32_44 = arith.constant 0 : i32
      %c63_i32_45 = arith.constant 63 : i32
      %74 = arith.maxsi %c0_i32_44, %73 : i32
      %75 = arith.minsi %c63_i32_45, %74 : i32
      %c1_i32_46 = arith.constant 1 : i32
      %c0_i32_47 = arith.constant 0 : i32
      %76 = tpu.memref_slice %arg10[%75, %c0_i32_47] : memref<64x128xf32, #tpu.memory_space<any>> -> memref<1x128xf32, #tpu.memory_space<any>>
      %77 = tpu.memref_squeeze %76 : memref<1x128xf32, #tpu.memory_space<any>> -> memref<128xf32, #tpu.memory_space<any>>
      %c0_i32_48 = arith.constant 0 : i32
      %78 = tpu.memref_slice %arg12[%12, %c1_i32_46, %c0_i32_48] : memref<2x16x128xf32, #tpu.memory_space<vmem>> -> memref<1x1x128xf32, #tpu.memory_space<vmem>>
      %79 = tpu.memref_squeeze %78 : memref<1x1x128xf32, #tpu.memory_space<vmem>> -> memref<128xf32, #tpu.memory_space<vmem>>
      %80 = tpu.memref_slice %arg13[%12] : memref<2x!tpu.dma_semaphore, #tpu.memory_space<semaphore_mem>> -> memref<1x!tpu.dma_semaphore, #tpu.memory_space<semaphore_mem>>
      %81 = tpu.memref_squeeze %80 : memref<1x!tpu.dma_semaphore, #tpu.memory_space<semaphore_mem>> -> memref<!tpu.dma_semaphore, #tpu.memory_space<semaphore_mem>>
      tpu.enqueue_dma source(%77 : memref<128xf32, #tpu.memory_space<any>>) target(%79 : memref<128xf32, #tpu.memory_space<vmem>>) target_semaphore(%81 : memref<!tpu.dma_semaphore, #tpu.memory_space<semaphore_mem>>)
      %c2_i32_49 = arith.constant 2 : i32
      %82 = arith.addi %59, %c2_i32_49 : i32
      %83 = arith.index_cast %82 : i32 to index
      %84 = memref.load %arg2[%83] : memref<64xi32, #tpu.memory_space<smem>>
      %c0_i32_50 = arith.constant 0 : i32
      %c63_i32_51 = arith.constant 63 : i32
      %85 = arith.maxsi %c0_i32_50, %84 : i32
      %86 = arith.minsi %c63_i32_51, %85 : i32
      %c2_i32_52 = arith.constant 2 : i32
      %c0_i32_53 = arith.constant 0 : i32
      %87 = tpu.memref_slice %arg10[%86, %c0_i32_53] : memref<64x128xf32, #tpu.memory_space<any>> -> memref<1x128xf32, #tpu.memory_space<any>>
      %88 = tpu.memref_squeeze %87 : memref<1x128xf32, #tpu.memory_space<any>> -> memref<128xf32, #tpu.memory_space<any>>
      %c0_i32_54 = arith.constant 0 : i32
      %89 = tpu.memref_slice %arg12[%12, %c2_i32_52, %c0_i32_54] : memref<2x16x128xf32, #tpu.memory_space<vmem>> -> memref<1x1x128xf32, #tpu.memory_space<vmem>>
      %90 = tpu.memref_squeeze %89 : memref<1x1x128xf32, #tpu.memory_space<vmem>> -> memref<128xf32, #tpu.memory_space<vmem>>
      %91 = tpu.memref_slice %arg13[%12] : memref<2x!tpu.dma_semaphore, #tpu.memory_space<semaphore_mem>> -> memref<1x!tpu.dma_semaphore, #tpu.memory_space<semaphore_mem>>
      %92 = tpu.memref_squeeze %91 : memref<1x!tpu.dma_semaphore, #tpu.memory_space<semaphore_mem>> -> memref<!tpu.dma_semaphore, #tpu.memory_space<semaphore_mem>>
      tpu.enqueue_dma source(%88 : memref<128xf32, #tpu.memory_space<any>>) target(%90 : memref<128xf32, #tpu.memory_space<vmem>>) target_semaphore(%92 : memref<!tpu.dma_semaphore, #tpu.memory_space<semaphore_mem>>)
      %c3_i32 = arith.constant 3 : i32
      %93 = arith.addi %59, %c3_i32 : i32
      %94 = arith.index_cast %93 : i32 to index
      %95 = memref.load %arg2[%94] : memref<64xi32, #tpu.memory_space<smem>>
      %c0_i32_55 = arith.constant 0 : i32
      %c63_i32_56 = arith.constant 63 : i32
      %96 = arith.maxsi %c0_i32_55, %95 : i32
      %97 = arith.minsi %c63_i32_56, %96 : i32
      %c3_i32_57 = arith.constant 3 : i32
      %c0_i32_58 = arith.constant 0 : i32
      %98 = tpu.memref_slice %arg10[%97, %c0_i32_58] : memref<64x128xf32, #tpu.memory_space<any>> -> memref<1x128xf32, #tpu.memory_space<any>>
      %99 = tpu.memref_squeeze %98 : memref<1x128xf32, #tpu.memory_space<any>> -> memref<128xf32, #tpu.memory_space<any>>
      %c0_i32_59 = arith.constant 0 : i32
      %100 = tpu.memref_slice %arg12[%12, %c3_i32_57, %c0_i32_59] : memref<2x16x128xf32, #tpu.memory_space<vmem>> -> memref<1x1x128xf32, #tpu.memory_space<vmem>>
      %101 = tpu.memref_squeeze %100 : memref<1x1x128xf32, #tpu.memory_space<vmem>> -> memref<128xf32, #tpu.memory_space<vmem>>
      %102 = tpu.memref_slice %arg13[%12] : memref<2x!tpu.dma_semaphore, #tpu.memory_space<semaphore_mem>> -> memref<1x!tpu.dma_semaphore, #tpu.memory_space<semaphore_mem>>
      %103 = tpu.memref_squeeze %102 : memref<1x!tpu.dma_semaphore, #tpu.memory_space<semaphore_mem>> -> memref<!tpu.dma_semaphore, #tpu.memory_space<semaphore_mem>>
      tpu.enqueue_dma source(%99 : memref<128xf32, #tpu.memory_space<any>>) target(%101 : memref<128xf32, #tpu.memory_space<vmem>>) target_semaphore(%103 : memref<!tpu.dma_semaphore, #tpu.memory_space<semaphore_mem>>)
      %c4_i32 = arith.constant 4 : i32
      %104 = arith.addi %59, %c4_i32 : i32
      %105 = arith.index_cast %104 : i32 to index
      %106 = memref.load %arg2[%105] : memref<64xi32, #tpu.memory_space<smem>>
      %c0_i32_60 = arith.constant 0 : i32
      %c63_i32_61 = arith.constant 63 : i32
      %107 = arith.maxsi %c0_i32_60, %106 : i32
      %108 = arith.minsi %c63_i32_61, %107 : i32
      %c4_i32_62 = arith.constant 4 : i32
      %c0_i32_63 = arith.constant 0 : i32
      %109 = tpu.memref_slice %arg10[%108, %c0_i32_63] : memref<64x128xf32, #tpu.memory_space<any>> -> memref<1x128xf32, #tpu.memory_space<any>>
      %110 = tpu.memref_squeeze %109 : memref<1x128xf32, #tpu.memory_space<any>> -> memref<128xf32, #tpu.memory_space<any>>
      %c0_i32_64 = arith.constant 0 : i32
      %111 = tpu.memref_slice %arg12[%12, %c4_i32_62, %c0_i32_64] : memref<2x16x128xf32, #tpu.memory_space<vmem>> -> memref<1x1x128xf32, #tpu.memory_space<vmem>>
      %112 = tpu.memref_squeeze %111 : memref<1x1x128xf32, #tpu.memory_space<vmem>> -> memref<128xf32, #tpu.memory_space<vmem>>
      %113 = tpu.memref_slice %arg13[%12] : memref<2x!tpu.dma_semaphore, #tpu.memory_space<semaphore_mem>> -> memref<1x!tpu.dma_semaphore, #tpu.memory_space<semaphore_mem>>
      %114 = tpu.memref_squeeze %113 : memref<1x!tpu.dma_semaphore, #tpu.memory_space<semaphore_mem>> -> memref<!tpu.dma_semaphore, #tpu.memory_space<semaphore_mem>>
      tpu.enqueue_dma source(%110 : memref<128xf32, #tpu.memory_space<any>>) target(%112 : memref<128xf32, #tpu.memory_space<vmem>>) target_semaphore(%114 : memref<!tpu.dma_semaphore, #tpu.memory_space<semaphore_mem>>)
      %c5_i32 = arith.constant 5 : i32
      %115 = arith.addi %59, %c5_i32 : i32
      %116 = arith.index_cast %115 : i32 to index
      %117 = memref.load %arg2[%116] : memref<64xi32, #tpu.memory_space<smem>>
      %c0_i32_65 = arith.constant 0 : i32
      %c63_i32_66 = arith.constant 63 : i32
      %118 = arith.maxsi %c0_i32_65, %117 : i32
      %119 = arith.minsi %c63_i32_66, %118 : i32
      %c5_i32_67 = arith.constant 5 : i32
      %c0_i32_68 = arith.constant 0 : i32
      %120 = tpu.memref_slice %arg10[%119, %c0_i32_68] : memref<64x128xf32, #tpu.memory_space<any>> -> memref<1x128xf32, #tpu.memory_space<any>>
      %121 = tpu.memref_squeeze %120 : memref<1x128xf32, #tpu.memory_space<any>> -> memref<128xf32, #tpu.memory_space<any>>
      %c0_i32_69 = arith.constant 0 : i32
      %122 = tpu.memref_slice %arg12[%12, %c5_i32_67, %c0_i32_69] : memref<2x16x128xf32, #tpu.memory_space<vmem>> -> memref<1x1x128xf32, #tpu.memory_space<vmem>>
      %123 = tpu.memref_squeeze %122 : memref<1x1x128xf32, #tpu.memory_space<vmem>> -> memref<128xf32, #tpu.memory_space<vmem>>
      %124 = tpu.memref_slice %arg13[%12] : memref<2x!tpu.dma_semaphore, #tpu.memory_space<semaphore_mem>> -> memref<1x!tpu.dma_semaphore, #tpu.memory_space<semaphore_mem>>
      %125 = tpu.memref_squeeze %124 : memref<1x!tpu.dma_semaphore, #tpu.memory_space<semaphore_mem>> -> memref<!tpu.dma_semaphore, #tpu.memory_space<semaphore_mem>>
      tpu.enqueue_dma source(%121 : memref<128xf32, #tpu.memory_space<any>>) target(%123 : memref<128xf32, #tpu.memory_space<vmem>>) target_semaphore(%125 : memref<!tpu.dma_semaphore, #tpu.memory_space<semaphore_mem>>)
      %c6_i32 = arith.constant 6 : i32
      %126 = arith.addi %59, %c6_i32 : i32
      %127 = arith.index_cast %126 : i32 to index
      %128 = memref.load %arg2[%127] : memref<64xi32, #tpu.memory_space<smem>>
      %c0_i32_70 = arith.constant 0 : i32
      %c63_i32_71 = arith.constant 63 : i32
      %129 = arith.maxsi %c0_i32_70, %128 : i32
      %130 = arith.minsi %c63_i32_71, %129 : i32
      %c6_i32_72 = arith.constant 6 : i32
      %c0_i32_73 = arith.constant 0 : i32
      %131 = tpu.memref_slice %arg10[%130, %c0_i32_73] : memref<64x128xf32, #tpu.memory_space<any>> -> memref<1x128xf32, #tpu.memory_space<any>>
      %132 = tpu.memref_squeeze %131 : memref<1x128xf32, #tpu.memory_space<any>> -> memref<128xf32, #tpu.memory_space<any>>
      %c0_i32_74 = arith.constant 0 : i32
      %133 = tpu.memref_slice %arg12[%12, %c6_i32_72, %c0_i32_74] : memref<2x16x128xf32, #tpu.memory_space<vmem>> -> memref<1x1x128xf32, #tpu.memory_space<vmem>>
      %134 = tpu.memref_squeeze %133 : memref<1x1x128xf32, #tpu.memory_space<vmem>> -> memref<128xf32, #tpu.memory_space<vmem>>
      %135 = tpu.memref_slice %arg13[%12] : memref<2x!tpu.dma_semaphore, #tpu.memory_space<semaphore_mem>> -> memref<1x!tpu.dma_semaphore, #tpu.memory_space<semaphore_mem>>
      %136 = tpu.memref_squeeze %135 : memref<1x!tpu.dma_semaphore, #tpu.memory_space<semaphore_mem>> -> memref<!tpu.dma_semaphore, #tpu.memory_space<semaphore_mem>>
      tpu.enqueue_dma source(%132 : memref<128xf32, #tpu.memory_space<any>>) target(%134 : memref<128xf32, #tpu.memory_space<vmem>>) target_semaphore(%136 : memref<!tpu.dma_semaphore, #tpu.memory_space<semaphore_mem>>)
      %c7_i32 = arith.constant 7 : i32
      %137 = arith.addi %59, %c7_i32 : i32
      %138 = arith.index_cast %137 : i32 to index
      %139 = memref.load %arg2[%138] : memref<64xi32, #tpu.memory_space<smem>>
      %c0_i32_75 = arith.constant 0 : i32
      %c63_i32_76 = arith.constant 63 : i32
      %140 = arith.maxsi %c0_i32_75, %139 : i32
      %141 = arith.minsi %c63_i32_76, %140 : i32
      %c7_i32_77 = arith.constant 7 : i32
      %c0_i32_78 = arith.constant 0 : i32
      %142 = tpu.memref_slice %arg10[%141, %c0_i32_78] : memref<64x128xf32, #tpu.memory_space<any>> -> memref<1x128xf32, #tpu.memory_space<any>>
      %143 = tpu.memref_squeeze %142 : memref<1x128xf32, #tpu.memory_space<any>> -> memref<128xf32, #tpu.memory_space<any>>
      %c0_i32_79 = arith.constant 0 : i32
      %144 = tpu.memref_slice %arg12[%12, %c7_i32_77, %c0_i32_79] : memref<2x16x128xf32, #tpu.memory_space<vmem>> -> memref<1x1x128xf32, #tpu.memory_space<vmem>>
      %145 = tpu.memref_squeeze %144 : memref<1x1x128xf32, #tpu.memory_space<vmem>> -> memref<128xf32, #tpu.memory_space<vmem>>
      %146 = tpu.memref_slice %arg13[%12] : memref<2x!tpu.dma_semaphore, #tpu.memory_space<semaphore_mem>> -> memref<1x!tpu.dma_semaphore, #tpu.memory_space<semaphore_mem>>
      %147 = tpu.memref_squeeze %146 : memref<1x!tpu.dma_semaphore, #tpu.memory_space<semaphore_mem>> -> memref<!tpu.dma_semaphore, #tpu.memory_space<semaphore_mem>>
      tpu.enqueue_dma source(%143 : memref<128xf32, #tpu.memory_space<any>>) target(%145 : memref<128xf32, #tpu.memory_space<vmem>>) target_semaphore(%147 : memref<!tpu.dma_semaphore, #tpu.memory_space<semaphore_mem>>)
      %c8_i32 = arith.constant 8 : i32
      %148 = arith.addi %59, %c8_i32 : i32
      %149 = arith.index_cast %148 : i32 to index
      %150 = memref.load %arg2[%149] : memref<64xi32, #tpu.memory_space<smem>>
      %c0_i32_80 = arith.constant 0 : i32
      %c63_i32_81 = arith.constant 63 : i32
      %151 = arith.maxsi %c0_i32_80, %150 : i32
      %152 = arith.minsi %c63_i32_81, %151 : i32
      %c8_i32_82 = arith.constant 8 : i32
      %c0_i32_83 = arith.constant 0 : i32
      %153 = tpu.memref_slice %arg10[%152, %c0_i32_83] : memref<64x128xf32, #tpu.memory_space<any>> -> memref<1x128xf32, #tpu.memory_space<any>>
      %154 = tpu.memref_squeeze %153 : memref<1x128xf32, #tpu.memory_space<any>> -> memref<128xf32, #tpu.memory_space<any>>
      %c0_i32_84 = arith.constant 0 : i32
      %155 = tpu.memref_slice %arg12[%12, %c8_i32_82, %c0_i32_84] : memref<2x16x128xf32, #tpu.memory_space<vmem>> -> memref<1x1x128xf32, #tpu.memory_space<vmem>>
      %156 = tpu.memref_squeeze %155 : memref<1x1x128xf32, #tpu.memory_space<vmem>> -> memref<128xf32, #tpu.memory_space<vmem>>
      %157 = tpu.memref_slice %arg13[%12] : memref<2x!tpu.dma_semaphore, #tpu.memory_space<semaphore_mem>> -> memref<1x!tpu.dma_semaphore, #tpu.memory_space<semaphore_mem>>
      %158 = tpu.memref_squeeze %157 : memref<1x!tpu.dma_semaphore, #tpu.memory_space<semaphore_mem>> -> memref<!tpu.dma_semaphore, #tpu.memory_space<semaphore_mem>>
      tpu.enqueue_dma source(%154 : memref<128xf32, #tpu.memory_space<any>>) target(%156 : memref<128xf32, #tpu.memory_space<vmem>>) target_semaphore(%158 : memref<!tpu.dma_semaphore, #tpu.memory_space<semaphore_mem>>)
      %c9_i32 = arith.constant 9 : i32
      %159 = arith.addi %59, %c9_i32 : i32
      %160 = arith.index_cast %159 : i32 to index
      %161 = memref.load %arg2[%160] : memref<64xi32, #tpu.memory_space<smem>>
      %c0_i32_85 = arith.constant 0 : i32
      %c63_i32_86 = arith.constant 63 : i32
      %162 = arith.maxsi %c0_i32_85, %161 : i32
      %163 = arith.minsi %c63_i32_86, %162 : i32
      %c9_i32_87 = arith.constant 9 : i32
      %c0_i32_88 = arith.constant 0 : i32
      %164 = tpu.memref_slice %arg10[%163, %c0_i32_88] : memref<64x128xf32, #tpu.memory_space<any>> -> memref<1x128xf32, #tpu.memory_space<any>>
      %165 = tpu.memref_squeeze %164 : memref<1x128xf32, #tpu.memory_space<any>> -> memref<128xf32, #tpu.memory_space<any>>
      %c0_i32_89 = arith.constant 0 : i32
      %166 = tpu.memref_slice %arg12[%12, %c9_i32_87, %c0_i32_89] : memref<2x16x128xf32, #tpu.memory_space<vmem>> -> memref<1x1x128xf32, #tpu.memory_space<vmem>>
      %167 = tpu.memref_squeeze %166 : memref<1x1x128xf32, #tpu.memory_space<vmem>> -> memref<128xf32, #tpu.memory_space<vmem>>
      %168 = tpu.memref_slice %arg13[%12] : memref<2x!tpu.dma_semaphore, #tpu.memory_space<semaphore_mem>> -> memref<1x!tpu.dma_semaphore, #tpu.memory_space<semaphore_mem>>
      %169 = tpu.memref_squeeze %168 : memref<1x!tpu.dma_semaphore, #tpu.memory_space<semaphore_mem>> -> memref<!tpu.dma_semaphore, #tpu.memory_space<semaphore_mem>>
      tpu.enqueue_dma source(%165 : memref<128xf32, #tpu.memory_space<any>>) target(%167 : memref<128xf32, #tpu.memory_space<vmem>>) target_semaphore(%169 : memref<!tpu.dma_semaphore, #tpu.memory_space<semaphore_mem>>)
      %c10_i32 = arith.constant 10 : i32
      %170 = arith.addi %59, %c10_i32 : i32
      %171 = arith.index_cast %170 : i32 to index
      %172 = memref.load %arg2[%171] : memref<64xi32, #tpu.memory_space<smem>>
      %c0_i32_90 = arith.constant 0 : i32
      %c63_i32_91 = arith.constant 63 : i32
      %173 = arith.maxsi %c0_i32_90, %172 : i32
      %174 = arith.minsi %c63_i32_91, %173 : i32
      %c10_i32_92 = arith.constant 10 : i32
      %c0_i32_93 = arith.constant 0 : i32
      %175 = tpu.memref_slice %arg10[%174, %c0_i32_93] : memref<64x128xf32, #tpu.memory_space<any>> -> memref<1x128xf32, #tpu.memory_space<any>>
      %176 = tpu.memref_squeeze %175 : memref<1x128xf32, #tpu.memory_space<any>> -> memref<128xf32, #tpu.memory_space<any>>
      %c0_i32_94 = arith.constant 0 : i32
      %177 = tpu.memref_slice %arg12[%12, %c10_i32_92, %c0_i32_94] : memref<2x16x128xf32, #tpu.memory_space<vmem>> -> memref<1x1x128xf32, #tpu.memory_space<vmem>>
      %178 = tpu.memref_squeeze %177 : memref<1x1x128xf32, #tpu.memory_space<vmem>> -> memref<128xf32, #tpu.memory_space<vmem>>
      %179 = tpu.memref_slice %arg13[%12] : memref<2x!tpu.dma_semaphore, #tpu.memory_space<semaphore_mem>> -> memref<1x!tpu.dma_semaphore, #tpu.memory_space<semaphore_mem>>
      %180 = tpu.memref_squeeze %179 : memref<1x!tpu.dma_semaphore, #tpu.memory_space<semaphore_mem>> -> memref<!tpu.dma_semaphore, #tpu.memory_space<semaphore_mem>>
      tpu.enqueue_dma source(%176 : memref<128xf32, #tpu.memory_space<any>>) target(%178 : memref<128xf32, #tpu.memory_space<vmem>>) target_semaphore(%180 : memref<!tpu.dma_semaphore, #tpu.memory_space<semaphore_mem>>)
      %c11_i32 = arith.constant 11 : i32
      %181 = arith.addi %59, %c11_i32 : i32
      %182 = arith.index_cast %181 : i32 to index
      %183 = memref.load %arg2[%182] : memref<64xi32, #tpu.memory_space<smem>>
      %c0_i32_95 = arith.constant 0 : i32
      %c63_i32_96 = arith.constant 63 : i32
      %184 = arith.maxsi %c0_i32_95, %183 : i32
      %185 = arith.minsi %c63_i32_96, %184 : i32
      %c11_i32_97 = arith.constant 11 : i32
      %c0_i32_98 = arith.constant 0 : i32
      %186 = tpu.memref_slice %arg10[%185, %c0_i32_98] : memref<64x128xf32, #tpu.memory_space<any>> -> memref<1x128xf32, #tpu.memory_space<any>>
      %187 = tpu.memref_squeeze %186 : memref<1x128xf32, #tpu.memory_space<any>> -> memref<128xf32, #tpu.memory_space<any>>
      %c0_i32_99 = arith.constant 0 : i32
      %188 = tpu.memref_slice %arg12[%12, %c11_i32_97, %c0_i32_99] : memref<2x16x128xf32, #tpu.memory_space<vmem>> -> memref<1x1x128xf32, #tpu.memory_space<vmem>>
      %189 = tpu.memref_squeeze %188 : memref<1x1x128xf32, #tpu.memory_space<vmem>> -> memref<128xf32, #tpu.memory_space<vmem>>
      %190 = tpu.memref_slice %arg13[%12] : memref<2x!tpu.dma_semaphore, #tpu.memory_space<semaphore_mem>> -> memref<1x!tpu.dma_semaphore, #tpu.memory_space<semaphore_mem>>
      %191 = tpu.memref_squeeze %190 : memref<1x!tpu.dma_semaphore, #tpu.memory_space<semaphore_mem>> -> memref<!tpu.dma_semaphore, #tpu.memory_space<semaphore_mem>>
      tpu.enqueue_dma source(%187 : memref<128xf32, #tpu.memory_space<any>>) target(%189 : memref<128xf32, #tpu.memory_space<vmem>>) target_semaphore(%191 : memref<!tpu.dma_semaphore, #tpu.memory_space<semaphore_mem>>)
      %c12_i32 = arith.constant 12 : i32
      %192 = arith.addi %59, %c12_i32 : i32
      %193 = arith.index_cast %192 : i32 to index
      %194 = memref.load %arg2[%193] : memref<64xi32, #tpu.memory_space<smem>>
      %c0_i32_100 = arith.constant 0 : i32
      %c63_i32_101 = arith.constant 63 : i32
      %195 = arith.maxsi %c0_i32_100, %194 : i32
      %196 = arith.minsi %c63_i32_101, %195 : i32
      %c12_i32_102 = arith.constant 12 : i32
      %c0_i32_103 = arith.constant 0 : i32
      %197 = tpu.memref_slice %arg10[%196, %c0_i32_103] : memref<64x128xf32, #tpu.memory_space<any>> -> memref<1x128xf32, #tpu.memory_space<any>>
      %198 = tpu.memref_squeeze %197 : memref<1x128xf32, #tpu.memory_space<any>> -> memref<128xf32, #tpu.memory_space<any>>
      %c0_i32_104 = arith.constant 0 : i32
      %199 = tpu.memref_slice %arg12[%12, %c12_i32_102, %c0_i32_104] : memref<2x16x128xf32, #tpu.memory_space<vmem>> -> memref<1x1x128xf32, #tpu.memory_space<vmem>>
      %200 = tpu.memref_squeeze %199 : memref<1x1x128xf32, #tpu.memory_space<vmem>> -> memref<128xf32, #tpu.memory_space<vmem>>
      %201 = tpu.memref_slice %arg13[%12] : memref<2x!tpu.dma_semaphore, #tpu.memory_space<semaphore_mem>> -> memref<1x!tpu.dma_semaphore, #tpu.memory_space<semaphore_mem>>
      %202 = tpu.memref_squeeze %201 : memref<1x!tpu.dma_semaphore, #tpu.memory_space<semaphore_mem>> -> memref<!tpu.dma_semaphore, #tpu.memory_space<semaphore_mem>>
      tpu.enqueue_dma source(%198 : memref<128xf32, #tpu.memory_space<any>>) target(%200 : memref<128xf32, #tpu.memory_space<vmem>>) target_semaphore(%202 : memref<!tpu.dma_semaphore, #tpu.memory_space<semaphore_mem>>)
      %c13_i32 = arith.constant 13 : i32
      %203 = arith.addi %59, %c13_i32 : i32
      %204 = arith.index_cast %203 : i32 to index
      %205 = memref.load %arg2[%204] : memref<64xi32, #tpu.memory_space<smem>>
      %c0_i32_105 = arith.constant 0 : i32
      %c63_i32_106 = arith.constant 63 : i32
      %206 = arith.maxsi %c0_i32_105, %205 : i32
      %207 = arith.minsi %c63_i32_106, %206 : i32
      %c13_i32_107 = arith.constant 13 : i32
      %c0_i32_108 = arith.constant 0 : i32
      %208 = tpu.memref_slice %arg10[%207, %c0_i32_108] : memref<64x128xf32, #tpu.memory_space<any>> -> memref<1x128xf32, #tpu.memory_space<any>>
      %209 = tpu.memref_squeeze %208 : memref<1x128xf32, #tpu.memory_space<any>> -> memref<128xf32, #tpu.memory_space<any>>
      %c0_i32_109 = arith.constant 0 : i32
      %210 = tpu.memref_slice %arg12[%12, %c13_i32_107, %c0_i32_109] : memref<2x16x128xf32, #tpu.memory_space<vmem>> -> memref<1x1x128xf32, #tpu.memory_space<vmem>>
      %211 = tpu.memref_squeeze %210 : memref<1x1x128xf32, #tpu.memory_space<vmem>> -> memref<128xf32, #tpu.memory_space<vmem>>
      %212 = tpu.memref_slice %arg13[%12] : memref<2x!tpu.dma_semaphore, #tpu.memory_space<semaphore_mem>> -> memref<1x!tpu.dma_semaphore, #tpu.memory_space<semaphore_mem>>
      %213 = tpu.memref_squeeze %212 : memref<1x!tpu.dma_semaphore, #tpu.memory_space<semaphore_mem>> -> memref<!tpu.dma_semaphore, #tpu.memory_space<semaphore_mem>>
      tpu.enqueue_dma source(%209 : memref<128xf32, #tpu.memory_space<any>>) target(%211 : memref<128xf32, #tpu.memory_space<vmem>>) target_semaphore(%213 : memref<!tpu.dma_semaphore, #tpu.memory_space<semaphore_mem>>)
      %c14_i32 = arith.constant 14 : i32
      %214 = arith.addi %59, %c14_i32 : i32
      %215 = arith.index_cast %214 : i32 to index
      %216 = memref.load %arg2[%215] : memref<64xi32, #tpu.memory_space<smem>>
      %c0_i32_110 = arith.constant 0 : i32
      %c63_i32_111 = arith.constant 63 : i32
      %217 = arith.maxsi %c0_i32_110, %216 : i32
      %218 = arith.minsi %c63_i32_111, %217 : i32
      %c14_i32_112 = arith.constant 14 : i32
      %c0_i32_113 = arith.constant 0 : i32
      %219 = tpu.memref_slice %arg10[%218, %c0_i32_113] : memref<64x128xf32, #tpu.memory_space<any>> -> memref<1x128xf32, #tpu.memory_space<any>>
      %220 = tpu.memref_squeeze %219 : memref<1x128xf32, #tpu.memory_space<any>> -> memref<128xf32, #tpu.memory_space<any>>
      %c0_i32_114 = arith.constant 0 : i32
      %221 = tpu.memref_slice %arg12[%12, %c14_i32_112, %c0_i32_114] : memref<2x16x128xf32, #tpu.memory_space<vmem>> -> memref<1x1x128xf32, #tpu.memory_space<vmem>>
      %222 = tpu.memref_squeeze %221 : memref<1x1x128xf32, #tpu.memory_space<vmem>> -> memref<128xf32, #tpu.memory_space<vmem>>
      %223 = tpu.memref_slice %arg13[%12] : memref<2x!tpu.dma_semaphore, #tpu.memory_space<semaphore_mem>> -> memref<1x!tpu.dma_semaphore, #tpu.memory_space<semaphore_mem>>
      %224 = tpu.memref_squeeze %223 : memref<1x!tpu.dma_semaphore, #tpu.memory_space<semaphore_mem>> -> memref<!tpu.dma_semaphore, #tpu.memory_space<semaphore_mem>>
      tpu.enqueue_dma source(%220 : memref<128xf32, #tpu.memory_space<any>>) target(%222 : memref<128xf32, #tpu.memory_space<vmem>>) target_semaphore(%224 : memref<!tpu.dma_semaphore, #tpu.memory_space<semaphore_mem>>)
      %c15_i32 = arith.constant 15 : i32
      %225 = arith.addi %59, %c15_i32 : i32
      %226 = arith.index_cast %225 : i32 to index
      %227 = memref.load %arg2[%226] : memref<64xi32, #tpu.memory_space<smem>>
      %c0_i32_115 = arith.constant 0 : i32
      %c63_i32_116 = arith.constant 63 : i32
      %228 = arith.maxsi %c0_i32_115, %227 : i32
      %229 = arith.minsi %c63_i32_116, %228 : i32
      %c15_i32_117 = arith.constant 15 : i32
      %c0_i32_118 = arith.constant 0 : i32
      %230 = tpu.memref_slice %arg10[%229, %c0_i32_118] : memref<64x128xf32, #tpu.memory_space<any>> -> memref<1x128xf32, #tpu.memory_space<any>>
      %231 = tpu.memref_squeeze %230 : memref<1x128xf32, #tpu.memory_space<any>> -> memref<128xf32, #tpu.memory_space<any>>
      %c0_i32_119 = arith.constant 0 : i32
      %232 = tpu.memref_slice %arg12[%12, %c15_i32_117, %c0_i32_119] : memref<2x16x128xf32, #tpu.memory_space<vmem>> -> memref<1x1x128xf32, #tpu.memory_space<vmem>>
      %233 = tpu.memref_squeeze %232 : memref<1x1x128xf32, #tpu.memory_space<vmem>> -> memref<128xf32, #tpu.memory_space<vmem>>
      %234 = tpu.memref_slice %arg13[%12] : memref<2x!tpu.dma_semaphore, #tpu.memory_space<semaphore_mem>> -> memref<1x!tpu.dma_semaphore, #tpu.memory_space<semaphore_mem>>
      %235 = tpu.memref_squeeze %234 : memref<1x!tpu.dma_semaphore, #tpu.memory_space<semaphore_mem>> -> memref<!tpu.dma_semaphore, #tpu.memory_space<semaphore_mem>>
      tpu.enqueue_dma source(%231 : memref<128xf32, #tpu.memory_space<any>>) target(%233 : memref<128xf32, #tpu.memory_space<vmem>>) target_semaphore(%235 : memref<!tpu.dma_semaphore, #tpu.memory_space<semaphore_mem>>)
    } else {
    }
    %c0 = arith.constant 0 : index
    %c0_10 = arith.constant 0 : index
    %20 = vector.load %arg3[%c0, %c0_10] : memref<16x128xf32, #tpu.memory_space<vmem>>, vector<16x128xf32>
    %21 = arith.truncf %20 : vector<16x128xf32> to vector<16x128xbf16>
    %c0_11 = arith.constant 0 : index
    %c0_12 = arith.constant 0 : index
    %22 = vector.load %arg4[%c0_11, %c0_12] : memref<128x128xbf16, #tpu.memory_space<vmem>>, vector<128x128xbf16>
    %cst = arith.constant dense<0.000000e+00> : vector<16x128xf32>
    %23 = tpu.matmul %21, %22, %cst {dimension_numbers = #tpu.dot_dimension_numbers<[1], [0], [0], [1], [0, 0, 1, 1], [], []>} : vector<16x128xbf16>, vector<128x128xbf16>, vector<16x128xf32> -> vector<16x128xf32>
    %c0_13 = arith.constant 0 : index
    %c0_14 = arith.constant 0 : index
    %24 = vector.load %arg5[%c0_13, %c0_14] : memref<1x128xf32, #tpu.memory_space<vmem>>, vector<1x128xf32>
    %25 = vector.broadcast %24 : vector<1x128xf32> to vector<16x128xf32>
    %26 = arith.addf %23, %25 : vector<16x128xf32>
    %27 = math.tanh %26 : vector<16x128xf32>
    %c0_i32_15 = arith.constant 0 : i32
    %c0_i32_16 = arith.constant 0 : i32
    %28 = tpu.memref_slice %arg12[%11, %c0_i32_15, %c0_i32_16] : memref<2x16x128xf32, #tpu.memory_space<vmem>> -> memref<1x16x128xf32, #tpu.memory_space<vmem>>
    %29 = tpu.memref_squeeze %28 : memref<1x16x128xf32, #tpu.memory_space<vmem>> -> memref<16x128xf32, #tpu.memory_space<vmem>>
    %c0_i32_17 = arith.constant 0 : i32
    %c0_i32_18 = arith.constant 0 : i32
    %30 = tpu.memref_slice %arg12[%11, %c0_i32_17, %c0_i32_18] : memref<2x16x128xf32, #tpu.memory_space<vmem>> -> memref<1x16x128xf32, #tpu.memory_space<vmem>>
    %31 = tpu.memref_squeeze %30 : memref<1x16x128xf32, #tpu.memory_space<vmem>> -> memref<16x128xf32, #tpu.memory_space<vmem>>
    %32 = tpu.memref_slice %arg13[%11] : memref<2x!tpu.dma_semaphore, #tpu.memory_space<semaphore_mem>> -> memref<1x!tpu.dma_semaphore, #tpu.memory_space<semaphore_mem>>
    %33 = tpu.memref_squeeze %32 : memref<1x!tpu.dma_semaphore, #tpu.memory_space<semaphore_mem>> -> memref<!tpu.dma_semaphore, #tpu.memory_space<semaphore_mem>>
    tpu.wait_dma2 semaphore(%33 : memref<!tpu.dma_semaphore, #tpu.memory_space<semaphore_mem>>) src(%29 : memref<16x128xf32, #tpu.memory_space<vmem>>) dst(%31 : memref<16x128xf32, #tpu.memory_space<vmem>>)
    %34 = arith.index_cast %11 : i32 to index
    %c0_19 = arith.constant 0 : index
    %c0_20 = arith.constant 0 : index
    %35 = vector.load %arg12[%34, %c0_19, %c0_20] : memref<2x16x128xf32, #tpu.memory_space<vmem>>, vector<1x16x128xf32>
    %36 = vector.shape_cast %35 : vector<1x16x128xf32> to vector<16x128xf32>
    %cst_21 = arith.constant 0.000000e+00 : f32
    %37 = vector.broadcast %cst_21 : f32 to vector<16x128xf32>
    %38 = arith.maximumf %36, %37 : vector<16x128xf32>
    %39 = arith.truncf %38 : vector<16x128xf32> to vector<16x128xbf16>
    %c0_22 = arith.constant 0 : index
    %c0_23 = arith.constant 0 : index
    %40 = vector.load %arg6[%c0_22, %c0_23] : memref<128x256xbf16, #tpu.memory_space<vmem>>, vector<128x256xbf16>
    %cst_24 = arith.constant dense<0.000000e+00> : vector<16x256xf32>
    %41 = tpu.matmul %39, %40, %cst_24 {dimension_numbers = #tpu.dot_dimension_numbers<[1], [0], [0], [1], [0, 0, 1, 1], [], []>} : vector<16x128xbf16>, vector<128x256xbf16>, vector<16x256xf32> -> vector<16x256xf32>
    %c0_25 = arith.constant 0 : index
    %c0_26 = arith.constant 0 : index
    %42 = vector.load %arg7[%c0_25, %c0_26] : memref<1x256xf32, #tpu.memory_space<vmem>>, vector<1x256xf32>
    %43 = vector.broadcast %42 : vector<1x256xf32> to vector<16x256xf32>
    %44 = arith.addf %41, %43 : vector<16x256xf32>
    %cst_27 = arith.constant 0.000000e+00 : f32
    %45 = vector.broadcast %cst_27 : f32 to vector<16x256xf32>
    %46 = arith.maximumf %44, %45 : vector<16x256xf32>
    %47 = arith.truncf %46 : vector<16x256xf32> to vector<16x256xbf16>
    %c0_28 = arith.constant 0 : index
    %c0_29 = arith.constant 0 : index
    %48 = vector.load %arg8[%c0_28, %c0_29] : memref<256x128xbf16, #tpu.memory_space<vmem>>, vector<256x128xbf16>
    %cst_30 = arith.constant dense<0.000000e+00> : vector<16x128xf32>
    %49 = tpu.matmul %47, %48, %cst_30 {dimension_numbers = #tpu.dot_dimension_numbers<[1], [0], [0], [1], [0, 0, 1, 1], [], []>} : vector<16x256xbf16>, vector<256x128xbf16>, vector<16x128xf32> -> vector<16x128xf32>
    %c0_31 = arith.constant 0 : index
    %c0_32 = arith.constant 0 : index
    %50 = vector.load %arg9[%c0_31, %c0_32] : memref<1x128xf32, #tpu.memory_space<vmem>>, vector<1x128xf32>
    %51 = vector.broadcast %50 : vector<1x128xf32> to vector<16x128xf32>
    %52 = arith.addf %49, %51 : vector<16x128xf32>
    %53 = arith.mulf %52, %27 : vector<16x128xf32>
    %cst_33 = arith.constant dense<0.000000e+00> : vector<16xf32>
    %54 = vector.multi_reduction <add>, %53, %cst_33 [1] : vector<16x128xf32> to vector<16xf32>
    %c0_34 = arith.constant 0 : index
    %c0_35 = arith.constant 0 : index
    %c0_36 = arith.constant 0 : index
    %55 = vector.load %arg11[%c0_34, %c0_35, %c0_36] : memref<1x1x16xf32, #tpu.memory_space<vmem>>, vector<1x1x16xf32>
    %56 = vector.shape_cast %55 : vector<1x1x16xf32> to vector<16xf32>
    %57 = vector.shape_cast %54 : vector<16xf32> to vector<1x1x16xf32>
    tpu.vector_store %arg11[%c0_34, %c0_35, %c0_36], %57 {strides = array<i32>} : memref<1x1x16xf32, #tpu.memory_space<vmem>>, vector<1x1x16xf32>,
    return
  }
  func.func @transform_0(%arg0: i32, %arg1: i32, %arg2: memref<64xi32, #tpu.memory_space<smem>>) -> (i32, i32) {
    %c2_i32 = arith.constant 2 : i32
    %0 = arith.muli %arg0, %c2_i32 : i32
    %1 = arith.addi %0, %arg1 : i32
    %c0_i32 = arith.constant 0 : i32
    %c0_i32_0 = arith.constant 0 : i32
    return %1, %c0_i32 : i32, i32
  }
  func.func @transform_1(%arg0: i32, %arg1: i32, %arg2: memref<64xi32, #tpu.memory_space<smem>>) -> (i32, i32) {
    %c0_i32 = arith.constant 0 : i32
    %c0_i32_0 = arith.constant 0 : i32
    %c0_i32_1 = arith.constant 0 : i32
    return %c0_i32, %c0_i32_0 : i32, i32
  }
  func.func @transform_2(%arg0: i32, %arg1: i32, %arg2: memref<64xi32, #tpu.memory_space<smem>>) -> (i32, i32) {
    %c0_i32 = arith.constant 0 : i32
    %c0_i32_0 = arith.constant 0 : i32
    %c0_i32_1 = arith.constant 0 : i32
    return %c0_i32, %c0_i32_0 : i32, i32
  }
  func.func @transform_3(%arg0: i32, %arg1: i32, %arg2: memref<64xi32, #tpu.memory_space<smem>>) -> (i32, i32) {
    %c0_i32 = arith.constant 0 : i32
    %c0_i32_0 = arith.constant 0 : i32
    %c0_i32_1 = arith.constant 0 : i32
    return %c0_i32, %c0_i32_0 : i32, i32
  }
  func.func @transform_4(%arg0: i32, %arg1: i32, %arg2: memref<64xi32, #tpu.memory_space<smem>>) -> (i32, i32) {
    %c0_i32 = arith.constant 0 : i32
    %c0_i32_0 = arith.constant 0 : i32
    %c0_i32_1 = arith.constant 0 : i32
    return %c0_i32, %c0_i32_0 : i32, i32
  }
  func.func @transform_5(%arg0: i32, %arg1: i32, %arg2: memref<64xi32, #tpu.memory_space<smem>>) -> (i32, i32) {
    %c0_i32 = arith.constant 0 : i32
    %c0_i32_0 = arith.constant 0 : i32
    %c0_i32_1 = arith.constant 0 : i32
    return %c0_i32, %c0_i32_0 : i32, i32
  }
  func.func @transform_6(%arg0: i32, %arg1: i32, %arg2: memref<64xi32, #tpu.memory_space<smem>>) -> (i32, i32) {
    %c0_i32 = arith.constant 0 : i32
    %c0_i32_0 = arith.constant 0 : i32
    %c0_i32_1 = arith.constant 0 : i32
    return %c0_i32, %c0_i32_0 : i32, i32
  }
  func.func @transform_8(%arg0: i32, %arg1: i32, %arg2: memref<64xi32, #tpu.memory_space<smem>>) -> (i32, i32, i32) {
    %c2_i32 = arith.constant 2 : i32
    %0 = arith.muli %arg0, %c2_i32 : i32
    %1 = arith.addi %0, %arg1 : i32
    %c0_i32 = arith.constant 0 : i32
    %c0_i32_0 = arith.constant 0 : i32
    %c0_i32_1 = arith.constant 0 : i32
    return %1, %c0_i32, %c0_i32_0 : i32, i32, i32
  }
}

</mosaic_0001>

<bundles_post_ra>
// kernel: tpu_custom_call.1
= control target key start
LH: loop header
LB: loop body
LE: loop exit
PB: predicated region body
PF: predicated region fallthrough
CT: control target
= control target key end

     0   :  { %s4673_s0 = inlined_call_operand.hbm [shape: s32[64], index: 0, kind: input, shape index: {}]   ;;  %s4674_s1 = inlined_call_operand.hbm [shape: f32[64,128], index: 1, kind: input, shape index: {}]   ;;  %s4675_s2 = inlined_call_operand.hbm [shape: bf16[128,128], index: 2, kind: input, shape index: {}]   ;;  %s4676_s3 = inlined_call_operand.vmem [shape: f32[1,128], index: 3, kind: input, shape index: {}]   ;;  %s4677_s4 = inlined_call_operand.hbm [shape: bf16[128,256], index: 4, kind: input, shape index: {}]   ;;  %s4678_s5 = inlined_call_operand.vmem [shape: f32[1,256], index: 5, kind: input, shape index: {}]   ;;  %s4679_s6 = inlined_call_operand.hbm [shape: bf16[256,128], index: 6, kind: input, shape index: {}]   ;;  %s4680_s7 = inlined_call_operand.vmem [shape: f32[1,128], index: 7, kind: input, shape index: {}]   ;;  %s4681_s8 = inlined_call_operand.hbm [shape: f32[64,128], index: 8, kind: input, shape index: {}]   ;;  %s4682_s9 = inlined_call_operand.hbm [shape: f32[4,1,16], index: 9, kind: output, shape index: {}]  }
   0x1   :  { %4700 = sst [smem:[#allocation96_spill]] %s4674_s1  ;;  %s2447_s11 = scalar_lea.hbm %s4673_s0, 16 }
   0x2   :  { %4701 = sst [smem:[#allocation97_spill]] %s4675_s2  ;;  %p2448_p0 = scmp.ne.s32.totalorder %s4673_s0, %s2447_s11 }
   0x3   :  { %4702 = sst [smem:[#allocation98_spill]] %s4676_s3  ;;  %p2451_p1 = scmp.lt.u32.totalorder %s2447_s11, %s4673_s0 }
   0x4   :  { %4703 = sst [smem:[#allocation99_spill]] %s4677_s4 }
   0x5   :  { %4704 = sst [smem:[#allocation100_spill]] %s4678_s5  ;;  %p2453_p2 = pnand %p2451_p1, %p2448_p0 }
   0x6   :  { %4705 = sst [smem:[#allocation101_spill]] %s4679_s6 }
   0x7   :  { %4706 = sst [smem:[#allocation102_spill]] %s4680_s7 }
   0x8   :  { %4707 = sst [smem:[#allocation103_spill]] %s4682_s9 }
   0x9   :  { %2456 = shalt.err (!%p2453_p2)  }
   0xa   :  { %s3451_s16 = smov [#allocation5]  }
   0xb   :  { %15 = dma.hbm_to_smem %s4673_s0, 16, %s3451_s16, [#allocation4] }
   0xc   :  { %3399 = dma.done.wait [#allocation4], 16 }
   0xd   :  { %3400 = vsyncadd [#allocation4], 4294967280 }
   0xe   :  { %17 = sfence }
   0xf   :  { %18 = vsyncpa [#allocation7], 0 }
  0x10   :  { %20 = vsyncpa [#allocation7 + $0x1], 0 }
  0x11   :  { %21 = vsyncpa [#allocation10], 0 }
  0x12   :  { %22 = vsyncpa [#allocation13], 0 }
  0x13   :  { %23 = vsyncpa [#allocation8], 0 }
  0x14   :  { %25 = vsyncpa [#allocation8 + $0x1], 0  ;;  %s3528_s19 = smov 0   ;;  %s3530_s20 = smov 0  }
  0x15   :  { %s3532_s21 = smov 0   ;;  %s3534_s22 = smov 0  }
  0x16   :  { %s3536_s23 = smov 0   ;;  %s3538_s0 = smov 0  }
  0x17   :  { %s3540_s24 = smov 0   ;;  %s3542_s25 = smov 0  }
  0x18 LB: > { %4708 = sst [smem:[#allocation87_spill]] %s3421_s19  ;;  %s1859_s26 = sadd.s32 4294967295, %s3449_s25   ;;  %s3449_s25 = sphi %s3542_s25, %s31_s25   ;;  %s3445_s24 = sphi %s3540_s24, %s4763_s24   ;;  %s3441_s0 = sphi %s3538_s0, %s4762_s0   ;;  %s3437_s23 = sphi %s3536_s23, %s4761_s23   ;;  %s3433_s22 = sphi %s3534_s22, %s4760_s22   ;;  %s3429_s21 = sphi %s3532_s21, %s4759_s21   ;;  %s3425_s20 = sphi %s3530_s20, %s4758_s20   ;;  %s3421_s19 = sphi %s3528_s19, %s4757_s19  }
  0x19   : > { %4709 = sst [smem:[#allocation88_spill]] %s3425_s20  ;;  %s1860_s27 = sadd.s32 4294967294, %s3449_s25  }
  0x1a   : > { %4710 = sst [smem:[#allocation89_spill]] %s3429_s21  ;;  %p67_p3 = scmp.ne.s32.totalorder %s3425_s20, %s3421_s19 }
  0x1b   : > { %4711 = sst [smem:[#allocation90_spill]] %s3441_s0  ;;  %p3572_p4 = scmp.eq.s32.totalorder %s1859_s26, 0 }
  0x1c   : > { %4712 = sst [smem:[#allocation91_spill]] %s3445_s24  ;;  %p3576_p5 = scmp.eq.s32.totalorder %s1859_s26, 3 }
  0x1d   : > { %s4713_s28 = scalar_select %p3572_p4, 1, 0 }
  0x1e   : > { %s4714_s29 = scalar_select %p3576_p5, 1, 0 }
  0x1f   : > { %p227_p6 = scmp.eq.s32.totalorder %s1860_s27, 3  ;;  %p3582_p7 = por %p3572_p4, %p67_p3 }
  0x20   : > { %p1865_p8 = scmp.ge.s32.totalorder %s3449_s25, 1  ;;  %p234_p10 = scmp.lt.s32.totalorder %s3449_s25, 5 }
  0x21   : > { %s4715_s30 = scalar_select %p3582_p7, 1, 0 }
  0x22   : > { %p3587_p9 = por %p227_p6, %p67_p3  ;;  %p3592_p11 = pnand %p1865_p8, %p234_p10 }
  0x23   : > { %s3452_s12 = smov [#allocation9]   ;;  %s3453_s15 = smov [#allocation11]  }
  0x24   : > { %s4716_s10 = scalar_select %p3587_p9, 1, 0 }
  0x25   : > { %s4718_s11 = scalar_select %p3592_p11, 1, 0 }
  0x26   : > { %4717 = sst [smem:[#allocation92_spill]] %s4716_s10  ;;  %s246_s13 = sshll.u32 %s3452_s12, 4  ;;  %s247_s13 = int_to_ptr.vmem [resolvable:$true] %s246_s13 }
  0x27   : > { %p2294_p12 = pneg %p3592_p11  ;;  %s262_s16 = sshll.u32 %s3453_s15, 4  ;;  %s3604_s16 = int_to_ptr.vmem [resolvable:$true] %s262_s16 }
  0x28   : > { %s4720_s2 = sld [smem:[#allocation97_spill]] }
  0x29   : > { %p3600_p13 = pnand %p2294_p12, %p3572_p4 }
  0x2b   : > { %p3614_p1 = pneg %p3600_p13 }
  0x2e   : > { %s2457_s26 = scalar_lea.hbm %s4720_s2, 1024 }
  0x2f   : > { %p2458_p0 = scmp.ne.s32.totalorder %s4720_s2, %s2457_s26  ;;  %p2464_p6 = scmp.lt.u32.totalorder %s2457_s26, %s4720_s2 }
  0x31   : > { %p2460_p2 = pnand %p3614_p1, %p2458_p0 }
  0x33   : > { %p2461_p3 = pneg %p2460_p2 }
  0x35   : > { %p2466_p8 = pnand %p2464_p6, %p2461_p3 }
  0x37   : > { %2469 = shalt.err (!%p2466_p8)
}
  0x38   : > { %s2470_s17 = scalar_lea.vmem %s247_s13, 1024  ;;  %p2478_p4 = scmp.lt.s32.totalorder %s247_s13, %s247_s13 }
  0x39   : > { %p2471_p10 = scmp.ne.s32.totalorder %s247_s13, %s2470_s17  ;;  %p2479_p7 = scmp.lt.s32.totalorder %s2470_s17, %s2470_s17 }
  0x3b   : > { %p2473_p12 = pnand %p2471_p10, %p3614_p1  ;;  %p2480_p11 = por %p2479_p7, %p2478_p4 }
  0x3d   : > { %p2474_p9 = pneg %p2473_p12 }
  0x3f   : > { %p2481_p5 = pnand %p2480_p11, %p2474_p9 }
  0x41   : > { %2484 = shalt.err (!%p2481_p5)
}
  0x42   : > { %s4690_s10 = smov 64   ;;  %s4691_s18 = smov 4  }
  0x43   : > { %2297 = dma.hbm_to_vmem [thread:$0]  (!%p3600_p13), %s4720_s2, 1024, %s247_s13, [#allocation10], %s4690_s10, %s4690_s10, %s4691_s18  }
  0x44   : > { %s4722_s4 = sld [smem:[#allocation99_spill]] }
  0x4a   : > { %s2485_s9 = scalar_lea.hbm %s4722_s4, 2048 }
  0x4b   : > { %p2486_p4 = scmp.ne.s32.totalorder %s4722_s4, %s2485_s9  ;;  %p2492_p9 = scmp.lt.u32.totalorder %s2485_s9, %s4722_s4 }
  0x4d   : > { %p2488_p5 = pnand %p2486_p4, %p3614_p1 }
  0x4f   : > { %p2489_p7 = pneg %p2488_p5 }
  0x51   : > { %p2494_p11 = pnand %p2492_p9, %p2489_p7 }
  0x53   : > { %2497 = shalt.err (!%p2494_p11)
}
  0x54   : > { %s2498_s13 = scalar_lea.vmem %s3604_s16, 2048  ;;  %p2506_p6 = scmp.lt.s32.totalorder %s3604_s16, %s3604_s16 }
  0x55   : > { %p2499_p0 = scmp.ne.s32.totalorder %s3604_s16, %s2498_s13  ;;  %p2507_p8 = scmp.lt.s32.totalorder %s2498_s13, %s2498_s13 }
  0x57   : > { %p2501_p2 = pnand %p2499_p0, %p3614_p1  ;;  %p2508_p10 = por %p2507_p8, %p2506_p6 }
  0x59   : > { %p2502_p3 = pneg %p2501_p2 }
  0x5b   : > { %p2509_p12 = pnand %p2508_p10, %p2502_p3 }
  0x5d   : > { %2512 = shalt.err (!%p2509_p12)
}
  0x5e   : > { %s4692_s7 = smov 128   ;;  %s4693_s3 = smov 8  }
  0x5f   : > { %2300 = dma.hbm_to_vmem [thread:$0]  (!%p3600_p13), %s4722_s4, 2048, %s3604_s16, [#allocation10], %s4692_s7, %s4692_s7, %s4693_s3  }
  0x60   : > { %s3458_s19 = smov [#allocation12]   ;;  %s4723_s6 = sld [smem:[#allocation101_spill]] }
  0x61   : > { %s278_s26 = sshll.u32 %s3458_s19, 4  ;;  %s279_s26 = int_to_ptr.vmem [resolvable:$true] %s278_s26 }
  0x66   : > { %s2513_s17 = scalar_lea.hbm %s4723_s6, 2048 }
  0x67   : > { %p2514_p4 = scmp.ne.s32.totalorder %s4723_s6, %s2513_s17  ;;  %p2520_p9 = scmp.lt.u32.totalorder %s2513_s17, %s4723_s6 }
  0x69   : > { %p2516_p5 = pnand %p2514_p4, %p3614_p1 }
  0x6b   : > { %p2517_p7 = pneg %p2516_p5 }
  0x6d   : > { %p2522_p11 = pnand %p2520_p9, %p2517_p7 }
  0x6f   : > { %2525 = shalt.err (!%p2522_p11)
}
  0x70   : > { %s2526_s16 = scalar_lea.vmem %s279_s26, 2048  ;;  %p2534_p6 = scmp.lt.s32.totalorder %s279_s26, %s279_s26 }
  0x71   : > { %p2527_p0 = scmp.ne.s32.totalorder %s279_s26, %s2526_s16  ;;  %p2535_p8 = scmp.lt.s32.totalorder %s2526_s16, %s2526_s16 }
  0x73   : > { %p2529_p2 = pnand %p2527_p0, %p3614_p1  ;;  %p2536_p10 = por %p2535_p8, %p2534_p6 }
  0x75   : > { %p2530_p3 = pneg %p2529_p2 }
  0x77   : > { %p2537_p12 = pnand %p2536_p10, %p2530_p3 }
  0x79   : > { %2540 = shalt.err (!%p2537_p12)
}
  0x7a   : > { %s4724_s10 = smov 4   ;;  %s4725_s5 = smov 64  }
  0x7b   : > { %2303 = dma.hbm_to_vmem [thread:$0]  (!%p3600_p13), %s4723_s6, 2048, %s279_s26, [#allocation13], %s4725_s5, %s4725_s5, %s4724_s10  }
  0x7c   : > { %s40_s14 = sadd.s32 1, %s3441_s0  ;;  %s43_s12 = sadd.s32 1, %s3445_s24 }
  0x7d   : > { %p41_p1 = scmp.ge.s32.totalorder %s40_s14, 2  ;;  %s1861_s9 = sshll.u32 %s3445_s24, 1 }
  0x7e   : > { %s54_s19 = sadd.s32 1, %s3429_s21  ;;  %s48_s27 = sadd.s32 %s3441_s0, %s1861_s9 }
  0x7f   : > { %s4765_s14 = smov (%p41_p1, %s40_s14), 0  ;;  %s4767_s12 = smov (!%p41_p1, %s43_s12), %s3445_s24 }
  0x80   : > { %4726 = sst [smem:[#allocation93_spill]] %s4765_s14  ;;  %p61_p4 = scmp.ne.s32.totalorder %s3429_s21, %s3425_s20 }
  0x81   : > { %p45_p5 = scmp.ge.s32.totalorder %s4767_s12, 2  ;;  %p62_p7 = scmp.eq.s32.totalorder %s3449_s25, 0 }
  0x82   : > { %p4727_p9 = scmp.ne.s32.totalorder %s4714_s29, 0  ;;  %p2315_p13 = scmp.lt.s32.totalorder %s3449_s25, 4 }
  0x83   : > { %s4769_s12 = smov (%p45_p5, %s4767_s12), 0  ;;  %p3700_p0 = por %p62_p7, %p61_p4 }
  0x84   : > { %p3693_p11 = por %p4727_p9, %p61_p4  ;;  %4729 = sst [smem:[#allocation94_spill]] %s4769_s12 }
  0x85   : > { %s295_s17 = sand.u32 1, %s3429_s21   ;;  %s1862_s13 = sshll.u32 %s4769_s12, 1 }
  0x86   : > { %s50_s16 = sadd.s32 %s1862_s13, %s4765_s14  ;;  %s1870_s10 = sshll.u32 %s295_s17, 4 }
  0x87   : > { %s51_s5 = ssub.s32 %s48_s27, %s50_s16  ;;  %s2160_s29 = sshll.u32 %s48_s27, 8 }
  0x88   : > { %p52_p2 = scmp.eq.s32.totalorder %s51_s5, 0  ;;  %s4731_s1 = sld [smem:[#allocation96_spill]] }
  0x89   : > { %s299_s7 = scalar_lea.vmem [#allocation6], %s1870_s10  ;;  %p3721_p3 = pnand %p2315_p13, %p3700_p0 }
  0x8a   : > { %s308_s3 = sshll.u32 %s299_s7, 4  ;;  %s3725_s27 = scalar_lea.sflag [#allocation7], %s295_s17  ;;  %s3715_s3 = int_to_ptr.vmem [resolvable:$true] %s308_s3 }
  0x8b   : > { %s3713_s4 = scalar_select %p52_p2, %s3429_s21, %s54_s19  }
  0x8c   : > { %p2543_p8 = pneg %p3721_p3 }
  0x8d   : > { %4732 = sst [smem:[#allocation95_spill]] %s3713_s4 }
  0x8e   : > { %s3710_s9 = scalar_lea.hbm %s4731_s1, %s2160_s29  ;;  %s2546_s26 = scalar_lea.hbm %s4731_s1, 1024 }
  0x8f   : > { %s2541_s16 = scalar_lea.hbm %s3710_s9, 256  ;;  %p2547_p1 = scmp.lt.u32.totalorder %s3710_s9, %s4731_s1 }
  0x90   : > { %p2542_p6 = scmp.ne.s32.totalorder %s3710_s9, %s2541_s16  ;;  %p2548_p4 = scmp.lt.u32.totalorder %s2546_s26, %s2541_s16 }
  0x91   : > { %p2550_p7 = scmp.lt.u32.totalorder %s2541_s16, %s3710_s9 }
  0x92   : > { %p2544_p10 = pnand %p2543_p8, %p2542_p6  ;;  %p2549_p5 = por %p2548_p4, %p2547_p1 }
  0x94   : > { %p2545_p12 = pneg %p2544_p10  ;;  %p2551_p9 = por %p2550_p7, %p2549_p5 }
  0x96   : > { %p2552_p13 = pnand %p2551_p9, %p2545_p12 }
  0x98   : > { %2555 = shalt.err (!%p2552_p13)
}
  0x99   : > { %s2556_s17 = scalar_lea.vmem %s3715_s3, 256  ;;  %s3459_s29 = smov [#allocation6]  }
  0x9a   : > { %p2557_p0 = scmp.ne.s32.totalorder %s3715_s3, %s2556_s17  ;;  %s2561_s2 = sshll.u32 %s3459_s29, 4  ;;  %s2562_s2 = int_to_ptr.vmem [resolvable:$false] %s2561_s2 }
  0x9b   : > { %s2563_s18 = scalar_lea.vmem %s2562_s2, 512  ;;  %p2564_p10 = scmp.lt.s32.totalorder %s3715_s3, %s2562_s2 }
  0x9c   : > { %p2559_p2 = pnand %p2557_p0, %p2543_p8  ;;  %p2565_p1 = scmp.lt.s32.totalorder %s2563_s18, %s2556_s17 }
  0x9e   : > { %p2560_p6 = pneg %p2559_p2  ;;  %p2566_p4 = por %p2565_p1, %p2564_p10 }
  0xa0   : > { %p2567_p5 = pnand %p2566_p4, %p2560_p6 }
  0xa2   : > { %2570 = shalt.err (!%p2567_p5)
}
  0xa3   : > { %s4734_s16 = smov 8   ;;  %s4735_s7 = smov 128  }
  0xa4   : > { %2307 = dma.hbm_to_vmem [thread:$0]  (!%p3721_p3), %s3710_s9, 256, %s3715_s3, %s3725_s27, %s4735_s7, %s4735_s7, %s4734_s16  }
  0xa5   : > { %p4736_p8 = scmp.ne.s32.totalorder %s4718_s11, 0 }
  0xa6   : > { %s3759_s19 = sand.u32 (!%p4736_p8), 1, %s3425_s20   ;;  %p4737_p12 = scmp.ne.s32.totalorder (!%p4736_p8), %s4715_s30, 0 }
  0xa7   : > { %320 = sbr.rel (%p4736_p8) target bundleno = 1894 (0x766), region = 48  ;;  %s1875_s26 = sshll.u32 (!%p4736_p8), %s3759_s19, 4 }
  0xa8   : > { %s323_s10 = scalar_lea.sflag (!%p4736_p8), [#allocation7], %s3759_s19  ;;  %s3763_s5 = scalar_lea.vmem (!%p4736_p8), [#allocation6], %s1875_s26 }
  0xae   : > { %3402 = dma.done.wait (%p4737_p12), %s323_s10, 256  }
  0xaf   : > { %3404 = vsyncadd (%p4737_p12), %s323_s10, 4294967040  ;;  %p4738_p3 = scmp.ne.s32.totalorder %s4713_s28, 0 }
  0xb1   : > { %3406 = dma.done.wait (%p4738_p3), [#allocation10], 3072  }
  0xb2   : > { %3408 = vsyncadd (%p4738_p3), [#allocation10], 4294964224 }
  0xb3   : > { %3410 = dma.done.wait (%p4738_p3), [#allocation13], 2048  }
  0xb4   : > { %3412 = vsyncadd (%p4738_p3), [#allocation13], 4294965248  ;;  %s1879_s30 = sshll.u32 %s3437_s23, 1  ;;  %p376_p7 = scmp.lt.s32.totalorder %s3433_s22, 0 }
  0xb5   : > { %s3779_s11 = sadd.s32 %s3433_s22, %s1879_s30  ;;  %s377_s3 = ssub.s32 0, %s3433_s22 }
  0xb6   : > { %s1880_s9 = smin.u32 %s3433_s22, %s377_s3  ;;  %p1883_p13 = scmp.ne.s32.totalorder %s3433_s22, 0 }
  0xb7   : > { %s379_s13 = sand.u32 1, %s1880_s9   ;;  %s3790_s23 = sshll.u32 (!%p1883_p13), %s3779_s11, 4 }
  0xb8   : > { %s380_s27 = ssub.s32 0, %s379_s13  ;;  %392 = sbr.rel (%p1883_p13) target bundleno = 589 (0x24d), region = 68 }
  0xb9   : > { %s4771_s27 = smov (!%p376_p7, %s380_s27), %s379_s13  ;;  %s394_s18 = sld [smem:[#allocation5 + %s3790_s23]] (!%p1883_p13) }
  0xba   : > { %p1882_p9 = scmp.lt.s32.totalorder %s4771_s27, 0  ;;  %s386_s17 = sadd.s32 2, %s4771_s27 }
  0xbb   : > { %s415_s26 = sadd.s32 (!%p1883_p13), 1, %s3790_s23  ;;  %s436_s9 = sadd.s32 (!%p1883_p13), 2, %s3790_s23 }
  0xbc   : > { %s4773_s17 = smov (!%p1882_p9, %s386_s17), %s4771_s27  ;;  %s3800_s10 = sld [smem:[#allocation5 + %s415_s26]] (!%p1883_p13) }
  0xbd   : > { %s1891_s2 = sshll.u32 (!%p1883_p13), %s4773_s17, 4  ;;  %s3806_s13 = sld [smem:[#allocation5 + %s436_s9]] (!%p1883_p13) }
  0xbe   : > { %s3794_s16 = scalar_lea.vmem (!%p1883_p13), [#allocation2], %s1891_s2  ;;  %s3821_s9 = scalar_lea.sflag (!%p1883_p13), [#allocation3], %s4773_s17 }
  0xbf   : > { %s411_s7 = sshll.u32 %s3794_s16, 4  ;;  %s1635_s30 = scalar_lea.vmem %s3794_s16, 1 [#allocation2]  ;;  %s3797_s7 = int_to_ptr.vmem [resolvable:$true] %s411_s7 }
  0xc0   : > { %s432_s3 = sshll.u32 %s1635_s30, 4  ;;  %p395_p0 = scmp.gt.s32.totalorder %s394_s18, 0  ;;  %s3804_s3 = int_to_ptr.vmem [resolvable:$true] %s432_s3 }
  0xc1   : > { %p1885_p2 = scmp.lt.s32.totalorder %s394_s18, 63  ;;  %s3826_s2 = scalar_lea.hbm %s4681_s8, 1024 }
  0xc2   : > { %s4775_s18 = smov (!%p395_p0, %s394_s18), 0  ;;  %p417_p6 = scmp.gt.s32.totalorder %s3800_s10, 0 }
  0xc3   : > { %p1892_p10 = scmp.lt.s32.totalorder %s3800_s10, 63  ;;  %s4777_s18 = smov (!%p1885_p2, %s4775_s18), 63 }
  0xc4   : > { %s3813_s26 = scalar_select %p417_p6, %s3800_s10, 0 }
  0xc5   : > { %s1890_s29 = sshll.u32 %s4777_s18, 4  ;;  %p438_p1 = scmp.gt.s32.totalorder %s3806_s13, 0 }
  0xc6   : > { %s400_s1 = scalar_lea.hbm %s4681_s8, %s1890_s29  ;;  %p1899_p4 = scmp.lt.s32.totalorder %s3806_s13, 63 }
  0xc7   : > { %s2571_s6 = scalar_lea.hbm %s400_s1, 16  ;;  %p2574_p8 = scmp.lt.u32.totalorder %s400_s1, %s4681_s8 }
  0xc8   : > { %p2572_p5 = scmp.ne.s32.totalorder %s400_s1, %s2571_s6  ;;  %p2575_p12 = scmp.lt.u32.totalorder %s3826_s2, %s2571_s6 }
  0xc9   : > { %p2577_p7 = scmp.lt.u32.totalorder %s2571_s6, %s400_s1 }
  0xca   : > { %p2576_p3 = por %p2575_p12, %p2574_p8 }
  0xcc   : > { %p2578_p9 = por %p2577_p7, %p2576_p3 }
  0xce   : > { %p2579_p13 = pnand %p2578_p9, %p2572_p5 }
  0xd0   : > { %2582 = shalt.err (!%p2579_p13)  }
  0xd1   : > { %s2583_s28 = scalar_lea.vmem %s3797_s7, 16  ;;  %s3460_s29 = smov [#allocation2]  }
  0xd2   : > { %p2584_p0 = scmp.ne.s32.totalorder %s3797_s7, %s2583_s28  ;;  %s2585_s12 = sshll.u32 %s3460_s29, 4  ;;  %s3834_s12 = int_to_ptr.vmem [resolvable:$false] %s2585_s12 }
  0xd3   : > { %s3837_s24 = scalar_lea.vmem %s3834_s12, 512  ;;  %p2588_p2 = scmp.lt.s32.totalorder %s3797_s7, %s3834_s12 }
  0xd4   : > { %p2589_p6 = scmp.lt.s32.totalorder %s3837_s24, %s2583_s28 }
  0xd6   : > { %p2590_p8 = por %p2589_p6, %p2588_p2 }
  0xd8   : > { %p2591_p12 = pnand %p2590_p8, %p2584_p0 }
  0xda   : > { %2594 = shalt.err (!%p2591_p12)  }
  0xdb   : > { %414 = dma.hbm_to_vmem [thread:$0]  %s400_s1, 16, %s3797_s7, %s3821_s9 }
  0xdc   : > { %s4779_s26 = smov (!%p1892_p10, %s3813_s26), 63  ;;  %s4739_s18 = scalar_lea.vmem %s3794_s16, 2 [#allocation2] }
  0xdd   : > { %s439_s6 = scalar_select %p438_p1, %s3806_s13, 0 }
  0xde   : > { %s1897_s14 = sshll.u32 %s4779_s26, 4  ;;  %s453_s27 = sshll.u32 %s4739_s18, 4  ;;  %s3855_s27 = int_to_ptr.vmem [resolvable:$true] %s453_s27 }
  0xdf   : > { %s422_s29 = scalar_lea.hbm %s4681_s8, %s1897_s14 }
  0xe0   : > { %s2595_s0 = scalar_lea.hbm %s422_s29, 16  ;;  %p2598_p3 = scmp.lt.u32.totalorder %s422_s29, %s4681_s8 }
  0xe1   : > { %p2596_p5 = scmp.ne.s32.totalorder %s422_s29, %s2595_s0  ;;  %p2599_p7 = scmp.lt.u32.totalorder %s3826_s2, %s2595_s0 }
  0xe2   : > { %p2601_p10 = scmp.lt.u32.totalorder %s2595_s0, %s422_s29 }
  0xe3   : > { %p2600_p9 = por %p2599_p7, %p2598_p3 }
  0xe5   : > { %p2602_p13 = por %p2601_p10, %p2600_p9 }
  0xe7   : > { %p2603_p1 = pnand %p2602_p13, %p2596_p5 }
  0xe9   : > { %2606 = shalt.err (!%p2603_p1)  }
  0xea   : > { %s2607_s1 = scalar_lea.vmem %s3804_s3, 16  ;;  %p2612_p2 = scmp.lt.s32.totalorder %s3804_s3, %s3834_s12 }
  0xeb   : > { %p2608_p0 = scmp.ne.s32.totalorder %s3804_s3, %s2607_s1  ;;  %p2613_p6 = scmp.lt.s32.totalorder %s3837_s24, %s2607_s1 }
  0xed   : > { %p2614_p8 = por %p2613_p6, %p2612_p2 }
  0xef   : > { %p2615_p12 = pnand %p2614_p8, %p2608_p0 }
  0xf1   : > { %2618 = shalt.err (!%p2615_p12)  }
  0xf2   : > { %435 = dma.hbm_to_vmem [thread:$0]  %s422_s29, 16, %s3804_s3, %s3821_s9 }
  0xf3   : > { %s4781_s6 = smov (!%p1899_p4, %s439_s6), 63  ;;  %s4740_s4 = sadd.s32 3, %s3790_s23 }
  0xf4   : > { %s3872_s21 = sld [smem:[#allocation5 + %s4740_s4]]  ;;  %s1645_s0 = scalar_lea.vmem %s3794_s16, 3 [#allocation2] }
  0xf5   : > { %s1904_s7 = sshll.u32 %s4781_s6, 4  ;;  %s474_s10 = sshll.u32 %s1645_s0, 4  ;;  %s3878_s10 = int_to_ptr.vmem [resolvable:$true] %s474_s10 }
  0xf6   : > { %s443_s18 = scalar_lea.hbm %s4681_s8, %s1904_s7 }
  0xf7   : > { %s2619_s30 = scalar_lea.hbm %s443_s18, 16  ;;  %p2622_p3 = scmp.lt.u32.totalorder %s443_s18, %s4681_s8 }
  0xf8   : > { %p2620_p5 = scmp.ne.s32.totalorder %s443_s18, %s2619_s30  ;;  %p2623_p7 = scmp.lt.u32.totalorder %s3826_s2, %s2619_s30 }
  0xf9   : > { %p2625_p9 = scmp.lt.u32.totalorder %s2619_s30, %s443_s18 }
  0xfa   : > { %p2624_p4 = por %p2623_p7, %p2622_p3 }
  0xfc   : > { %p2626_p10 = por %p2625_p9, %p2624_p4 }
  0xfe   : > { %p2627_p13 = pnand %p2626_p10, %p2620_p5 }
 0x100   : > { %2630 = shalt.err (!%p2627_p13)  }
 0x101   : > { %s2631_s3 = scalar_lea.vmem %s3855_s27, 16  ;;  %p2636_p0 = scmp.lt.s32.totalorder %s3855_s27, %s3834_s12 }
 0x102   : > { %p2632_p1 = scmp.ne.s32.totalorder %s3855_s27, %s2631_s3  ;;  %p2637_p2 = scmp.lt.s32.totalorder %s3837_s24, %s2631_s3 }
 0x104   : > { %p2638_p6 = por %p2637_p2, %p2636_p0 }
 0x106   : > { %p2639_p8 = pnand %p2638_p6, %p2632_p1 }
 0x108   : > { %2642 = shalt.err (!%p2639_p8)  }
 0x109   : > { %456 = dma.hbm_to_vmem [thread:$0]  %s443_s18, 16, %s3855_s27, %s3821_s9 }
 0x10a   : > { %s478_s13 = sadd.s32 4, %s3790_s23  ;;  %s1650_s6 = scalar_lea.vmem %s3794_s16, 4 [#allocation2] }
 0x10b   : > { %s3893_s29 = sld [smem:[#allocation5 + %s478_s13]]  ;;  %s495_s4 = sshll.u32 %s1650_s6, 4  ;;  %s3897_s4 = int_to_ptr.vmem [resolvable:$true] %s495_s4 }
 0x10c   : > { %p459_p12 = scmp.gt.s32.totalorder %s3872_s21, 0  ;;  %p1906_p5 = scmp.lt.s32.totalorder %s3872_s21, 63 }
 0x10d   : > { %s499_s0 = sadd.s32 5, %s3790_s23  ;;  %s1655_s26 = scalar_lea.vmem %s3794_s16, 5 [#allocation2] }
 0x10e   : > { %s4783_s21 = smov (!%p459_p12, %s3872_s21), 0  ;;  %s3901_s7 = sld [smem:[#allocation5 + %s499_s0]] }
 0x10f   : > { %s4785_s21 = smov (!%p1906_p5, %s4783_s21), 63  ;;  %s516_s14 = sshll.u32 %s1655_s26, 4  ;;  %s3909_s14 = int_to_ptr.vmem [resolvable:$true] %s516_s14 }
 0x110   : > { %s1911_s27 = sshll.u32 %s4785_s21, 4 }
 0x111   : > { %p480_p3 = scmp.gt.s32.totalorder %s3893_s29, 0  ;;  %s464_s28 = scalar_lea.hbm %s4681_s8, %s1911_s27 }
 0x112   : > { %s2643_s1 = scalar_lea.hbm %s464_s28, 16  ;;  %p2646_p9 = scmp.lt.u32.totalorder %s464_s28, %s4681_s8 }
 0x113   : > { %p2644_p4 = scmp.ne.s32.totalorder %s464_s28, %s2643_s1  ;;  %p2647_p10 = scmp.lt.u32.totalorder %s3826_s2, %s2643_s1 }
 0x114   : > { %p2649_p1 = scmp.lt.u32.totalorder %s2643_s1, %s464_s28 }
 0x115   : > { %p2648_p13 = por %p2647_p10, %p2646_p9 }
 0x117   : > { %p2650_p0 = por %p2649_p1, %p2648_p13 }
 0x119   : > { %p2651_p2 = pnand %p2650_p0, %p2644_p4 }
 0x11b   : > { %2654 = shalt.err (!%p2651_p2)  }
 0x11c   : > { %s2655_s21 = scalar_lea.vmem %s3878_s10, 16  ;;  %p2660_p8 = scmp.lt.s32.totalorder %s3878_s10, %s3834_s12 }
 0x11d   : > { %p2656_p6 = scmp.ne.s32.totalorder %s3878_s10, %s2655_s21  ;;  %p2661_p12 = scmp.lt.s32.totalorder %s3837_s24, %s2655_s21 }
 0x11f   : > { %p2662_p5 = por %p2661_p12, %p2660_p8 }
 0x121   : > { %p2663_p7 = pnand %p2662_p5, %p2656_p6 }
 0x123   : > { %2666 = shalt.err (!%p2663_p7)  }
 0x124   : > { %477 = dma.hbm_to_vmem [thread:$0]  %s464_s28, 16, %s3878_s10, %s3821_s9 }
 0x125   : > { %s481_s6 = scalar_select %p480_p3, %s3893_s29, 0 }
 0x126   : > { %p501_p4 = scmp.gt.s32.totalorder %s3901_s7, 0  ;;  %p1920_p9 = scmp.lt.s32.totalorder %s3901_s7, 63 }
 0x127   : > { %p4741_p10 = scmp.lt.s32.totalorder %s3893_s29, 63  ;;  %s520_s27 = sadd.s32 6, %s3790_s23 }
 0x128   : > { %s502_s0 = scalar_select %p501_p4, %s3901_s7, 0 }
 0x129   : > { %s4787_s6 = smov (!%p4741_p10, %s481_s6), 63  ;;  %s3934_s3 = sld [smem:[#allocation5 + %s520_s27]] }
 0x12a   : > { %s1918_s26 = sshll.u32 %s4787_s6, 4 }
 0x12b   : > { %s485_s1 = scalar_lea.hbm %s4681_s8, %s1918_s26 }
 0x12c   : > { %s2667_s13 = scalar_lea.hbm %s485_s1, 16  ;;  %p2670_p13 = scmp.lt.u32.totalorder %s485_s1, %s4681_s8 }
 0x12d   : > { %p2668_p7 = scmp.ne.s32.totalorder %s485_s1, %s2667_s13  ;;  %p2671_p3 = scmp.lt.u32.totalorder %s3826_s2, %s2667_s13 }
 0x12e   : > { %p2673_p0 = scmp.lt.u32.totalorder %s2667_s13, %s485_s1 }
 0x12f   : > { %p2672_p1 = por %p2671_p3, %p2670_p13 }
 0x131   : > { %p2674_p2 = por %p2673_p0, %p2672_p1 }
 0x133   : > { %p2675_p6 = pnand %p2674_p2, %p2668_p7 }
 0x135   : > { %2678 = shalt.err (!%p2675_p6)  }
 0x136   : > { %s2679_s10 = scalar_lea.vmem %s3897_s4, 16  ;;  %p2684_p12 = scmp.lt.s32.totalorder %s3897_s4, %s3834_s12 }
 0x137   : > { %p2680_p8 = scmp.ne.s32.totalorder %s3897_s4, %s2679_s10  ;;  %p2685_p5 = scmp.lt.s32.totalorder %s3837_s24, %s2679_s10 }
 0x139   : > { %p2686_p4 = por %p2685_p5, %p2684_p12 }
 0x13b   : > { %p2687_p10 = pnand %p2686_p4, %p2680_p8 }
 0x13d   : > { %2690 = shalt.err (!%p2687_p10)  }
 0x13e   : > { %498 = dma.hbm_to_vmem [thread:$0]  %s485_s1, 16, %s3897_s4, %s3821_s9 }
 0x13f   : > { %s4789_s0 = smov (!%p1920_p9, %s502_s0), 63  ;;  %s1660_s20 = scalar_lea.vmem %s3794_s16, 6 [#allocation2] }
 0x140   : > { %s541_s29 = sadd.s32 7, %s3790_s23  ;;  %s1925_s28 = sshll.u32 %s4789_s0, 4 }
 0x141   : > { %s537_s6 = sshll.u32 %s1660_s20, 4  ;;  %s506_s18 = scalar_lea.hbm %s4681_s8, %s1925_s28  ;;  %s3954_s6 = int_to_ptr.vmem [resolvable:$true] %s537_s6 }
 0x142   : > { %s2691_s30 = scalar_lea.hbm %s506_s18, 16  ;;  %p2694_p13 = scmp.lt.u32.totalorder %s506_s18, %s4681_s8 }
 0x143   : > { %p2692_p7 = scmp.ne.s32.totalorder %s506_s18, %s2691_s30  ;;  %p2695_p3 = scmp.lt.u32.totalorder %s3826_s2, %s2691_s30 }
 0x144   : > { %p2697_p0 = scmp.lt.u32.totalorder %s2691_s30, %s506_s18 }
 0x145   : > { %p2696_p1 = por %p2695_p3, %p2694_p13 }
 0x147   : > { %p2698_p9 = por %p2697_p0, %p2696_p1 }
 0x149   : > { %p2699_p2 = pnand %p2698_p9, %p2692_p7 }
 0x14b   : > { %2702 = shalt.err (!%p2699_p2)  }
 0x14c   : > { %s2703_s4 = scalar_lea.vmem %s3909_s14, 16  ;;  %p2708_p8 = scmp.lt.s32.totalorder %s3909_s14, %s3834_s12 }
 0x14d   : > { %p2704_p6 = scmp.ne.s32.totalorder %s3909_s14, %s2703_s4  ;;  %p2709_p12 = scmp.lt.s32.totalorder %s3837_s24, %s2703_s4 }
 0x14f   : > { %p2710_p5 = por %p2709_p12, %p2708_p8 }
 0x151   : > { %p2711_p4 = pnand %p2710_p5, %p2704_p6 }
 0x153   : > { %2714 = shalt.err (!%p2711_p4)  }
 0x154   : > { %519 = dma.hbm_to_vmem [thread:$0]  %s506_s18, 16, %s3909_s14, %s3821_s9 }
 0x155   : > { %p522_p10 = scmp.gt.s32.totalorder %s3934_s3, 0  ;;  %p1927_p7 = scmp.lt.s32.totalorder %s3934_s3, 63 }
 0x156   : > { %s3969_s7 = sld [smem:[#allocation5 + %s541_s29]]  ;;  %s1665_s0 = scalar_lea.vmem %s3794_s16, 7 [#allocation2] }
 0x157   : > { %s4791_s3 = smov (!%p522_p10, %s3934_s3), 0  ;;  %s558_s1 = sshll.u32 %s1665_s0, 4  ;;  %s3974_s1 = int_to_ptr.vmem [resolvable:$true] %s558_s1 }
 0x158   : > { %s562_s10 = sadd.s32 8, %s3790_s23  ;;  %s4793_s3 = smov (!%p1927_p7, %s4791_s3), 63 }
 0x159   : > { %s3976_s20 = sld [smem:[#allocation5 + %s562_s10]]  ;;  %s1932_s28 = sshll.u32 %s4793_s3, 4 }
 0x15a   : > { %s1670_s26 = scalar_lea.vmem %s3794_s16, 8 [#allocation2]  ;;  %s527_s14 = scalar_lea.hbm %s4681_s8, %s1932_s28 }
 0x15b   : > { %s2715_s18 = scalar_lea.hbm %s527_s14, 16  ;;  %p2718_p1 = scmp.lt.u32.totalorder %s527_s14, %s4681_s8 }
 0x15c   : > { %p543_p13 = scmp.gt.s32.totalorder %s3969_s7, 0  ;;  %p2716_p3 = scmp.ne.s32.totalorder %s527_s14, %s2715_s18 }
 0x15d   : > { %p2719_p0 = scmp.lt.u32.totalorder %s3826_s2, %s2715_s18  ;;  %p2721_p2 = scmp.lt.u32.totalorder %s2715_s18, %s527_s14 }
 0x15f   : > { %p2720_p9 = por %p2719_p0, %p2718_p1 }
 0x161   : > { %p2722_p6 = por %p2721_p2, %p2720_p9 }
 0x163   : > { %p2723_p8 = pnand %p2722_p6, %p2716_p3 }
 0x165   : > { %2726 = shalt.err (!%p2723_p8)  }
 0x166   : > { %s2727_s3 = scalar_lea.vmem %s3954_s6, 16  ;;  %p2732_p5 = scmp.lt.s32.totalorder %s3954_s6, %s3834_s12 }
 0x167   : > { %p2728_p12 = scmp.ne.s32.totalorder %s3954_s6, %s2727_s3  ;;  %p2733_p4 = scmp.lt.s32.totalorder %s3837_s24, %s2727_s3 }
 0x169   : > { %p2734_p10 = por %p2733_p4, %p2732_p5 }
 0x16b   : > { %p2735_p7 = pnand %p2734_p10, %p2728_p12 }
 0x16d   : > { %2738 = shalt.err (!%p2735_p7)  }
 0x16e   : > { %540 = dma.hbm_to_vmem [thread:$0]  %s527_s14, 16, %s3954_s6, %s3821_s9 }
 0x16f   : > { %s544_s21 = scalar_select %p543_p13, %s3969_s7, 0 }
 0x170   : > { %p1934_p3 = scmp.lt.s32.totalorder %s3969_s7, 63  ;;  %s579_s4 = sshll.u32 %s1670_s26, 4  ;;  %s4001_s4 = int_to_ptr.vmem [resolvable:$true] %s579_s4 }
 0x171   : > { %p564_p1 = scmp.gt.s32.totalorder %s3976_s20, 0  ;;  %p1941_p0 = scmp.lt.s32.totalorder %s3976_s20, 63 }
 0x172   : > { %s4795_s21 = smov (!%p1934_p3, %s544_s21), 63  ;;  %s583_s18 = sadd.s32 9, %s3790_s23 }
 0x173   : > { %s565_s0 = scalar_select %p564_p1, %s3976_s20, 0 }
 0x174   : > { %s1939_s10 = sshll.u32 %s4795_s21, 4 }
 0x175   : > { %s548_s30 = scalar_lea.hbm %s4681_s8, %s1939_s10 }
 0x176   : > { %s2739_s29 = scalar_lea.hbm %s548_s30, 16  ;;  %p2742_p13 = scmp.lt.u32.totalorder %s548_s30, %s4681_s8 }
 0x177   : > { %p2740_p9 = scmp.ne.s32.totalorder %s548_s30, %s2739_s29  ;;  %p2743_p2 = scmp.lt.u32.totalorder %s3826_s2, %s2739_s29 }
 0x178   : > { %p2745_p8 = scmp.lt.u32.totalorder %s2739_s29, %s548_s30 }
 0x179   : > { %p2744_p6 = por %p2743_p2, %p2742_p13 }
 0x17b   : > { %p2746_p12 = por %p2745_p8, %p2744_p6 }
 0x17d   : > { %p2747_p5 = pnand %p2746_p12, %p2740_p9 }
 0x17f   : > { %2750 = shalt.err (!%p2747_p5)  }
 0x180   : > { %s2751_s7 = scalar_lea.vmem %s3974_s1, 16  ;;  %p2756_p10 = scmp.lt.s32.totalorder %s3974_s1, %s3834_s12 }
 0x181   : > { %p2752_p4 = scmp.ne.s32.totalorder %s3974_s1, %s2751_s7  ;;  %p2757_p7 = scmp.lt.s32.totalorder %s3837_s24, %s2751_s7 }
 0x183   : > { %p2758_p3 = por %p2757_p7, %p2756_p10 }
 0x185   : > { %p2759_p1 = pnand %p2758_p3, %p2752_p4 }
 0x187   : > { %2762 = shalt.err (!%p2759_p1)  }
 0x188   : > { %561 = dma.hbm_to_vmem [thread:$0]  %s548_s30, 16, %s3974_s1, %s3821_s9 }
 0x189   : > { %s4797_s0 = smov (!%p1941_p0, %s565_s0), 63  ;;  %s4020_s26 = sld [smem:[#allocation5 + %s583_s18]] }
 0x18a   : > { %s1675_s14 = scalar_lea.vmem %s3794_s16, 9 [#allocation2]  ;;  %s1946_s3 = sshll.u32 %s4797_s0, 4 }
 0x18b   : > { %s569_s28 = scalar_lea.hbm %s4681_s8, %s1946_s3  ;;  %s600_s27 = sshll.u32 %s1675_s14, 4  ;;  %s4039_s27 = int_to_ptr.vmem [resolvable:$true] %s600_s27 }
 0x18c   : > { %s2763_s29 = scalar_lea.hbm %s569_s28, 16  ;;  %p2766_p13 = scmp.lt.u32.totalorder %s569_s28, %s4681_s8 }
 0x18d   : > { %p2764_p9 = scmp.ne.s32.totalorder %s569_s28, %s2763_s29  ;;  %p2767_p2 = scmp.lt.u32.totalorder %s3826_s2, %s2763_s29 }
 0x18e   : > { %p2769_p8 = scmp.lt.u32.totalorder %s2763_s29, %s569_s28 }
 0x18f   : > { %p2768_p6 = por %p2767_p2, %p2766_p13 }
 0x191   : > { %p2770_p12 = por %p2769_p8, %p2768_p6 }
 0x193   : > { %p2771_p0 = pnand %p2770_p12, %p2764_p9 }
 0x195   : > { %2774 = shalt.err (!%p2771_p0)  }
 0x196   : > { %s2775_s1 = scalar_lea.vmem %s4001_s4, 16  ;;  %p2780_p4 = scmp.lt.s32.totalorder %s4001_s4, %s3834_s12 }
 0x197   : > { %p2776_p5 = scmp.ne.s32.totalorder %s4001_s4, %s2775_s1  ;;  %p2781_p10 = scmp.lt.s32.totalorder %s3837_s24, %s2775_s1 }
 0x199   : > { %p2782_p7 = por %p2781_p10, %p2780_p4 }
 0x19b   : > { %p2783_p3 = pnand %p2782_p7, %p2776_p5 }
 0x19d   : > { %2786 = shalt.err (!%p2783_p3)  }
 0x19e   : > { %582 = dma.hbm_to_vmem [thread:$0]  %s569_s28, 16, %s4001_s4, %s3821_s9 }
 0x19f   : > { %s604_s20 = sadd.s32 10, %s3790_s23  ;;  %s1680_s0 = scalar_lea.vmem %s3794_s16, 10 [#allocation2] }
 0x1a0   : > { %s4041_s30 = sld [smem:[#allocation5 + %s604_s20]]  ;;  %p585_p1 = scmp.gt.s32.totalorder %s4020_s26, 0 }
 0x1a1   : > { %p1948_p9 = scmp.lt.s32.totalorder %s4020_s26, 63  ;;  %s621_s18 = sshll.u32 %s1680_s0, 4  ;;  %s4051_s18 = int_to_ptr.vmem [resolvable:$true] %s621_s18 }
 0x1a2   : > { %s625_s7 = sadd.s32 11, %s3790_s23  ;;  %s4799_s26 = smov (!%p585_p1, %s4020_s26), 0 }
 0x1a3   : > { %s4047_s14 = sld [smem:[#allocation5 + %s625_s7]]  ;;  %s1685_s3 = scalar_lea.vmem %s3794_s16, 11 [#allocation2] }
 0x1a4   : > { %s4801_s26 = smov (!%p1948_p9, %s4799_s26), 63  ;;  %s4057_s29 = sshll.u32 %s1685_s3, 4  ;;  %s643_s29 = int_to_ptr.vmem [resolvable:$true] %s4057_s29 }
 0x1a5   : > { %s1953_s4 = sshll.u32 %s4801_s26, 4 }
 0x1a6   : > { %p606_p13 = scmp.gt.s32.totalorder %s4041_s30, 0  ;;  %s590_s28 = scalar_lea.hbm %s4681_s8, %s1953_s4 }
 0x1a7   : > { %s2787_s13 = scalar_lea.hbm %s590_s28, 16  ;;  %p2790_p8 = scmp.lt.u32.totalorder %s590_s28, %s4681_s8 }
 0x1a8   : > { %p2788_p6 = scmp.ne.s32.totalorder %s590_s28, %s2787_s13  ;;  %p2791_p12 = scmp.lt.u32.totalorder %s3826_s2, %s2787_s13 }
 0x1a9   : > { %p2793_p5 = scmp.lt.u32.totalorder %s2787_s13, %s590_s28 }
 0x1aa   : > { %p2792_p0 = por %p2791_p12, %p2790_p8 }
 0x1ac   : > { %p2794_p4 = por %p2793_p5, %p2792_p0 }
 0x1ae   : > { %p2795_p10 = pnand %p2794_p4, %p2788_p6 }
 0x1b0   : > { %2798 = shalt.err (!%p2795_p10)  }
 0x1b1   : > { %s2799_s26 = scalar_lea.vmem %s4039_s27, 16  ;;  %p2804_p3 = scmp.lt.s32.totalorder %s4039_s27, %s3834_s12 }
 0x1b2   : > { %p2800_p7 = scmp.ne.s32.totalorder %s4039_s27, %s2799_s26  ;;  %p2805_p1 = scmp.lt.s32.totalorder %s3837_s24, %s2799_s26 }
 0x1b4   : > { %p2806_p9 = por %p2805_p1, %p2804_p3 }
 0x1b6   : > { %p2807_p2 = pnand %p2806_p9, %p2800_p7 }
 0x1b8   : > { %2810 = shalt.err (!%p2807_p2)  }
 0x1b9   : > { %603 = dma.hbm_to_vmem [thread:$0]  %s590_s28, 16, %s4039_s27, %s3821_s9 }
 0x1ba   : > { %s607_s20 = scalar_select %p606_p13, %s4041_s30, 0 }
 0x1bb   : > { %p627_p6 = scmp.gt.s32.totalorder %s4047_s14, 0  ;;  %p1962_p8 = scmp.lt.s32.totalorder %s4047_s14, 63 }
 0x1bc   : > { %p4742_p12 = scmp.lt.s32.totalorder %s4041_s30, 63  ;;  %s646_s3 = sadd.s32 12, %s3790_s23 }
 0x1bd   : > { %s628_s0 = scalar_select %p627_p6, %s4047_s14, 0 }
 0x1be   : > { %s4803_s20 = smov (!%p4742_p12, %s607_s20), 63  ;;  %s4082_s13 = sld [smem:[#allocation5 + %s646_s3]] }
 0x1bf   : > { %s1960_s7 = sshll.u32 %s4803_s20, 4 }
 0x1c0   : > { %s611_s10 = scalar_lea.hbm %s4681_s8, %s1960_s7 }
 0x1c1   : > { %s2811_s6 = scalar_lea.hbm %s611_s10, 16  ;;  %p2814_p0 = scmp.lt.u32.totalorder %s611_s10, %s4681_s8 }
 0x1c2   : > { %p2812_p2 = scmp.ne.s32.totalorder %s611_s10, %s2811_s6  ;;  %p2815_p13 = scmp.lt.u32.totalorder %s3826_s2, %s2811_s6 }
 0x1c3   : > { %p2817_p4 = scmp.lt.u32.totalorder %s2811_s6, %s611_s10 }
 0x1c4   : > { %p2816_p5 = por %p2815_p13, %p2814_p0 }
 0x1c6   : > { %p2818_p10 = por %p2817_p4, %p2816_p5 }
 0x1c8   : > { %p2819_p7 = pnand %p2818_p10, %p2812_p2 }
 0x1ca   : > { %2822 = shalt.err (!%p2819_p7)  }
 0x1cb   : > { %s2823_s27 = scalar_lea.vmem %s4051_s18, 16  ;;  %p2828_p1 = scmp.lt.s32.totalorder %s4051_s18, %s3834_s12 }
 0x1cc   : > { %p2824_p3 = scmp.ne.s32.totalorder %s4051_s18, %s2823_s27  ;;  %p2829_p9 = scmp.lt.s32.totalorder %s3837_s24, %s2823_s27 }
 0x1ce   : > { %p2830_p6 = por %p2829_p9, %p2828_p1 }
 0x1d0   : > { %p2831_p12 = pnand %p2830_p6, %p2824_p3 }
 0x1d2   : > { %2834 = shalt.err (!%p2831_p12)  }
 0x1d3   : > { %624 = dma.hbm_to_vmem [thread:$0]  %s611_s10, 16, %s4051_s18, %s3821_s9 }
 0x1d4   : > { %s4805_s0 = smov (!%p1962_p8, %s628_s0), 63  ;;  %s1690_s30 = scalar_lea.vmem %s3794_s16, 12 [#allocation2] }
 0x1d5   : > { %s1967_s28 = sshll.u32 %s4805_s0, 4  ;;  %s667_s20 = sadd.s32 13, %s3790_s23 }
 0x1d6   : > { %s632_s4 = scalar_lea.hbm %s4681_s8, %s1967_s28  ;;  %s663_s21 = sshll.u32 %s1690_s30, 4  ;;  %s664_s21 = int_to_ptr.vmem [resolvable:$true] %s663_s21 }
 0x1d7   : > { %s2835_s6 = scalar_lea.hbm %s632_s4, 16  ;;  %p2838_p0 = scmp.lt.u32.totalorder %s632_s4, %s4681_s8 }
 0x1d8   : > { %p2836_p2 = scmp.ne.s32.totalorder %s632_s4, %s2835_s6  ;;  %p2839_p13 = scmp.lt.u32.totalorder %s3826_s2, %s2835_s6 }
 0x1d9   : > { %p2841_p4 = scmp.lt.u32.totalorder %s2835_s6, %s632_s4 }
 0x1da   : > { %p2840_p5 = por %p2839_p13, %p2838_p0 }
 0x1dc   : > { %p2842_p10 = por %p2841_p4, %p2840_p5 }
 0x1de   : > { %p2843_p8 = pnand %p2842_p10, %p2836_p2 }
 0x1e0   : > { %2846 = shalt.err (!%p2843_p8)  }
 0x1e1   : > { %s2847_s18 = scalar_lea.vmem %s643_s29, 16  ;;  %p2852_p3 = scmp.lt.s32.totalorder %s643_s29, %s3834_s12 }
 0x1e2   : > { %p2848_p7 = scmp.ne.s32.totalorder %s643_s29, %s2847_s18  ;;  %p2853_p1 = scmp.lt.s32.totalorder %s3837_s24, %s2847_s18 }
 0x1e4   : > { %p2854_p9 = por %p2853_p1, %p2852_p3 }
 0x1e6   : > { %p2855_p6 = pnand %p2854_p9, %p2848_p7 }
 0x1e8   : > { %2858 = shalt.err (!%p2855_p6)  }
 0x1e9   : > { %645 = dma.hbm_to_vmem [thread:$0]  %s632_s4, 16, %s643_s29, %s3821_s9 }
 0x1ea   : > { %p648_p12 = scmp.gt.s32.totalorder %s4082_s13, 0  ;;  %p1969_p0 = scmp.lt.s32.totalorder %s4082_s13, 63 }
 0x1eb   : > { %s4112_s14 = sld [smem:[#allocation5 + %s667_s20]]  ;;  %s1695_s0 = scalar_lea.vmem %s3794_s16, 13 [#allocation2] }
 0x1ec   : > { %s4807_s13 = smov (!%p648_p12, %s4082_s13), 0  ;;  %s684_s10 = sshll.u32 %s1695_s0, 4  ;;  %s4119_s10 = int_to_ptr.vmem [resolvable:$true] %s684_s10 }
 0x1ed   : > { %s688_s27 = sadd.s32 14, %s3790_s23  ;;  %s4809_s13 = smov (!%p1969_p0, %s4807_s13), 63 }
 0x1ee   : > { %s4117_s30 = sld [smem:[#allocation5 + %s688_s27]]  ;;  %s1974_s28 = sshll.u32 %s4809_s13, 4 }
 0x1ef   : > { %s653_s29 = scalar_lea.hbm %s4681_s8, %s1974_s28 }
 0x1f0   : > { %s2859_s4 = scalar_lea.hbm %s653_s29, 16  ;;  %p2862_p5 = scmp.lt.u32.totalorder %s653_s29, %s4681_s8 }
 0x1f1   : > { %p669_p2 = scmp.gt.s32.totalorder %s4112_s14, 0  ;;  %p2860_p13 = scmp.ne.s32.totalorder %s653_s29, %s2859_s4 }
 0x1f2   : > { %p2863_p4 = scmp.lt.u32.totalorder %s3826_s2, %s2859_s4  ;;  %p2865_p8 = scmp.lt.u32.totalorder %s2859_s4, %s653_s29 }
 0x1f4   : > { %p2864_p10 = por %p2863_p4, %p2862_p5 }
 0x1f6   : > { %p2866_p7 = por %p2865_p8, %p2864_p10 }
 0x1f8   : > { %p2867_p3 = pnand %p2866_p7, %p2860_p13 }
 0x1fa   : > { %2870 = shalt.err (!%p2867_p3)  }
 0x1fb   : > { %s2871_s13 = scalar_lea.vmem %s664_s21, 16  ;;  %p2876_p9 = scmp.lt.s32.totalorder %s664_s21, %s3834_s12 }
 0x1fc   : > { %p2872_p1 = scmp.ne.s32.totalorder %s664_s21, %s2871_s13  ;;  %p2877_p6 = scmp.lt.s32.totalorder %s3837_s24, %s2871_s13 }
 0x1fe   : > { %p2878_p12 = por %p2877_p6, %p2876_p9 }
 0x200   : > { %p2879_p0 = pnand %p2878_p12, %p2872_p1 }
 0x202   : > { %2882 = shalt.err (!%p2879_p0)  }
 0x203   : > { %666 = dma.hbm_to_vmem [thread:$0]  %s653_s29, 16, %s664_s21, %s3821_s9 }
 0x204   : > { %s670_s1 = scalar_select %p669_p2, %s4112_s14, 0 }
 0x205   : > { %p1976_p13 = scmp.lt.s32.totalorder %s4112_s14, 63  ;;  %s1700_s26 = scalar_lea.vmem %s3794_s16, 14 [#allocation2] }
 0x206   : > { %p690_p5 = scmp.gt.s32.totalorder %s4117_s30, 0  ;;  %p1983_p4 = scmp.lt.s32.totalorder %s4117_s30, 63 }
 0x207   : > { %s4811_s1 = smov (!%p1976_p13, %s670_s1), 63  ;;  %s705_s27 = sshll.u32 %s1700_s26, 4  ;;  %s706_s27 = int_to_ptr.vmem [resolvable:$true] %s705_s27 }
 0x208   : > { %s691_s18 = scalar_select %p690_p5, %s4117_s30, 0 }
 0x209   : > { %s1981_s0 = sshll.u32 %s4811_s1, 4  ;;  %s709_s4 = sadd.s32 15, %s3790_s23 }
 0x20a   : > { %s674_s3 = scalar_lea.hbm %s4681_s8, %s1981_s0 }
 0x20b   : > { %s2883_s20 = scalar_lea.hbm %s674_s3, 16  ;;  %p2886_p8 = scmp.lt.u32.totalorder %s674_s3, %s4681_s8 }
 0x20c   : > { %p2884_p10 = scmp.ne.s32.totalorder %s674_s3, %s2883_s20  ;;  %p2887_p2 = scmp.lt.u32.totalorder %s3826_s2, %s2883_s20 }
 0x20d   : > { %p2889_p3 = scmp.lt.u32.totalorder %s2883_s20, %s674_s3 }
 0x20e   : > { %p2888_p7 = por %p2887_p2, %p2886_p8 }
 0x210   : > { %p2890_p1 = por %p2889_p3, %p2888_p7 }
 0x212   : > { %p2891_p9 = pnand %p2890_p1, %p2884_p10 }
 0x214   : > { %2894 = shalt.err (!%p2891_p9)  }
 0x215   : > { %s2895_s21 = scalar_lea.vmem %s4119_s10, 16  ;;  %p2900_p12 = scmp.lt.s32.totalorder %s4119_s10, %s3834_s12 }
 0x216   : > { %p2896_p6 = scmp.ne.s32.totalorder %s4119_s10, %s2895_s21  ;;  %p2901_p0 = scmp.lt.s32.totalorder %s3837_s24, %s2895_s21 }
 0x218   : > { %p2902_p13 = por %p2901_p0, %p2900_p12 }
 0x21a   : > { %p2903_p5 = pnand %p2902_p13, %p2896_p6 }
 0x21c   : > { %2906 = shalt.err (!%p2903_p5)  }
 0x21d   : > { %687 = dma.hbm_to_vmem [thread:$0]  %s674_s3, 16, %s4119_s10, %s3821_s9 }
 0x21e   : > { %s4813_s18 = smov (!%p1983_p4, %s691_s18), 63  ;;  %s710_s23 = sld [smem:[#allocation5 + %s709_s4]] }
 0x21f   : > { %s1988_s14 = sshll.u32 %s4813_s18, 4 }
 0x220   : > { %s695_s26 = scalar_lea.hbm %s4681_s8, %s1988_s14 }
 0x221   : > { %s2907_s0 = scalar_lea.hbm %s695_s26, 16  ;;  %p2910_p8 = scmp.lt.u32.totalorder %s695_s26, %s4681_s8 }
 0x222   : > { %p2908_p10 = scmp.ne.s32.totalorder %s695_s26, %s2907_s0  ;;  %p2911_p2 = scmp.lt.u32.totalorder %s3826_s2, %s2907_s0 }
 0x223   : > { %p2913_p3 = scmp.lt.u32.totalorder %s2907_s0, %s695_s26 }
 0x224   : > { %p2912_p7 = por %p2911_p2, %p2910_p8 }
 0x226   : > { %p2914_p1 = por %p2913_p3, %p2912_p7 }
 0x228   : > { %p2915_p9 = pnand %p2914_p1, %p2908_p10 }
 0x22a   : > { %2918 = shalt.err (!%p2915_p9)  }
 0x22b   : > { %s2919_s10 = scalar_lea.vmem %s706_s27, 16  ;;  %p2924_p6 = scmp.lt.s32.totalorder %s706_s27, %s3834_s12 }
 0x22c   : > { %p2920_p4 = scmp.ne.s32.totalorder %s706_s27, %s2919_s10  ;;  %p2925_p12 = scmp.lt.s32.totalorder %s3837_s24, %s2919_s10 }
 0x22e   : > { %p2926_p0 = por %p2925_p12, %p2924_p6 }
 0x230   : > { %p2927_p13 = pnand %p2926_p0, %p2920_p4 }
 0x232   : > { %2930 = shalt.err (!%p2927_p13)  }
 0x233   : > { %708 = dma.hbm_to_vmem [thread:$0]  %s695_s26, 16, %s706_s27, %s3821_s9 }
 0x234   : > { %s1705_s30 = scalar_lea.vmem %s3794_s16, 15 [#allocation2]  ;;  %p711_p5 = scmp.gt.s32.totalorder %s710_s23, 0 }
 0x235   : > { %p1990_p8 = scmp.lt.s32.totalorder %s710_s23, 63  ;;  %s726_s18 = sshll.u32 %s1705_s30, 4  ;;  %s727_s18 = int_to_ptr.vmem [resolvable:$true] %s726_s18 }
 0x236   : > { %s4815_s23 = smov (!%p711_p5, %s710_s23), 0 }
 0x237   : > { %s4817_s23 = smov (!%p1990_p8, %s4815_s23), 63 }
 0x238   : > { %s1995_s3 = sshll.u32 %s4817_s23, 4 }
 0x239   : > { %s716_s6 = scalar_lea.hbm %s4681_s8, %s1995_s3 }
 0x23a   : > { %s2931_s13 = scalar_lea.hbm %s716_s6, 16  ;;  %p2934_p2 = scmp.lt.u32.totalorder %s716_s6, %s4681_s8 }
 0x23b   : > { %p2932_p10 = scmp.ne.s32.totalorder %s716_s6, %s2931_s13  ;;  %p2935_p7 = scmp.lt.u32.totalorder %s3826_s2, %s2931_s13 }
 0x23c   : > { %p2937_p1 = scmp.lt.u32.totalorder %s2931_s13, %s716_s6 }
 0x23d   : > { %p2936_p3 = por %p2935_p7, %p2934_p2 }
 0x23f   : > { %p2938_p9 = por %p2937_p1, %p2936_p3 }
 0x241   : > { %p2939_p4 = pnand %p2938_p9, %p2932_p10 }
 0x243   : > { %2942 = shalt.err (!%p2939_p4)  }
 0x244   : > { %s2943_s16 = scalar_lea.vmem %s727_s18, 16  ;;  %p2948_p12 = scmp.lt.s32.totalorder %s727_s18, %s3834_s12 }
 0x245   : > { %p2944_p6 = scmp.ne.s32.totalorder %s727_s18, %s2943_s16  ;;  %p2949_p0 = scmp.lt.s32.totalorder %s3837_s24, %s2943_s16 }
 0x247   : > { %p2950_p13 = por %p2949_p0, %p2948_p12 }
 0x249   : > { %p2951_p5 = pnand %p2950_p13, %p2944_p6 }
 0x24b   : > { %2954 = shalt.err (!%p2951_p5)  }
 0x24c   : > { %729 = dma.hbm_to_vmem [thread:$0]  %s716_s6, 16, %s727_s18, %s3821_s9 }
 0x24d PF: > { %s730_s27 = sadd.s32 1, %s3433_s22 }
 0x24e   : > { %p1997_p8 = scmp.ge.s32.totalorder %s730_s27, 2 }
 0x24f   : > { %s2193_s2 = sshll.u32 (!%p1997_p8), %s3779_s11, 4  ;;  %s4743_s23 = ssub.s32 (!%p1997_p8), 1, %s4773_s17 }
 0x250   : > { %734 = sbr.rel (%p1997_p8) target bundleno = 996 (0x3e4), region = 136  ;;  %s2005_s29 = sshll.u32 (!%p1997_p8), %s4743_s23, 4 }
 0x251   : > { %s4182_s1 = sadd.s32 (!%p1997_p8), 16, %s2193_s2  ;;  %s4185_s24 = scalar_lea.vmem (!%p1997_p8), [#allocation2], %s2005_s29 }
 0x252   : > { %s737_s12 = sld [smem:[#allocation5 + %s4182_s1]] (!%p1997_p8)  ;;  %s754_s22 = sshll.u32 (!%p1997_p8), %s4185_s24, 4  ;;  %s4189_s22 = int_to_ptr.vmem [resolvable:$true] %s754_s22 }
 0x253   : > { %s758_s9 = sadd.s32 (!%p1997_p8), 1, %s4182_s1  ;;  %s1715_s0 = scalar_lea.vmem (!%p1997_p8), %s4185_s24, 1 [#allocation2] }
 0x254   : > { %s4191_s26 = sld [smem:[#allocation5 + %s758_s9]] (!%p1997_p8)  ;;  %s779_s28 = sadd.s32 (!%p1997_p8), 2, %s4182_s1 }
 0x255   : > { %s775_s7 = sshll.u32 (!%p1997_p8), %s1715_s0, 4  ;;  %s4195_s10 = sld [smem:[#allocation5 + %s779_s28]] (!%p1997_p8)  ;;  %s4197_s7 = int_to_ptr.vmem [resolvable:$true] %s775_s7 }
 0x256   : > { %s1720_s30 = scalar_lea.vmem (!%p1997_p8), %s4185_s24, 2 [#allocation2]  ;;  %s800_s3 = sadd.s32 (!%p1997_p8), 3, %s4182_s1 }
 0x257   : > { %s4200_s18 = sshll.u32 %s1720_s30, 4  ;;  %s4744_s14 = smov %s4743_s23  ;;  %s4245_s18 = int_to_ptr.vmem [resolvable:$true] %s4200_s18 }
 0x258   : > { %p738_p10 = scmp.gt.s32.totalorder %s737_s12, 0  ;;  %p1999_p2 = scmp.lt.s32.totalorder %s737_s12, 63 }
 0x259   : > { %s4215_s16 = scalar_lea.sflag [#allocation3], %s4744_s14  ;;  %s4220_s29 = scalar_lea.hbm %s4681_s8, 1024 }
 0x25a   : > { %s4819_s12 = smov (!%p738_p10, %s737_s12), 0  ;;  %p760_p7 = scmp.gt.s32.totalorder %s4191_s26, 0 }
 0x25b   : > { %p2006_p3 = scmp.lt.s32.totalorder %s4191_s26, 63  ;;  %s4821_s12 = smov (!%p1999_p2, %s4819_s12), 63 }
 0x25c   : > { %s4206_s4 = scalar_select %p760_p7, %s4191_s26, 0 }
 0x25d   : > { %s2004_s20 = sshll.u32 %s4821_s12, 4  ;;  %p781_p1 = scmp.gt.s32.totalorder %s4195_s10, 0 }
 0x25e   : > { %s743_s21 = scalar_lea.hbm %s4681_s8, %s2004_s20  ;;  %p2013_p9 = scmp.lt.s32.totalorder %s4195_s10, 63 }
 0x25f   : > { %s2955_s27 = scalar_lea.hbm %s743_s21, 16  ;;  %p2958_p6 = scmp.lt.u32.totalorder %s743_s21, %s4681_s8 }
 0x260   : > { %p2956_p4 = scmp.ne.s32.totalorder %s743_s21, %s2955_s27  ;;  %p2959_p12 = scmp.lt.u32.totalorder %s4220_s29, %s2955_s27 }
 0x261   : > { %p2961_p13 = scmp.lt.u32.totalorder %s2955_s27, %s743_s21 }
 0x262   : > { %p2960_p0 = por %p2959_p12, %p2958_p6 }
 0x264   : > { %p2962_p5 = por %p2961_p13, %p2960_p0 }
 0x266   : > { %p2963_p8 = pnand %p2962_p5, %p2956_p4 }
 0x268   : > { %2966 = shalt.err (!%p2963_p8)  }
 0x269   : > { %s2967_s12 = scalar_lea.vmem %s4189_s22, 16  ;;  %s3461_s28 = smov [#allocation2]  }
 0x26a   : > { %p2968_p10 = scmp.ne.s32.totalorder %s4189_s22, %s2967_s12  ;;  %s2969_s30 = sshll.u32 %s3461_s28, 4  ;;  %s4228_s30 = int_to_ptr.vmem [resolvable:$false] %s2969_s30 }
 0x26b   : > { %s4231_s20 = scalar_lea.vmem %s4228_s30, 512  ;;  %p2972_p2 = scmp.lt.s32.totalorder %s4189_s22, %s4228_s30 }
 0x26c   : > { %p2973_p7 = scmp.lt.s32.totalorder %s4231_s20, %s2967_s12 }
 0x26e   : > { %p2974_p6 = por %p2973_p7, %p2972_p2 }
 0x270   : > { %p2975_p12 = pnand %p2974_p6, %p2968_p10 }
 0x272   : > { %2978 = shalt.err (!%p2975_p12)  }
 0x273   : > { %757 = dma.hbm_to_vmem [thread:$0]  %s743_s21, 16, %s4189_s22, %s4215_s16 }
 0x274   : > { %s4823_s4 = smov (!%p2006_p3, %s4206_s4), 63  ;;  %s4252_s23 = sld [smem:[#allocation5 + %s800_s3]] }
 0x275   : > { %s782_s6 = scalar_select %p781_p1, %s4195_s10, 0 }
 0x276   : > { %s2011_s13 = sshll.u32 %s4823_s4, 4 }
 0x277   : > { %s765_s2 = scalar_lea.hbm %s4681_s8, %s2011_s13 }
 0x278   : > { %s2979_s9 = scalar_lea.hbm %s765_s2, 16  ;;  %p2982_p0 = scmp.lt.u32.totalorder %s765_s2, %s4681_s8 }
 0x279   : > { %p2980_p4 = scmp.ne.s32.totalorder %s765_s2, %s2979_s9  ;;  %p2983_p13 = scmp.lt.u32.totalorder %s4220_s29, %s2979_s9 }
 0x27a   : > { %p2985_p5 = scmp.lt.u32.totalorder %s2979_s9, %s765_s2 }
 0x27b   : > { %p2984_p3 = por %p2983_p13, %p2982_p0 }
 0x27d   : > { %p2986_p1 = por %p2985_p5, %p2984_p3 }
 0x27f   : > { %p2987_p8 = pnand %p2986_p1, %p2980_p4 }
 0x281   : > { %2990 = shalt.err (!%p2987_p8)  }
 0x282   : > { %s2991_s22 = scalar_lea.vmem %s4197_s7, 16  ;;  %p2996_p2 = scmp.lt.s32.totalorder %s4197_s7, %s4228_s30 }
 0x283   : > { %p2992_p10 = scmp.ne.s32.totalorder %s4197_s7, %s2991_s22  ;;  %p2997_p7 = scmp.lt.s32.totalorder %s4231_s20, %s2991_s22 }
 0x285   : > { %p2998_p6 = por %p2997_p7, %p2996_p2 }
 0x287   : > { %p2999_p12 = pnand %p2998_p6, %p2992_p10 }
 0x289   : > { %3002 = shalt.err (!%p2999_p12)  }
 0x28a   : > { %778 = dma.hbm_to_vmem [thread:$0]  %s765_s2, 16, %s4197_s7, %s4215_s16 }
 0x28b   : > { %s4825_s6 = smov (!%p2013_p9, %s782_s6), 63  ;;  %s1725_s26 = scalar_lea.vmem %s4185_s24, 3 [#allocation2] }
 0x28c   : > { %s821_s3 = sadd.s32 4, %s4182_s1  ;;  %s2018_s4 = sshll.u32 %s4825_s6, 4 }
 0x28d   : > { %s817_s21 = sshll.u32 %s1725_s26, 4  ;;  %s786_s14 = scalar_lea.hbm %s4681_s8, %s2018_s4  ;;  %s4272_s21 = int_to_ptr.vmem [resolvable:$true] %s817_s21 }
 0x28e   : > { %s3003_s27 = scalar_lea.hbm %s786_s14, 16  ;;  %p3006_p0 = scmp.lt.u32.totalorder %s786_s14, %s4681_s8 }
 0x28f   : > { %p3004_p4 = scmp.ne.s32.totalorder %s786_s14, %s3003_s27  ;;  %p3007_p13 = scmp.lt.u32.totalorder %s4220_s29, %s3003_s27 }
 0x290   : > { %p3009_p5 = scmp.lt.u32.totalorder %s3003_s27, %s786_s14 }
 0x291   : > { %p3008_p3 = por %p3007_p13, %p3006_p0 }
 0x293   : > { %p3010_p9 = por %p3009_p5, %p3008_p3 }
 0x295   : > { %p3011_p1 = pnand %p3010_p9, %p3004_p4 }
 0x297   : > { %3014 = shalt.err (!%p3011_p1)  }
 0x298   : > { %s3015_s7 = scalar_lea.vmem %s4245_s18, 16  ;;  %p3020_p10 = scmp.lt.s32.totalorder %s4245_s18, %s4228_s30 }
 0x299   : > { %p3016_p8 = scmp.ne.s32.totalorder %s4245_s18, %s3015_s7  ;;  %p3021_p2 = scmp.lt.s32.totalorder %s4231_s20, %s3015_s7 }
 0x29b   : > { %p3022_p7 = por %p3021_p2, %p3020_p10 }
 0x29d   : > { %p3023_p6 = pnand %p3022_p7, %p3016_p8 }
 0x29f   : > { %3026 = shalt.err (!%p3023_p6)  }
 0x2a0   : > { %799 = dma.hbm_to_vmem [thread:$0]  %s786_s14, 16, %s4245_s18, %s4215_s16 }
 0x2a1   : > { %p802_p12 = scmp.gt.s32.totalorder %s4252_s23, 0  ;;  %p2020_p4 = scmp.lt.s32.totalorder %s4252_s23, 63 }
 0x2a2   : > { %s4287_s10 = sld [smem:[#allocation5 + %s821_s3]]  ;;  %s1730_s6 = scalar_lea.vmem %s4185_s24, 4 [#allocation2] }
 0x2a3   : > { %s4827_s23 = smov (!%p802_p12, %s4252_s23), 0  ;;  %s838_s2 = sshll.u32 %s1730_s6, 4  ;;  %s4292_s2 = int_to_ptr.vmem [resolvable:$true] %s838_s2 }
 0x2a4   : > { %s842_s12 = sadd.s32 5, %s4182_s1  ;;  %s4829_s23 = smov (!%p2020_p4, %s4827_s23), 63 }
 0x2a5   : > { %s4294_s22 = sld [smem:[#allocation5 + %s842_s12]]  ;;  %s2025_s26 = sshll.u32 %s4829_s23, 4 }
 0x2a6   : > { %s1735_s4 = scalar_lea.vmem %s4185_s24, 5 [#allocation2]  ;;  %s807_s18 = scalar_lea.hbm %s4681_s8, %s2025_s26 }
 0x2a7   : > { %s3027_s14 = scalar_lea.hbm %s807_s18, 16  ;;  %p3030_p3 = scmp.lt.u32.totalorder %s807_s18, %s4681_s8 }
 0x2a8   : > { %p823_p0 = scmp.gt.s32.totalorder %s4287_s10, 0  ;;  %p3028_p13 = scmp.ne.s32.totalorder %s807_s18, %s3027_s14 }
 0x2a9   : > { %p3031_p5 = scmp.lt.u32.totalorder %s4220_s29, %s3027_s14  ;;  %p3033_p1 = scmp.lt.u32.totalorder %s3027_s14, %s807_s18 }
 0x2ab   : > { %p3032_p9 = por %p3031_p5, %p3030_p3 }
 0x2ad   : > { %p3034_p8 = por %p3033_p1, %p3032_p9 }
 0x2af   : > { %p3035_p10 = pnand %p3034_p8, %p3028_p13 }
 0x2b1   : > { %3038 = shalt.err (!%p3035_p10)  }
 0x2b2   : > { %s3039_s23 = scalar_lea.vmem %s4272_s21, 16  ;;  %p3044_p7 = scmp.lt.s32.totalorder %s4272_s21, %s4228_s30 }
 0x2b3   : > { %p3040_p2 = scmp.ne.s32.totalorder %s4272_s21, %s3039_s23  ;;  %p3045_p6 = scmp.lt.s32.totalorder %s4231_s20, %s3039_s23 }
 0x2b5   : > { %p3046_p12 = por %p3045_p6, %p3044_p7 }
 0x2b7   : > { %p3047_p4 = pnand %p3046_p12, %p3040_p2 }
 0x2b9   : > { %3050 = shalt.err (!%p3047_p4)  }
 0x2ba   : > { %820 = dma.hbm_to_vmem [thread:$0]  %s807_s18, 16, %s4272_s21, %s4215_s16 }
 0x2bb   : > { %s824_s9 = scalar_select %p823_p0, %s4287_s10, 0 }
 0x2bc   : > { %p2027_p13 = scmp.lt.s32.totalorder %s4287_s10, 63  ;;  %s859_s0 = sshll.u32 %s1735_s4, 4  ;;  %s4319_s0 = int_to_ptr.vmem [resolvable:$true] %s859_s0 }
 0x2bd   : > { %p844_p3 = scmp.gt.s32.totalorder %s4294_s22, 0  ;;  %p2034_p5 = scmp.lt.s32.totalorder %s4294_s22, 63 }
 0x2be   : > { %s4831_s9 = smov (!%p2027_p13, %s824_s9), 63  ;;  %s863_s13 = sadd.s32 6, %s4182_s1 }
 0x2bf   : > { %s845_s7 = scalar_select %p844_p3, %s4294_s22, 0 }
 0x2c0   : > { %s2032_s6 = sshll.u32 %s4831_s9, 4 }
 0x2c1   : > { %s828_s28 = scalar_lea.hbm %s4681_s8, %s2032_s6 }
 0x2c2   : > { %s3051_s14 = scalar_lea.hbm %s828_s28, 16  ;;  %p3054_p0 = scmp.lt.u32.totalorder %s828_s28, %s4681_s8 }
 0x2c3   : > { %p3052_p9 = scmp.ne.s32.totalorder %s828_s28, %s3051_s14  ;;  %p3055_p1 = scmp.lt.u32.totalorder %s4220_s29, %s3051_s14 }
 0x2c4   : > { %p3057_p10 = scmp.lt.u32.totalorder %s3051_s14, %s828_s28 }
 0x2c5   : > { %p3056_p8 = por %p3055_p1, %p3054_p0 }
 0x2c7   : > { %p3058_p2 = por %p3057_p10, %p3056_p8 }
 0x2c9   : > { %p3059_p7 = pnand %p3058_p2, %p3052_p9 }
 0x2cb   : > { %3062 = shalt.err (!%p3059_p7)  }
 0x2cc   : > { %s3063_s10 = scalar_lea.vmem %s4292_s2, 16  ;;  %p3068_p12 = scmp.lt.s32.totalorder %s4292_s2, %s4228_s30 }
 0x2cd   : > { %p3064_p6 = scmp.ne.s32.totalorder %s4292_s2, %s3063_s10  ;;  %p3069_p4 = scmp.lt.s32.totalorder %s4231_s20, %s3063_s10 }
 0x2cf   : > { %p3070_p13 = por %p3069_p4, %p3068_p12 }
 0x2d1   : > { %p3071_p3 = pnand %p3070_p13, %p3064_p6 }
 0x2d3   : > { %3074 = shalt.err (!%p3071_p3)  }
 0x2d4   : > { %841 = dma.hbm_to_vmem [thread:$0]  %s828_s28, 16, %s4292_s2, %s4215_s16 }
 0x2d5   : > { %s4833_s7 = smov (!%p2034_p5, %s845_s7), 63  ;;  %s4338_s4 = sld [smem:[#allocation5 + %s863_s13]] }
 0x2d6   : > { %s1740_s18 = scalar_lea.vmem %s4185_s24, 6 [#allocation2]  ;;  %s2039_s27 = sshll.u32 %s4833_s7, 4 }
 0x2d7   : > { %s880_s23 = sshll.u32 %s1740_s18, 4  ;;  %s849_s12 = scalar_lea.hbm %s4681_s8, %s2039_s27  ;;  %s4344_s23 = int_to_ptr.vmem [resolvable:$true] %s880_s23 }
 0x2d8   : > { %s3075_s26 = scalar_lea.hbm %s849_s12, 16  ;;  %p3078_p0 = scmp.lt.u32.totalorder %s849_s12, %s4681_s8 }
 0x2d9   : > { %p3076_p9 = scmp.ne.s32.totalorder %s849_s12, %s3075_s26  ;;  %p3079_p1 = scmp.lt.u32.totalorder %s4220_s29, %s3075_s26 }
 0x2da   : > { %p3081_p5 = scmp.lt.u32.totalorder %s3075_s26, %s849_s12 }
 0x2db   : > { %p3080_p8 = por %p3079_p1, %p3078_p0 }
 0x2dd   : > { %p3082_p10 = por %p3081_p5, %p3080_p8 }
 0x2df   : > { %p3083_p2 = pnand %p3082_p10, %p3076_p9 }
 0x2e1   : > { %3086 = shalt.err (!%p3083_p2)  }
 0x2e2   : > { %s3087_s2 = scalar_lea.vmem %s4319_s0, 16  ;;  %p3092_p6 = scmp.lt.s32.totalorder %s4319_s0, %s4228_s30 }
 0x2e3   : > { %p3088_p7 = scmp.ne.s32.totalorder %s4319_s0, %s3087_s2  ;;  %p3093_p12 = scmp.lt.s32.totalorder %s4231_s20, %s3087_s2 }
 0x2e5   : > { %p3094_p4 = por %p3093_p12, %p3092_p6 }
 0x2e7   : > { %p3095_p13 = pnand %p3094_p4, %p3088_p7 }
 0x2e9   : > { %3098 = shalt.err (!%p3095_p13)  }
 0x2ea   : > { %862 = dma.hbm_to_vmem [thread:$0]  %s849_s12, 16, %s4319_s0, %s4215_s16 }
 0x2eb   : > { %s884_s22 = sadd.s32 7, %s4182_s1  ;;  %s1745_s7 = scalar_lea.vmem %s4185_s24, 7 [#allocation2] }
 0x2ec   : > { %s4359_s28 = sld [smem:[#allocation5 + %s884_s22]]  ;;  %s901_s13 = sshll.u32 %s1745_s7, 4  ;;  %s4363_s13 = int_to_ptr.vmem [resolvable:$true] %s901_s13 }
 0x2ed   : > { %p865_p3 = scmp.gt.s32.totalorder %s4338_s4, 0  ;;  %p2041_p9 = scmp.lt.s32.totalorder %s4338_s4, 63 }
 0x2ee   : > { %s905_s21 = sadd.s32 8, %s4182_s1  ;;  %s1750_s18 = scalar_lea.vmem %s4185_s24, 8 [#allocation2] }
 0x2ef   : > { %s4835_s4 = smov (!%p865_p3, %s4338_s4), 0  ;;  %s4367_s10 = sld [smem:[#allocation5 + %s905_s21]] }
 0x2f0   : > { %s4837_s4 = smov (!%p2041_p9, %s4835_s4), 63  ;;  %s922_s27 = sshll.u32 %s1750_s18, 4  ;;  %s4375_s27 = int_to_ptr.vmem [resolvable:$true] %s922_s27 }
 0x2f1   : > { %s2046_s0 = sshll.u32 %s4837_s4, 4 }
 0x2f2   : > { %p886_p0 = scmp.gt.s32.totalorder %s4359_s28, 0  ;;  %s870_s12 = scalar_lea.hbm %s4681_s8, %s2046_s0 }
 0x2f3   : > { %s3099_s26 = scalar_lea.hbm %s870_s12, 16  ;;  %p3102_p5 = scmp.lt.u32.totalorder %s870_s12, %s4681_s8 }
 0x2f4   : > { %p3100_p8 = scmp.ne.s32.totalorder %s870_s12, %s3099_s26  ;;  %p3103_p10 = scmp.lt.u32.totalorder %s4220_s29, %s3099_s26 }
 0x2f5   : > { %p3105_p7 = scmp.lt.u32.totalorder %s3099_s26, %s870_s12 }
 0x2f6   : > { %p3104_p2 = por %p3103_p10, %p3102_p5 }
 0x2f8   : > { %p3106_p6 = por %p3105_p7, %p3104_p2 }
 0x2fa   : > { %p3107_p12 = pnand %p3106_p6, %p3100_p8 }
 0x2fc   : > { %3110 = shalt.err (!%p3107_p12)  }
 0x2fd   : > { %s3111_s4 = scalar_lea.vmem %s4344_s23, 16  ;;  %p3116_p13 = scmp.lt.s32.totalorder %s4344_s23, %s4228_s30 }
 0x2fe   : > { %p3112_p4 = scmp.ne.s32.totalorder %s4344_s23, %s3111_s4  ;;  %p3117_p3 = scmp.lt.s32.totalorder %s4231_s20, %s3111_s4 }
 0x300   : > { %p3118_p9 = por %p3117_p3, %p3116_p13 }
 0x302   : > { %p3119_p1 = pnand %p3118_p9, %p3112_p4 }
 0x304   : > { %3122 = shalt.err (!%p3119_p1)  }
 0x305   : > { %883 = dma.hbm_to_vmem [thread:$0]  %s870_s12, 16, %s4344_s23, %s4215_s16 }
 0x306   : > { %s887_s2 = scalar_select %p886_p0, %s4359_s28, 0 }
 0x307   : > { %p907_p8 = scmp.gt.s32.totalorder %s4367_s10, 0  ;;  %p2055_p5 = scmp.lt.s32.totalorder %s4367_s10, 63 }
 0x308   : > { %p4745_p10 = scmp.lt.s32.totalorder %s4359_s28, 63  ;;  %s926_s21 = sadd.s32 9, %s4182_s1 }
 0x309   : > { %s908_s22 = scalar_select %p907_p8, %s4367_s10, 0 }
 0x30a   : > { %s4839_s2 = smov (!%p4745_p10, %s887_s2), 63  ;;  %s4400_s6 = sld [smem:[#allocation5 + %s926_s21]] }
 0x30b   : > { %s2053_s7 = sshll.u32 %s4839_s2, 4 }
 0x30c   : > { %s891_s9 = scalar_lea.hbm %s4681_s8, %s2053_s7 }
 0x30d   : > { %s3123_s26 = scalar_lea.hbm %s891_s9, 16  ;;  %p3126_p2 = scmp.lt.u32.totalorder %s891_s9, %s4681_s8 }
 0x30e   : > { %p3124_p1 = scmp.ne.s32.totalorder %s891_s9, %s3123_s26  ;;  %p3127_p0 = scmp.lt.u32.totalorder %s4220_s29, %s3123_s26 }
 0x30f   : > { %p3129_p6 = scmp.lt.u32.totalorder %s3123_s26, %s891_s9 }
 0x310   : > { %p3128_p7 = por %p3127_p0, %p3126_p2 }
 0x312   : > { %p3130_p12 = por %p3129_p6, %p3128_p7 }
 0x314   : > { %p3131_p4 = pnand %p3130_p12, %p3124_p1 }
 0x316   : > { %3134 = shalt.err (!%p3131_p4)  }
 0x317   : > { %s3135_s23 = scalar_lea.vmem %s4363_s13, 16  ;;  %p3140_p3 = scmp.lt.s32.totalorder %s4363_s13, %s4228_s30 }
 0x318   : > { %p3136_p13 = scmp.ne.s32.totalorder %s4363_s13, %s3135_s23  ;;  %p3141_p9 = scmp.lt.s32.totalorder %s4231_s20, %s3135_s23 }
 0x31a   : > { %p3142_p8 = por %p3141_p9, %p3140_p3 }
 0x31c   : > { %p3143_p10 = pnand %p3142_p8, %p3136_p13 }
 0x31e   : > { %3146 = shalt.err (!%p3143_p10)  }
 0x31f   : > { %904 = dma.hbm_to_vmem [thread:$0]  %s891_s9, 16, %s4363_s13, %s4215_s16 }
 0x320   : > { %s4841_s22 = smov (!%p2055_p5, %s908_s22), 63  ;;  %s1755_s28 = scalar_lea.vmem %s4185_s24, 9 [#allocation2] }
 0x321   : > { %s947_s12 = sadd.s32 10, %s4182_s1  ;;  %s2060_s4 = sshll.u32 %s4841_s22, 4 }
 0x322   : > { %s943_s2 = sshll.u32 %s1755_s28, 4  ;;  %s912_s18 = scalar_lea.hbm %s4681_s8, %s2060_s4  ;;  %s4420_s2 = int_to_ptr.vmem [resolvable:$true] %s943_s2 }
 0x323   : > { %s3147_s0 = scalar_lea.hbm %s912_s18, 16  ;;  %p3150_p2 = scmp.lt.u32.totalorder %s912_s18, %s4681_s8 }
 0x324   : > { %p3148_p1 = scmp.ne.s32.totalorder %s912_s18, %s3147_s0  ;;  %p3151_p0 = scmp.lt.u32.totalorder %s4220_s29, %s3147_s0 }
 0x325   : > { %p3153_p6 = scmp.lt.u32.totalorder %s3147_s0, %s912_s18 }
 0x326   : > { %p3152_p7 = por %p3151_p0, %p3150_p2 }
 0x328   : > { %p3154_p5 = por %p3153_p6, %p3152_p7 }
 0x32a   : > { %p3155_p12 = pnand %p3154_p5, %p3148_p1 }
 0x32c   : > { %3158 = shalt.err (!%p3155_p12)  }
 0x32d   : > { %s3159_s13 = scalar_lea.vmem %s4375_s27, 16  ;;  %p3164_p13 = scmp.lt.s32.totalorder %s4375_s27, %s4228_s30 }
 0x32e   : > { %p3160_p4 = scmp.ne.s32.totalorder %s4375_s27, %s3159_s13  ;;  %p3165_p3 = scmp.lt.s32.totalorder %s4231_s20, %s3159_s13 }
 0x330   : > { %p3166_p9 = por %p3165_p3, %p3164_p13 }
 0x332   : > { %p3167_p8 = pnand %p3166_p9, %p3160_p4 }
 0x334   : > { %3170 = shalt.err (!%p3167_p8)  }
 0x335   : > { %925 = dma.hbm_to_vmem [thread:$0]  %s912_s18, 16, %s4375_s27, %s4215_s16 }
 0x336   : > { %p928_p10 = scmp.gt.s32.totalorder %s4400_s6, 0  ;;  %p2062_p1 = scmp.lt.s32.totalorder %s4400_s6, 63 }
 0x337   : > { %s4435_s10 = sld [smem:[#allocation5 + %s947_s12]]  ;;  %s1760_s22 = scalar_lea.vmem %s4185_s24, 10 [#allocation2] }
 0x338   : > { %s4843_s6 = smov (!%p928_p10, %s4400_s6), 0  ;;  %s964_s9 = sshll.u32 %s1760_s22, 4  ;;  %s4440_s9 = int_to_ptr.vmem [resolvable:$true] %s964_s9 }
 0x339   : > { %s968_s3 = sadd.s32 11, %s4182_s1  ;;  %s4845_s6 = smov (!%p2062_p1, %s4843_s6), 63 }
 0x33a   : > { %s4442_s23 = sld [smem:[#allocation5 + %s968_s3]]  ;;  %s2067_s28 = sshll.u32 %s4845_s6, 4 }
 0x33b   : > { %s1765_s4 = scalar_lea.vmem %s4185_s24, 11 [#allocation2]  ;;  %s933_s27 = scalar_lea.hbm %s4681_s8, %s2067_s28 }
 0x33c   : > { %s3171_s18 = scalar_lea.hbm %s933_s27, 16  ;;  %p3174_p7 = scmp.lt.u32.totalorder %s933_s27, %s4681_s8 }
 0x33d   : > { %p949_p2 = scmp.gt.s32.totalorder %s4435_s10, 0  ;;  %p3172_p0 = scmp.ne.s32.totalorder %s933_s27, %s3171_s18 }
 0x33e   : > { %p3175_p6 = scmp.lt.u32.totalorder %s4220_s29, %s3171_s18  ;;  %p3177_p12 = scmp.lt.u32.totalorder %s3171_s18, %s933_s27 }
 0x340   : > { %p3176_p5 = por %p3175_p6, %p3174_p7 }
 0x342   : > { %p3178_p4 = por %p3177_p12, %p3176_p5 }
 0x344   : > { %p3179_p13 = pnand %p3178_p4, %p3172_p0 }
 0x346   : > { %3182 = shalt.err (!%p3179_p13)  }
 0x347   : > { %s3183_s6 = scalar_lea.vmem %s4420_s2, 16  ;;  %p3188_p9 = scmp.lt.s32.totalorder %s4420_s2, %s4228_s30 }
 0x348   : > { %p3184_p3 = scmp.ne.s32.totalorder %s4420_s2, %s3183_s6  ;;  %p3189_p8 = scmp.lt.s32.totalorder %s4231_s20, %s3183_s6 }
 0x34a   : > { %p3190_p10 = por %p3189_p8, %p3188_p9 }
 0x34c   : > { %p3191_p1 = pnand %p3190_p10, %p3184_p3 }
 0x34e   : > { %3194 = shalt.err (!%p3191_p1)  }
 0x34f   : > { %946 = dma.hbm_to_vmem [thread:$0]  %s933_s27, 16, %s4420_s2, %s4215_s16 }
 0x350   : > { %s950_s26 = scalar_select %p949_p2, %s4435_s10, 0 }
 0x351   : > { %p2069_p0 = scmp.lt.s32.totalorder %s4435_s10, 63  ;;  %s985_s14 = sshll.u32 %s1765_s4, 4  ;;  %s4467_s14 = int_to_ptr.vmem [resolvable:$true] %s985_s14 }
 0x352   : > { %p970_p7 = scmp.gt.s32.totalorder %s4442_s23, 0  ;;  %p2076_p6 = scmp.lt.s32.totalorder %s4442_s23, 63 }
 0x353   : > { %s4847_s26 = smov (!%p2069_p0, %s950_s26), 63  ;;  %s989_s21 = sadd.s32 12, %s4182_s1 }
 0x354   : > { %s971_s13 = scalar_select %p970_p7, %s4442_s23, 0 }
 0x355   : > { %s2074_s22 = sshll.u32 %s4847_s26, 4 }
 0x356   : > { %s954_s7 = scalar_lea.hbm %s4681_s8, %s2074_s22 }
 0x357   : > { %s3195_s18 = scalar_lea.hbm %s954_s7, 16  ;;  %p3198_p2 = scmp.lt.u32.totalorder %s954_s7, %s4681_s8 }
 0x358   : > { %p3196_p5 = scmp.ne.s32.totalorder %s954_s7, %s3195_s18  ;;  %p3199_p12 = scmp.lt.u32.totalorder %s4220_s29, %s3195_s18 }
 0x359   : > { %p3201_p13 = scmp.lt.u32.totalorder %s3195_s18, %s954_s7 }
 0x35a   : > { %p3200_p4 = por %p3199_p12, %p3198_p2 }
 0x35c   : > { %p3202_p3 = por %p3201_p13, %p3200_p4 }
 0x35e   : > { %p3203_p9 = pnand %p3202_p3, %p3196_p5 }
 0x360   : > { %3206 = shalt.err (!%p3203_p9)  }
 0x361   : > { %s3207_s10 = scalar_lea.vmem %s4440_s9, 16  ;;  %p3212_p10 = scmp.lt.s32.totalorder %s4440_s9, %s4228_s30 }
 0x362   : > { %p3208_p8 = scmp.ne.s32.totalorder %s4440_s9, %s3207_s10  ;;  %p3213_p1 = scmp.lt.s32.totalorder %s4231_s20, %s3207_s10 }
 0x364   : > { %p3214_p0 = por %p3213_p1, %p3212_p10 }
 0x366   : > { %p3215_p7 = pnand %p3214_p0, %p3208_p8 }
 0x368   : > { %3218 = shalt.err (!%p3215_p7)  }
 0x369   : > { %967 = dma.hbm_to_vmem [thread:$0]  %s954_s7, 16, %s4440_s9, %s4215_s16 }
 0x36a   : > { %s4849_s13 = smov (!%p2076_p6, %s971_s13), 63  ;;  %s4486_s4 = sld [smem:[#allocation5 + %s989_s21]] }
 0x36b   : > { %s1770_s27 = scalar_lea.vmem %s4185_s24, 12 [#allocation2]  ;;  %s2081_s0 = sshll.u32 %s4849_s13, 4 }
 0x36c   : > { %s975_s22 = scalar_lea.hbm %s4681_s8, %s2081_s0  ;;  %s1006_s3 = sshll.u32 %s1770_s27, 4  ;;  %s4505_s3 = int_to_ptr.vmem [resolvable:$true] %s1006_s3 }
 0x36d   : > { %s3219_s28 = scalar_lea.hbm %s975_s22, 16  ;;  %p3222_p2 = scmp.lt.u32.totalorder %s975_s22, %s4681_s8 }
 0x36e   : > { %p3220_p5 = scmp.ne.s32.totalorder %s975_s22, %s3219_s28  ;;  %p3223_p12 = scmp.lt.u32.totalorder %s4220_s29, %s3219_s28 }
 0x36f   : > { %p3225_p13 = scmp.lt.u32.totalorder %s3219_s28, %s975_s22 }
 0x370   : > { %p3224_p4 = por %p3223_p12, %p3222_p2 }
 0x372   : > { %p3226_p3 = por %p3225_p13, %p3224_p4 }
 0x374   : > { %p3227_p6 = pnand %p3226_p3, %p3220_p5 }
 0x376   : > { %3230 = shalt.err (!%p3227_p6)  }
 0x377   : > { %s3231_s9 = scalar_lea.vmem %s4467_s14, 16  ;;  %p3236_p8 = scmp.lt.s32.totalorder %s4467_s14, %s4228_s30 }
 0x378   : > { %p3232_p9 = scmp.ne.s32.totalorder %s4467_s14, %s3231_s9  ;;  %p3237_p10 = scmp.lt.s32.totalorder %s4231_s20, %s3231_s9 }
 0x37a   : > { %p3238_p1 = por %p3237_p10, %p3236_p8 }
 0x37c   : > { %p3239_p0 = pnand %p3238_p1, %p3232_p9 }
 0x37e   : > { %3242 = shalt.err (!%p3239_p0)  }
 0x37f   : > { %988 = dma.hbm_to_vmem [thread:$0]  %s975_s22, 16, %s4467_s14, %s4215_s16 }
 0x380   : > { %s1010_s23 = sadd.s32 13, %s4182_s1  ;;  %s1775_s13 = scalar_lea.vmem %s4185_s24, 13 [#allocation2] }
 0x381   : > { %s4507_s7 = sld [smem:[#allocation5 + %s1010_s23]]  ;;  %p991_p7 = scmp.gt.s32.totalorder %s4486_s4, 0 }
 0x382   : > { %p2083_p5 = scmp.lt.s32.totalorder %s4486_s4, 63  ;;  %s1027_s21 = sshll.u32 %s1775_s13, 4  ;;  %s4517_s21 = int_to_ptr.vmem [resolvable:$true] %s1027_s21 }
 0x383   : > { %s1031_s2 = sadd.s32 14, %s4182_s1  ;;  %s4851_s4 = smov (!%p991_p7, %s4486_s4), 0 }
 0x384   : > { %s4513_s10 = sld [smem:[#allocation5 + %s1031_s2]]  ;;  %s1780_s27 = scalar_lea.vmem %s4185_s24, 14 [#allocation2] }
 0x385   : > { %s4853_s4 = smov (!%p2083_p5, %s4851_s4), 63  ;;  %s4523_s22 = sshll.u32 %s1780_s27, 4  ;;  %s1049_s22 = int_to_ptr.vmem [resolvable:$true] %s4523_s22 }
 0x386   : > { %s2088_s14 = sshll.u32 %s4853_s4, 4 }
 0x387   : > { %p1012_p2 = scmp.gt.s32.totalorder %s4507_s7, 0  ;;  %s996_s26 = scalar_lea.hbm %s4681_s8, %s2088_s14 }
 0x388   : > { %s3243_s28 = scalar_lea.hbm %s996_s26, 16  ;;  %p3246_p13 = scmp.lt.u32.totalorder %s996_s26, %s4681_s8 }
 0x389   : > { %p3244_p4 = scmp.ne.s32.totalorder %s996_s26, %s3243_s28  ;;  %p3247_p3 = scmp.lt.u32.totalorder %s4220_s29, %s3243_s28 }
 0x38a   : > { %p3249_p9 = scmp.lt.u32.totalorder %s3243_s28, %s996_s26 }
 0x38b   : > { %p3248_p6 = por %p3247_p3, %p3246_p13 }
 0x38d   : > { %p3250_p8 = por %p3249_p9, %p3248_p6 }
 0x38f   : > { %p3251_p10 = pnand %p3250_p8, %p3244_p4 }
 0x391   : > { %3254 = shalt.err (!%p3251_p10)  }
 0x392   : > { %s3255_s4 = scalar_lea.vmem %s4505_s3, 16  ;;  %p3260_p0 = scmp.lt.s32.totalorder %s4505_s3, %s4228_s30 }
 0x393   : > { %p3256_p1 = scmp.ne.s32.totalorder %s4505_s3, %s3255_s4  ;;  %p3261_p7 = scmp.lt.s32.totalorder %s4231_s20, %s3255_s4 }
 0x395   : > { %p3262_p5 = por %p3261_p7, %p3260_p0 }
 0x397   : > { %p3263_p12 = pnand %p3262_p5, %p3256_p1 }
 0x399   : > { %3266 = shalt.err (!%p3263_p12)  }
 0x39a   : > { %1009 = dma.hbm_to_vmem [thread:$0]  %s996_s26, 16, %s4505_s3, %s4215_s16 }
 0x39b   : > { %s1013_s9 = scalar_select %p1012_p2, %s4507_s7, 0 }
 0x39c   : > { %p1033_p4 = scmp.gt.s32.totalorder %s4513_s10, 0  ;;  %p2097_p13 = scmp.lt.s32.totalorder %s4513_s10, 63 }
 0x39d   : > { %p4746_p3 = scmp.lt.s32.totalorder %s4507_s7, 63  ;;  %s1052_s2 = sadd.s32 15, %s4182_s1 }
 0x39e   : > { %s1034_s23 = scalar_select %p1033_p4, %s4513_s10, 0 }
 0x39f   : > { %s4855_s9 = smov (!%p4746_p3, %s1013_s9), 63  ;;  %s4548_s6 = sld [smem:[#allocation5 + %s1052_s2]] }
 0x3a0   : > { %s2095_s13 = sshll.u32 %s4855_s9, 4 }
 0x3a1   : > { %s1017_s0 = scalar_lea.hbm %s4681_s8, %s2095_s13 }
 0x3a2   : > { %s3267_s28 = scalar_lea.hbm %s1017_s0, 16  ;;  %p3270_p6 = scmp.lt.u32.totalorder %s1017_s0, %s4681_s8 }
 0x3a3   : > { %p3268_p12 = scmp.ne.s32.totalorder %s1017_s0, %s3267_s28  ;;  %p3271_p2 = scmp.lt.u32.totalorder %s4220_s29, %s3267_s28 }
 0x3a4   : > { %p3273_p8 = scmp.lt.u32.totalorder %s3267_s28, %s1017_s0 }
 0x3a5   : > { %p3272_p9 = por %p3271_p2, %p3270_p6 }
 0x3a7   : > { %p3274_p10 = por %p3273_p8, %p3272_p9 }
 0x3a9   : > { %p3275_p1 = pnand %p3274_p10, %p3268_p12 }
 0x3ab   : > { %3278 = shalt.err (!%p3275_p1)  }
 0x3ac   : > { %s3279_s1 = scalar_lea.vmem %s4517_s21, 16  ;;  %p3284_p7 = scmp.lt.s32.totalorder %s4517_s21, %s4228_s30 }
 0x3ad   : > { %p3280_p0 = scmp.ne.s32.totalorder %s4517_s21, %s3279_s1  ;;  %p3285_p5 = scmp.lt.s32.totalorder %s4231_s20, %s3279_s1 }
 0x3af   : > { %p3286_p4 = por %p3285_p5, %p3284_p7 }
 0x3b1   : > { %p3287_p3 = pnand %p3286_p4, %p3280_p0 }
 0x3b3   : > { %3290 = shalt.err (!%p3287_p3)  }
 0x3b4   : > { %1030 = dma.hbm_to_vmem [thread:$0]  %s1017_s0, 16, %s4517_s21, %s4215_s16 }
 0x3b5   : > { %s4857_s23 = smov (!%p2097_p13, %s1034_s23), 63  ;;  %s1785_s9 = scalar_lea.vmem %s4185_s24, 15 [#allocation2] }
 0x3b6   : > { %s2102_s3 = sshll.u32 %s4857_s23, 4 }
 0x3b7   : > { %s1038_s4 = scalar_lea.hbm %s4681_s8, %s2102_s3 }
 0x3b8   : > { %s3291_s13 = scalar_lea.hbm %s1038_s4, 16  ;;  %p3294_p6 = scmp.lt.u32.totalorder %s1038_s4, %s4681_s8 }
 0x3b9   : > { %p3292_p12 = scmp.ne.s32.totalorder %s1038_s4, %s3291_s13  ;;  %p3295_p2 = scmp.lt.u32.totalorder %s4220_s29, %s3291_s13 }
 0x3ba   : > { %p3297_p8 = scmp.lt.u32.totalorder %s3291_s13, %s1038_s4 }
 0x3bb   : > { %p3296_p9 = por %p3295_p2, %p3294_p6 }
 0x3bd   : > { %p3298_p10 = por %p3297_p8, %p3296_p9 }
 0x3bf   : > { %p3299_p1 = pnand %p3298_p10, %p3292_p12 }
 0x3c1   : > { %3302 = shalt.err (!%p3299_p1)  }
 0x3c2   : > { %s3303_s21 = scalar_lea.vmem %s1049_s22, 16  ;;  %p3308_p0 = scmp.lt.s32.totalorder %s1049_s22, %s4228_s30 }
 0x3c3   : > { %p3304_p13 = scmp.ne.s32.totalorder %s1049_s22, %s3303_s21  ;;  %p3309_p7 = scmp.lt.s32.totalorder %s4231_s20, %s3303_s21 }
 0x3c5   : > { %p3310_p5 = por %p3309_p7, %p3308_p0 }
 0x3c7   : > { %p3311_p4 = pnand %p3310_p5, %p3304_p13 }
 0x3c9   : > { %3314 = shalt.err (!%p3311_p4)  }
 0x3ca   : > { %1051 = dma.hbm_to_vmem [thread:$0]  %s1038_s4, 16, %s1049_s22, %s4215_s16 }
 0x3cb   : > { %p1054_p3 = scmp.gt.s32.totalorder %s4548_s6, 0  ;;  %p2104_p6 = scmp.lt.s32.totalorder %s4548_s6, 63 }
 0x3cc   : > { %s1069_s24 = sshll.u32 %s1785_s9, 4  ;;  %s1070_s24 = int_to_ptr.vmem [resolvable:$true] %s1069_s24 }
 0x3cd   : > { %s4859_s6 = smov (!%p1054_p3, %s4548_s6), 0 }
 0x3ce   : > { %s4861_s6 = smov (!%p2104_p6, %s4859_s6), 63 }
 0x3cf   : > { %s2109_s10 = sshll.u32 %s4861_s6, 4 }
 0x3d0   : > { %s1059_s0 = scalar_lea.hbm %s4681_s8, %s2109_s10 }
 0x3d1   : > { %s3315_s28 = scalar_lea.hbm %s1059_s0, 16  ;;  %p3318_p2 = scmp.lt.u32.totalorder %s1059_s0, %s4681_s8 }
 0x3d2   : > { %p3316_p12 = scmp.ne.s32.totalorder %s1059_s0, %s3315_s28  ;;  %p3319_p9 = scmp.lt.u32.totalorder %s4220_s29, %s3315_s28 }
 0x3d3   : > { %p3321_p10 = scmp.lt.u32.totalorder %s3315_s28, %s1059_s0 }
 0x3d4   : > { %p3320_p8 = por %p3319_p9, %p3318_p2 }
 0x3d6   : > { %p3322_p1 = por %p3321_p10, %p3320_p8 }
 0x3d8   : > { %p3323_p13 = pnand %p3322_p1, %p3316_p12 }
 0x3da   : > { %3326 = shalt.err (!%p3323_p13)  }
 0x3db   : > { %s3327_s22 = scalar_lea.vmem %s1070_s24, 16  ;;  %p3332_p7 = scmp.lt.s32.totalorder %s1070_s24, %s4228_s30 }
 0x3dc   : > { %p3328_p0 = scmp.ne.s32.totalorder %s1070_s24, %s3327_s22  ;;  %p3333_p5 = scmp.lt.s32.totalorder %s4231_s20, %s3327_s22 }
 0x3de   : > { %p3334_p4 = por %p3333_p5, %p3332_p7 }
 0x3e0   : > { %p3335_p3 = pnand %p3334_p4, %p3328_p0 }
 0x3e2   : > { %3338 = shalt.err (!%p3335_p3)  }
 0x3e3   : > { %1072 = dma.hbm_to_vmem [thread:$0]  %s1059_s0, 16, %s1070_s24, %s4215_s16 }
 0x3e4 PF: > { %v2395_v0 = vld [vmem:[#allocation9] sm:$0xff]   ;;  %v3462_v1 = vmov 0.0   ;;  %v2396_v2 = vld [vmem:[#allocation9 + $0x8] sm:$0xff]   ;;  %vm3463_vm0 = vmmov 0   ;;  %v2397_v3 = vld [vmem:[#allocation9 + $0x10] sm:$0xff]   ;;  %s2120_s16 = sshll.u32 %s4773_s17, 4 }
 0x3e5   : > { %2258 = vmatprep.subr.bf16.mxu0 %v3462_v1  ;;  %2274 = vmatprep.mubr.msk.bf16.mxu0 %vm3463_vm0, %v3462_v1  ;;  %v2398_v4 = vld [vmem:[#allocation9 + $0x18] sm:$0xff]   ;;  %v2399_v5 = vld [vmem:[#allocation9 + $0x20] sm:$0xff]   ;;  %v2400_v6 = vld [vmem:[#allocation9 + $0x28] sm:$0xff]   ;;  %s4747_s20 = sld [smem:[#allocation98_spill]]  ;;  %s1192_s6 = scalar_lea.sflag [#allocation3], %s4773_s17 }
 0x3e6   : > { %2259 = vmatpush3.bf16.msra.mxu0 %v2395_v0  ;;  %v2401_v7 = vld [vmem:[#allocation9 + $0x30] sm:$0xff]   ;;  %v2402_v8 = vld [vmem:[#allocation9 + $0x38] sm:$0xff]  }
 0x3e7   : > { %2260 = vmatprep.subr.bf16.mxu0 %v3462_v1  ;;  %v1073_v9 = vld [vmem:[%s3763_s5] sm:$0xff]  ;;  %v1074_v10 = vld [vmem:[%s3763_s5 + $0x8] sm:$0xff]  ;;  %s4598_s5 = scalar_lea.vmem [#allocation2], %s2120_s16 }
 0x3e8   : > { %v1075_v11 = vpack.c.bf16 %v1074_v10, %v1073_v9 }
 0x3ea   : > { %2261 = vmatpush3.bf16.msra.mxu0 %v2396_v2 }
 0x3eb   : > { %2262 = vmatprep.subr.bf16.mxu0 %v3462_v1  ;;  %v2111_v12 = vld [vmem:[%s4747_s20] ss:$0 sm:$0xff] }
 0x3ee   : > { %2263 = vmatpush3.bf16.msra.mxu0 %v2397_v3 }
 0x3ef   : > { %2264 = vmatprep.subr.bf16.mxu0 %v3462_v1 }
 0x3f2   : > { %2265 = vmatpush3.bf16.msra.mxu0 %v2398_v4 }
 0x3f3   : > { %2266 = vmatprep.subr.bf16.mxu0 %v3462_v1 }
 0x3f6   : > { %2267 = vmatpush3.bf16.msra.mxu0 %v2399_v5 }
 0x3f7   : > { %2268 = vmatprep.subr.bf16.mxu0 %v3462_v1 }
 0x3fa   : > { %2269 = vmatpush3.bf16.msra.mxu0 %v2400_v6 }
 0x3fb   : > { %2270 = vmatprep.subr.bf16.mxu0 %v3462_v1 }
 0x3fe   : > { %2271 = vmatpush3.bf16.msra.mxu0 %v2401_v7 }
 0x3ff   : > { %2272 = vmatprep.subr.bf16.mxu0 %v3462_v1 }
 0x402   : > { %2273 = vmatpush3.bf16.msra.mxu0 %v2402_v8 }
 0x405   : > { %2275 = vmatmul.mubr.bf16.vlgmr.msra.gmra.mrb[0].mxu0 %v1075_v11 }
 0x4d8   : > { %v1181_v13 = vpop.f32.mrb[0].mxu0 }
 0x4d9   : > { %v1182_v14 = vadd.f32 %v2111_v12, %v1181_v13  ;;  %v2276_v15 = vpop.f32.mrb[1].mxu0 }
 0x4da   : > { %v1184_v16 = vpop.f32.mrb[2].mxu0 }
 0x4db   : > { %2403 = vtanh.f32 %v1182_v14  ;;  %v1185_v17 = vadd.f32 %v2111_v12, %v1184_v16  ;;  %v2277_v18 = vpop.f32.mrb[3].mxu0 }
 0x4dd   : > { %2405 = vtanh.f32 %v1185_v17 }
 0x4e5   : > { %v4594_v19 = vpop.eup %2403 }
 0x4e7   : > { %v4596_v20 = vpop.eup %2405 }
 0x4e8   : > { %3413 = dma.done.wait %s1192_s6, 256 }
 0x4e9   : > { %3414 = vsyncadd %s1192_s6, 4294967040  ;;  %v3464_v21 = vmov 0   ;;  %v2407_v22 = vld [vmem:[#allocation11 + $0x4] ss:$8 sps:$4 sm:$0xff]   ;;  %v2409_v23 = vld [vmem:[#allocation11] ss:$8 sps:$4 sm:$0xff]   ;;  %v1219_v59 = vlaneseq }
 0x4ea   : > { %1341 = vmatprep.mubr.bf16.mxu1 %v3464_v21  ;;  %1309 = vmatprep.subr.bf16.mxu1 %v2407_v22  ;;  %v2410_v24 = vld [vmem:[#allocation11 + $0x14] ss:$8 sps:$4 sm:$0xff]   ;;  %v2412_v25 = vld [vmem:[#allocation11 + $0x10] ss:$8 sps:$4 sm:$0xff]   ;;  %v2413_v26 = vld [vmem:[#allocation11 + $0x24] ss:$8 sps:$4 sm:$0xff]  }
 0x4eb   : > { %1310 = vmatpush1.bf16.msra.mxu1 %v2409_v23  ;;  %v2415_v27 = vld [vmem:[#allocation11 + $0x20] ss:$8 sps:$4 sm:$0xff]   ;;  %v2416_v28 = vld [vmem:[#allocation11 + $0x34] ss:$8 sps:$4 sm:$0xff]   ;;  %v2418_v29 = vld [vmem:[#allocation11 + $0x30] ss:$8 sps:$4 sm:$0xff]  }
 0x4ec   : > { %1311 = vmatprep.subr.bf16.mxu1 %v2410_v24  ;;  %v2419_v30 = vld [vmem:[#allocation11 + $0x44] ss:$8 sps:$4 sm:$0xff]   ;;  %v2421_v32 = vld [vmem:[#allocation11 + $0x40] ss:$8 sps:$4 sm:$0xff]   ;;  %v2422_v34 = vld [vmem:[#allocation11 + $0x54] ss:$8 sps:$4 sm:$0xff]  }
 0x4ed   : > { %v2431_v31 = vld [vmem:[#allocation12 + $0x40] sm:$0xff]   ;;  %v2433_v35 = vld [vmem:[#allocation12 + $0x48] sm:$0xff]   ;;  %v2435_v37 = vld [vmem:[#allocation12 + $0x50] sm:$0xff]   ;;  %v1220_v60 = vshrl.u32 %v1219_v59, 7  ;;  %s4748_s3 = sld [smem:[#allocation100_spill]]  ;;  %s4749_s4 = sld [smem:[#allocation102_spill]] }
 0x4ee   : > { %v2432_v33 = vld [vmem:[#allocation12] sm:$0xff]   ;;  %2236 = vmatprep.subr.bf16.mxu0 %v2431_v31  ;;  %v2434_v36 = vld [vmem:[#allocation12 + $0x8] sm:$0xff]   ;;  %v2424_v38 = vld [vmem:[#allocation11 + $0x50] ss:$8 sps:$4 sm:$0xff]   ;;  %s2155_s9 = sshll.u32 %s3779_s11, 4  ;;  %s4750_s13 = scalar_lea.vmem [#allocation14], %s3759_s19 }
 0x4ef   : > { %1312 = vmatpush1.bf16.msra.mxu1 %v2412_v25  ;;  %2237 = vmatpush3.bf16.msra.mxu0 %v2432_v33  ;;  %v2425_v39 = vld [vmem:[#allocation11 + $0x64] ss:$8 sps:$4 sm:$0xff]   ;;  %v2436_v40 = vld [vmem:[#allocation12 + $0x10] sm:$0xff]   ;;  %v2437_v41 = vld [vmem:[#allocation12 + $0x58] sm:$0xff]   ;;  %v1221_v61 = vsub.s32 0, %v1220_v60  ;;  %v1225_v63 = vsub.s32 1, %v1220_v60  ;;  %s4753_s14 = smov %s4750_s13 }
 0x4f0   : > { %1313 = vmatprep.subr.bf16.mxu1 %v2413_v26  ;;  %2238 = vmatprep.subr.bf16.mxu0 %v2433_v35  ;;  %v2427_v42 = vld [vmem:[#allocation11 + $0x60] ss:$8 sps:$4 sm:$0xff]   ;;  %v1196_v43 = vld [vmem:[%s4598_s5] sm:$0xff]  ;;  %v2443_v55 = vld [vmem:[#allocation12 + $0x70] sm:$0xff]   ;;  %s1573_s2 = sshll.u32 %s4750_s13, 4  ;;  %vm1553_vm1 = vcmask 130112   ;;  %s4619_s2 = int_to_ptr.vmem [resolvable:$true] %s1573_s2 }
 0x4f1   : > { %v1197_v44 = vld [vmem:[%s4598_s5 + $0x8] sm:$0xff]  ;;  %v2428_v45 = vld [vmem:[#allocation11 + $0x74] ss:$8 sps:$4 sm:$0xff]   ;;  %v1198_v48 = vmax.f32 %v1196_v43, 0.0  ;;  %v2430_v50 = vld [vmem:[#allocation11 + $0x70] ss:$8 sps:$4 sm:$0xff]  }
 0x4f2   : > { %v2438_v46 = vld [vmem:[#allocation12 + $0x18] sm:$0xff]   ;;  %v2439_v47 = vld [vmem:[#allocation12 + $0x60] sm:$0xff]   ;;  %v1199_v49 = vmax.f32 %v1197_v44, 0.0  ;;  %v2441_v52 = vld [vmem:[#allocation12 + $0x68] sm:$0xff]   ;;  %vm1556_vm2 = vcmask 122880   ;;  %s4751_s24 = sld [smem:[#allocation103_spill]] }
 0x4f3   : > { %1314 = vmatpush1.bf16.msra.mxu1 %v2415_v27  ;;  %2239 = vmatpush3.bf16.msra.mxu0 %v2434_v36  ;;  %v2440_v51 = vld [vmem:[#allocation12 + $0x20] sm:$0xff]   ;;  %v2442_v54 = vld [vmem:[#allocation12 + $0x28] sm:$0xff]   ;;  %v2444_v56 = vld [vmem:[#allocation12 + $0x30] sm:$0xff]   ;;  %s1559_s11 = scalar_lea.sflag [#allocation8], %s3759_s19  ;;  %s3339_s0 = scalar_lea.vmem %s4619_s2, 16 }
 0x4f4   : > { %1315 = vmatprep.subr.bf16.mxu1 %v2416_v28  ;;  %2240 = vmatprep.subr.bf16.mxu0 %v2435_v37  ;;  %v1200_v53 = vpack.c.bf16 %v1199_v49, %v1198_v48  ;;  %v2445_v57 = vld [vmem:[#allocation12 + $0x78] sm:$0xff]   ;;  %p3340_p6 = scmp.ne.s32.totalorder %s4619_s2, %s3339_s0  ;;  %s3465_s28 = smov [#allocation14]  }
 0x4f5   : > { %v2446_v58 = vld [vmem:[#allocation12 + $0x38] sm:$0xff]   ;;  %s3343_s18 = sshll.u32 %s3465_s28, 4  ;;  %s3344_s18 = int_to_ptr.vmem [resolvable:$false] %s3343_s18 }
 0x4f6   : > { %v1217_v62 = vld [vmem:[%s4748_s3] sm:$0x3]  ;;  %p3341_p12 = pnand %p3340_p6, %p3693_p11  ;;  %s3345_s12 = scalar_lea.vmem %s3344_s18, 32 }
 0x4f7   : > { %1316 = vmatpush1.bf16.msra.mxu1 %v2418_v29  ;;  %2241 = vmatpush3.bf16.msra.mxu0 %v2436_v40  ;;  %v1222_v0 = vrot.slane %v1217_v62, %v1221_v61  ;;  %v1226_v1 = vrot.slane %v1217_v62, %v1225_v63  ;;  %v2137_v18 = vld [vmem:[%s4749_s4] ss:$0 sm:$0xff]  ;;  %v1543_v29 = vand.u32 127, %v1219_v59  ;;  %p3346_p9 = scmp.lt.s32.totalorder %s4619_s2, %s3344_s18  ;;  %p3347_p8 = scmp.lt.s32.totalorder %s3345_s12, %s3339_s0 }
 0x4f8   : > { %1317 = vmatprep.subr.bf16.mxu1 %v2419_v30  ;;  %2242 = vmatprep.subr.bf16.mxu0 %v2437_v41  ;;  %s4752_s10 = smov %s4751_s24  ;;  %s4617_s23 = scalar_lea.hbm %s4751_s24, %s2155_s9 }
 0x4f9   : > { %v1548_v30 = vadd.s32 4294967288, %v1543_v29  ;;  %p3342_p2 = pneg %p3341_p12  ;;  %p3348_p10 = por %p3347_p8, %p3346_p9 }
 0x4fb   : > { %1318 = vmatpush1.bf16.msra.mxu1 %v2421_v32  ;;  %2243 = vmatpush3.bf16.msra.mxu0 %v2438_v46  ;;  %v1546_v32 = vsub.s32 %v1543_v29, %v1220_v60  ;;  %v1551_v33 = vsub.s32 %v1548_v30, %v1220_v60  ;;  %p3349_p1 = pnand %p3348_p10, %p3342_p2 }
 0x4fc   : > { %1319 = vmatprep.subr.bf16.mxu1 %v2422_v34  ;;  %2244 = vmatprep.subr.bf16.mxu0 %v2439_v47 }
 0x4ff   : > { %1320 = vmatpush1.bf16.msra.mxu1 %v2424_v38  ;;  %2245 = vmatpush3.bf16.msra.mxu0 %v2440_v51 }
 0x500   : > { %1321 = vmatprep.subr.bf16.mxu1 %v2425_v39  ;;  %2246 = vmatprep.subr.bf16.mxu0 %v2441_v52 }
 0x503   : > { %1322 = vmatpush1.bf16.msra.mxu1 %v2427_v42  ;;  %2247 = vmatpush3.bf16.msra.mxu0 %v2442_v54 }
 0x504   : > { %1323 = vmatprep.subr.bf16.mxu1 %v2428_v45  ;;  %2248 = vmatprep.subr.bf16.mxu0 %v2443_v55 }
 0x507   : > { %1324 = vmatpush1.bf16.msra.mxu1 %v2430_v50  ;;  %2249 = vmatpush3.bf16.msra.mxu0 %v2444_v56 }
 0x508   : > { %2250 = vmatprep.subr.bf16.mxu0 %v2445_v57 }
 0x50a   : > { %1342 = vmatmul.mubr.bf16.vlgmr.msra.gmra.mrb[0].mxu1 %v1200_v53 }
 0x50b   : > { %2251 = vmatpush3.bf16.msra.mxu0 %v2446_v58 }
 0x5dd   : > { %v1343_v2 = vpop.f32.mrb[0].mxu1 }
 0x5de   : > { %v1344_v3 = vadd.f32 %v1343_v2, %v1222_v0  ;;  %v1345_v4 = vpop.f32.mrb[1].mxu1 }
 0x5df   : > { %v1346_v5 = vadd.f32 %v1345_v4, %v1226_v1  ;;  %v1347_v6 = vpop.f32.mrb[2].mxu1 }
 0x5e0   : > { %v1348_v7 = vadd.f32 %v1347_v6, %v1222_v0  ;;  %v1349_v8 = vpop.f32.mrb[3].mxu1  ;;  %v1352_v10 = vmax.f32 %v1344_v3, 0.0 }
 0x5e1   : > { %v1350_v9 = vadd.f32 %v1349_v8, %v1226_v1  ;;  %v1353_v12 = vmax.f32 %v1346_v5, 0.0 }
 0x5e2   : > { %v1354_v11 = vmax.f32 %v1348_v7, 0.0 }
 0x5e3   : > { %v1355_v13 = vmax.f32 %v1350_v9, 0.0 }
 0x5e4   : > { %v1356_v14 = vpack.c.bf16 %v1354_v11, %v1352_v10 }
 0x5e5   : > { %v1357_v15 = vpack.c.bf16 %v1355_v13, %v1353_v12 }
 0x5e7   : > { %1525 = vmatprep.mubr.bf16.mxu0 %v1357_v15 }
 0x5e8   : > { %1526 = vmatmul.mubr.bf16.vlgmr.msra.gmra.mrb[4].mxu0 %v1356_v14 }
 0x6bb   : > { %v2252_v16 = vpop.f32.mrb[4].mxu0 }
 0x6bc   : > { %v2253_v17 = vpop.f32.mrb[5].mxu0 }
 0x6bd   : > { %v2254_v21 = vadd.f32 %v2253_v17, %v2252_v16  ;;  %v2255_v22 = vpop.f32.mrb[6].mxu0 }
 0x6be   : > { %v2256_v23 = vpop.f32.mrb[7].mxu0 }
 0x6bf   : > { %v2257_v24 = vadd.f32 %v2256_v23, %v2255_v22  ;;  %v1528_v25 = vadd.f32 %v2254_v21, %v2137_v18 }
 0x6c1   : > { %v1534_v26 = vmul.f32 %v4594_v19, %v1528_v25  ;;  %v1531_v27 = vadd.f32 %v2257_v24, %v2137_v18 }
 0x6c3   : > { %1536 = vadd.xlane.f32.xlu0 %v1534_v26  ;;  %v1535_v28 = vmul.f32 %v4596_v20, %v1531_v27 }
 0x6c7   : > { %1538 = vadd.xlane.f32.xlu0 %v1535_v28 }
 0x750   : > { %v1537_v31 = vpop.xlane.xlu0 %1536 }
 0x751   : > { %v1547_v35 = vrot.slane %v1537_v31, %v1546_v32 }
 0x754   : > { %v1539_v34 = vpop.xlane.xlu0 %1538 }
 0x755   : > { %v1552_v19 = vrot.slane %v1539_v34, %v1551_v33 }
 0x757   : > { %v1554_v20 = vsel %vm1553_vm1, %v1552_v19, %v1547_v35 }
 0x758   : > { %1557 = vst.msk [vmem:[%s4753_s14] sm:$0x1] %vm1556_vm2, %v1554_v20 }
 0x759   : > { %3352 = shalt.err (!%p3349_p1)
}
 0x75a   : > { %s3353_s19 = scalar_lea.hbm %s4617_s23, 16  ;;  %s3357_s29 = scalar_lea.hbm %s4752_s10, 64 }
 0x75b   : > { %p3354_p13 = scmp.ne.s32.totalorder %s4617_s23, %s3353_s19  ;;  %p3358_p5 = scmp.lt.u32.totalorder %s4617_s23, %s4752_s10 }
 0x75c   : > { %p3359_p4 = scmp.lt.u32.totalorder %s3357_s29, %s3353_s19  ;;  %p3361_p6 = scmp.lt.u32.totalorder %s3353_s19, %s4617_s23 }
 0x75d   : > { %p3355_p0 = pnand %p3354_p13, %p3693_p11 }
 0x75e   : > { %p3360_p3 = por %p3359_p4, %p3358_p5 }
 0x75f   : > { %p3356_p7 = pneg %p3355_p0 }
 0x760   : > { %p3362_p12 = por %p3361_p6, %p3360_p3 }
 0x762   : > { %p3363_p2 = pnand %p3362_p12, %p3356_p7 }
 0x764   : > { %3366 = shalt.err (!%p3363_p2)
}
 0x765   : > { %2292 = dma.vmem_to_hbm [thread:$0]  (%p3693_p11), %s4619_s2, 16, %s4617_s23, %s1559_s11  }
 0x766 PF: > { %s4754_s5 = sld [smem:[#allocation87_spill]]  ;;  %s4755_s6 = sld [smem:[#allocation92_spill]] }
 0x767   : > { %p2319_p9 = scmp.ge.s32.totalorder %s3449_s25, 2 }
 0x76c   : > { %s1585_s17 = sand.u32 1, %s4754_s5   ;;  %p4756_p8 = scmp.ne.s32.totalorder %s4755_s6, 0 }
 0x76d   : > { %s1586_s1 = scalar_lea.sflag [#allocation8], %s1585_s17 }
 0x76e   : > { %p2309_p10 = pnand %p2319_p9, %p4756_p8 }
 0x770   : > { %3416 = dma.done.wait (!%p2309_p10), %s1586_s1, 16  }
 0x771   : > { %3418 = vsyncadd (!%p2309_p10), %s1586_s1, 4294967280  ;;  %s31_s25 = sadd.s32 1, %s3449_s25   ;;  %s4757_s19 = sld [smem:[#allocation88_spill]] }
 0x772   : > { %p28_p1 = scmp.ge.s32.totalorder %s31_s25, 6   ;;  %s4758_s20 = sld [smem:[#allocation89_spill]] }
 0x773   : > { %s4759_s21 = sld [smem:[#allocation95_spill]]  ;;  %s4760_s22 = sld [smem:[#allocation90_spill]] }
 0x774   : > { %s4761_s23 = sld [smem:[#allocation91_spill]]  ;;  %s4762_s0 = sld [smem:[#allocation93_spill]] }
 0x775   : > { %s4763_s24 = sld [smem:[#allocation94_spill]]  ;;  %30 = sbr.rel (!%p28_p1) target bundleno = 24 (0x18), region = 310 }
 0x77c   :  { %1590 = vsyncpa [#allocation7], 1 }
 0x77d   :  { %1592 = vsyncpa [#allocation7 + $0x1], 1 }
 0x77e   :  { %1593 = vsyncpa [#allocation10], 1 }
 0x77f   :  { %1594 = vsyncpa [#allocation13], 1 }
 0x780   :  { %1595 = vsyncpa [#allocation8], 1 }
 0x781   :  { %1597 = vsyncpa [#allocation8 + $0x1], 1 }
 0x782   :  { %1598 = vsyncmov [#allocation3] }
 0x785   :  { %s1599_s15 = vpop.sfrf %1598 }
 0x786   :  { %p2158_p11 = scmp.ne.s32.totalorder %s1599_s15, 0 }
 0x788   :  { %1603 = shalt.err (%p2158_p11)  }
 0x789   :  { %1605 = vsyncmov [#allocation3 + $0x1] }
 0x78c   :  { %s1606_s3 = vpop.sfrf %1605 }
 0x78d   :  { %p2159_p13 = scmp.ne.s32.totalorder %s1606_s3, 0 }
 0x78f   :  { %1610 = shalt.err (%p2159_p13)  }

</bundles_post_ra>
